<compile_context>
chip_gen: v7x
topology: tpu7x:2x2x1
jax: 0.10.0
libtpu: 0.0.40
codegen_flags: <defaults>
</compile_context>

<pallas_src>
import functools

import jax
import jax.numpy as jnp
from jax import lax
from jax.experimental import pallas as pl
from jax.experimental.pallas import tpu as pltpu


# ----------------------------------------------------------------------------
# Stage 1: fused conv stack (runs once per sample; grid = (batch,))
# ----------------------------------------------------------------------------
def _vnet_conv_kernel(xcol_ref, w1_ref, w2_ref, w3_ref, act_ref,
                      x1_ref, col2_ref, x2_ref, col3_ref, *, dims):
    (H1, W1, C1), (H2, W2, C2), (H3, W3, C3) = dims
    f32 = jnp.float32
    K = 3  # kernel size of conv2 / conv3 (fixed by the module)

    # ---- conv1 (1 -> 16, k5, s2): one MXU matmul over host-built im2col rows.
    x1_ref[...] = jnp.dot(xcol_ref[0], w1_ref[...], preferred_element_type=f32)

    # ---- conv2 (16 -> 32, k3, s2): gather 9 taps into an im2col scratch with
    #      strided loads (no selection matmuls), then ONE matmul.
    #      Gather loop is fully static (H2*K*K = 63 tiny load/store pairs).
    for di in range(K):
        for dj in range(K):
            tap = di * K + dj
            for oh in range(H2):
                patch = x1_ref[pl.ds((2 * oh + di) * W1 + dj, W2, stride=2), :]
                col2_ref[pl.ds(oh * W2, W2), pl.ds(tap * C1, C1)] = patch
    x2_ref[...] = jnp.dot(col2_ref[...], w2_ref[...], preferred_element_type=f32)

    # ---- conv3 (32 -> 32, k3, s2): same pattern, (9, 288) im2col, ONE matmul.
    for di in range(K):
        for dj in range(K):
            tap = di * K + dj
            for oh in range(H3):
                patch = x2_ref[pl.ds((2 * oh + di) * W2 + dj, W3, stride=2), :]
                col3_ref[pl.ds(oh * W3, W3), pl.ds(tap * C2, C2)] = patch

    # Flattened activation in (H, W, C) order (torch's (C, H, W) Flatten order
    # is folded into the FC1 weight permutation done once on the host).
    act_ref[0] = jnp.dot(col3_ref[...], w3_ref[...],
                         preferred_element_type=f32).astype(act_ref.dtype)


def _conv_stage(xcol, w1m, w2m, w3m, *, dims):
    (H1, W1, C1), (H2, W2, C2), (H3, W3, C3) = dims
    N = xcol.shape[0]
    K = 3
    kernel = functools.partial(_vnet_conv_kernel, dims=dims)
    return pl.pallas_call(
        kernel,
        out_shape=jax.ShapeDtypeStruct((N, H3 * W3, C3), jnp.float32),
        grid_spec=pltpu.PrefetchScalarGridSpec(
            num_scalar_prefetch=0,
            grid=(N,),
            in_specs=[
                pl.BlockSpec((1, H1 * W1, xcol.shape[2]), lambda i: (i, 0, 0)),
                # Weights: constant index_map -> DMA'd once, stay resident.
                pl.BlockSpec(w1m.shape, lambda i: (0, 0)),
                pl.BlockSpec(w2m.shape, lambda i: (0, 0)),
                pl.BlockSpec(w3m.shape, lambda i: (0, 0)),
            ],
            out_specs=pl.BlockSpec((1, H3 * W3, C3), lambda i: (i, 0, 0)),
            scratch_shapes=[
                pltpu.VMEM((H1 * W1, C1), jnp.float32),        # conv1 output
                pltpu.VMEM((H2 * W2, K * K * C1), jnp.float32),  # conv2 im2col
                pltpu.VMEM((H2 * W2, C2), jnp.float32),        # conv2 output
                pltpu.VMEM((H3 * W3, K * K * C2), jnp.float32),  # conv3 im2col
            ],
        ),
        compiler_params=pltpu.CompilerParams(
            dimension_semantics=("parallel",),     # batch across cores on v7x
            vmem_limit_bytes=32 * 1024 * 1024),
    )(xcol, w1m, w2m, w3m)


# ----------------------------------------------------------------------------
# Stage 2: batched FC1 + Tanh + FC2, tiled over the hidden dimension
# ----------------------------------------------------------------------------
def _vnet_fc_kernel(a_ref, wfc1_ref, wfc2_ref, out_ref):
    @pl.when(pl.program_id(0) == 0)
    def _():
        out_ref[...] = jnp.zeros_like(out_ref)

    a = a_ref[...].astype(wfc1_ref.dtype)          # bf16 MXU feed (f32 accum)
    h = jnp.tanh(jnp.dot(a, wfc1_ref[...], preferred_element_type=jnp.float32))
    out_ref[...] += jnp.dot(h.astype(wfc2_ref.dtype), wfc2_ref[...],
                            preferred_element_type=jnp.float32)


def _pick_hidden_tile(hidden, max_tile=2048):
    """Largest multiple of 128 that divides `hidden` (<= max_tile)."""
    best = None
    t = 128
    while t <= min(hidden, max_tile):
        if hidden % t == 0:
            best = t
        t += 128
    # TODO(synk): at the real size (hidden=10000) no multiple-of-128 divisor
    # exists; pad the hidden dimension of wfc1/wfc2 to 10112 host-side instead
    # of falling back to a single full-hidden block.
    return best if best is not None else hidden


def _fc_stage(acts, wfc1m, wfc2m):
    N, flatsz = acts.shape
    hidden, out_dim = wfc1m.shape[0] and wfc1m.shape[1], wfc2m.shape[1]
    hidden = wfc1m.shape[1]
    th = _pick_hidden_tile(hidden)
    grid = (hidden // th,)
    return pl.pallas_call(
        _vnet_fc_kernel,
        out_shape=jax.ShapeDtypeStruct((N, out_dim), jnp.float32),
        grid_spec=pltpu.PrefetchScalarGridSpec(
            num_scalar_prefetch=0,
            grid=grid,
            in_specs=[
                pl.BlockSpec((N, flatsz), lambda j: (0, 0)),      # resident
                pl.BlockSpec((flatsz, th), lambda j: (0, j)),     # streamed
                pl.BlockSpec((th, out_dim), lambda j: (j, 0)),    # streamed
            ],
            out_specs=pl.BlockSpec((N, out_dim), lambda j: (0, 0)),
        ),
        compiler_params=pltpu.CompilerParams(
            dimension_semantics=("arbitrary",),    # reduction over hidden tiles
            vmem_limit_bytes=32 * 1024 * 1024),
    )(acts, wfc1m, wfc2m)


# ----------------------------------------------------------------------------
# Host-side glue
# ----------------------------------------------------------------------------
def _im2col_conv1(x, k, stride):
    """x: (N, 1, H, W) -> (N, Ho*Wo, k*k) with column order (di, dj)."""
    N, C, H, W = x.shape
    assert C == 1, "conv1 of VNet has a single input channel"
    Ho = (H - k) // stride + 1
    Wo = (W - k) // stride + 1
    cols = [x[:, 0,
              di:di + stride * (Ho - 1) + 1:stride,
              dj:dj + stride * (Wo - 1) + 1:stride]
            for di in range(k) for dj in range(k)]
    patches = jnp.stack(cols, axis=-1)                # (N, Ho, Wo, k*k)
    return patches.reshape(N, Ho * Wo, k * k), Ho, Wo


def vnet_forward(x, mp):
    """Fused encoder forward. `mp` = kernel-layout params of one model."""
    N = x.shape[0]
    w1m, w2m, w3m = mp["w1m"], mp["w2m"], mp["w3m"]
    wfc1m, wfc2m = mp["wfc1m"], mp["wfc2m"]

    xcol, H1, W1 = _im2col_conv1(x, k=5, stride=2)
    H2, W2 = (H1 - 3) // 2 + 1, (W1 - 3) // 2 + 1
    H3, W3 = (H2 - 3) // 2 + 1, (W2 - 3) // 2 + 1
    C1, C2, C3 = w1m.shape[1], w2m.shape[1], w3m.shape[1]
    dims = ((H1, W1, C1), (H2, W2, C2), (H3, W3, C3))

    acts = _conv_stage(xcol, w1m, w2m, w3m, dims=dims)   # (N, H3*W3, C3)
    acts = acts.reshape(N, H3 * W3 * C3)                  # (H,W,C) flatten order
    return _fc_stage(acts, wfc1m, wfc2m)                  # (N, out_dim)


# ----------------------------------------------------------------------------
# Parameters: torch-layout init + one-time kernel-layout preparation
# ----------------------------------------------------------------------------
def init_params(key, hidden, output_dim, flatsz):
    ks = jax.random.split(key, 5)
    enc = {
        "w1": jax.random.normal(ks[0], (16, 1, 5, 5), jnp.float32) * 0.10,
        "w2": jax.random.normal(ks[1], (32, 16, 3, 3), jnp.float32) * 0.05,
        "w3": jax.random.normal(ks[2], (32, 32, 3, 3), jnp.float32) * 0.05,
        "wfc1": jax.random.normal(ks[3], (hidden, flatsz), jnp.float32) * 0.02,
        "wfc2": jax.random.normal(ks[4], (output_dim, hidden), jnp.float32) * 0.02,
    }
    # encoderfrozen is a deep copy of encoder at construction -> same values.
    frozen = {k: v for k, v in enc.items()}
    return {"online": enc, "frozen": frozen}


def prepare_params(params, H3, W3, fc_dtype=jnp.bfloat16):
    """One-time re-layout of torch (OIHW / flatten-CHW) weights for the kernels.

    FC weights are cast to `fc_dtype` (bf16 by default): at the real model
    size the FC1 weight dominates HBM traffic / VMEM residency; accumulation
    stays f32 inside the kernel.
    """
    prep = {}
    for name, p in params.items():
        w1, w2, w3, wfc1, wfc2 = p["w1"], p["w2"], p["w3"], p["wfc1"], p["wfc2"]
        c1 = w1.shape[0]
        c2_in, c2 = w2.shape[1], w2.shape[0]
        c3_in, c3 = w3.shape[1], w3.shape[0]
        hidden = wfc1.shape[0]
        prep[name] = {
            # (kh*kw, cout) with cin = 1 -> column order (di, dj)
            "w1m": w1.reshape(c1, -1).T,
            # (kh*kw*cin, cout), row order (di, dj, cin) -- matches im2col cols
            "w2m": jnp.transpose(w2, (2, 3, 1, 0)).reshape(-1, c2),
            "w3m": jnp.transpose(w3, (2, 3, 1, 0)).reshape(-1, c3),
            # torch Flatten order is (C, H, W); permute FC1 rows once to the
            # kernel's (H, W, C) activation order -> (H3*W3*C3, hidden)
            "wfc1m": jnp.transpose(wfc1.reshape(hidden, c3, H3, W3),
                                   (2, 3, 1, 0)).reshape(H3 * W3 * c3,
                                                         hidden).astype(fc_dtype),
            "wfc2m": wfc2.T.astype(fc_dtype),            # (hidden, out_dim)
        }
    return prep


# ----------------------------------------------------------------------------
# Pure-JAX reference (original torch semantics, original f32 weight layout)
# ----------------------------------------------------------------------------
def vnet_forward_ref(x, p):
    dn = ("NCHW", "OIHW", "NCHW")

    def conv(v, w):
        return lax.conv_general_dilated(v, w, (2, 2), "VALID",
                                        dimension_numbers=dn)

    x3 = conv(conv(conv(x, p["w1"]), p["w2"]), p["w3"])
    flat = x3.reshape(x3.shape[0], -1)          # nn.Flatten: (C, H, W) order
    h = jnp.tanh(flat @ p["wfc1"].T)
    return h @ p["wfc2"].T


# ----------------------------------------------------------------------------
if __name__ == "__main__":
    # Small shapes consistent with the module structure:
    #   input NCHW = (2, 1, 33, 33) -> conv outputs (15,15), (7,7), (3,3)
    #   flatsz = 32*3*3 = 288, hidden = 128 (stand-in for 10000), output_dim = 32
    N, H, W = 2, 33, 33
    HIDDEN, OUTPUT_DIM = 128, 32

    H1, W1 = (H - 5) // 2 + 1, (W - 5) // 2 + 1
    H2, W2 = (H1 - 3) // 2 + 1, (W1 - 3) // 2 + 1
    H3, W3 = (H2 - 3) // 2 + 1, (W2 - 3) // 2 + 1
    flatsz = 32 * H3 * W3

    key = jax.random.PRNGKey(0)
    kx, kp = jax.random.split(key)
    x = jax.random.normal(kx, (N, 1, H, W), jnp.float32)

    params = init_params(kp, HIDDEN, OUTPUT_DIM, flatsz)
    prep = prepare_params(params, H3, W3, fc_dtype=jnp.bfloat16)

    fwd = jax.jit(vnet_forward)
    out = jax.block_until_ready(fwd(x, prep["online"]))
    out_frozen = jax.block_until_ready(fwd(x, prep["frozen"]))

    ref = vnet_forward_ref(x, params["online"])
    assert out.shape == (N, OUTPUT_DIM), out.shape
    # bf16 FC weights (f32 accumulation) -> slightly looser tolerance than f32.
    assert jnp.allclose(out, ref, rtol=2e-3, atol=2e-3), "mismatch vs JAX reference"
    assert jnp.allclose(out, out_frozen), "frozen copy should match online"

    print("KERNEL_OK")
</pallas_src>

<mosaic_0001>
module attributes {stable_mosaic.version = 11 : i64} {
  func.func @_vnet_fc_kernel(%arg0: i32, %arg1: memref<2x288xf32, #tpu.memory_space<vmem>>, %arg2: memref<288x128xbf16, #tpu.memory_space<vmem>>, %arg3: memref<128x32xbf16, #tpu.memory_space<vmem>>, %arg4: memref<2x32xf32, #tpu.memory_space<vmem>>) attributes {dimension_semantics = [#tpu.dimension_semantics<arbitrary>], iteration_bounds = array<i64: 1>, scalar_prefetch = 0 : i64, scratch_operands = 0 : i64, tpu.core_type = #tpu.core_type<tc>, window_params = [{pipeline_mode = #tpu.pipeline_mode<synchronous>, transform_indices = @transform_0, window_bounds = array<i64: 2, 288>}, {transform_indices = @transform_1, window_bounds = array<i64: 288, 128>}, {transform_indices = @transform_2, window_bounds = array<i64: 128, 32>}, {pipeline_mode = #tpu.pipeline_mode<synchronous>, transform_indices = @transform_3, window_bounds = array<i64: 2, 32>}]} {
    %c0_i32 = arith.constant 0 : i32
    %0 = arith.cmpi eq, %arg0, %c0_i32 : i32
    %1 = arith.extui %0 : i1 to i32
    %c0_i32_0 = arith.constant 0 : i32
    %2 = arith.cmpi ne, %1, %c0_i32_0 : i32
    scf.if %2 {
      %cst_11 = arith.constant 0.000000e+00 : f32
      %14 = vector.broadcast %cst_11 : f32 to vector<2x32xf32>
      %c0_12 = arith.constant 0 : index
      %c0_13 = arith.constant 0 : index
      %15 = vector.load %arg4[%c0_12, %c0_13] : memref<2x32xf32, #tpu.memory_space<vmem>>, vector<2x32xf32>
      tpu.vector_store %arg4[%c0_12, %c0_13], %14 {strides = array<i32>} : memref<2x32xf32, #tpu.memory_space<vmem>>, vector<2x32xf32>,
    } else {
    }
    %c0 = arith.constant 0 : index
    %c0_1 = arith.constant 0 : index
    %3 = vector.load %arg1[%c0, %c0_1] : memref<2x288xf32, #tpu.memory_space<vmem>>, vector<2x288xf32>
    %4 = arith.truncf %3 : vector<2x288xf32> to vector<2x288xbf16>
    %c0_2 = arith.constant 0 : index
    %c0_3 = arith.constant 0 : index
    %5 = vector.load %arg2[%c0_2, %c0_3] : memref<288x128xbf16, #tpu.memory_space<vmem>>, vector<288x128xbf16>
    %cst = arith.constant dense<0.000000e+00> : vector<2x128xf32>
    %6 = tpu.matmul %4, %5, %cst {dimension_numbers = #tpu.dot_dimension_numbers<[1], [0], [0], [1], [0, 0, 1, 1], [], []>} : vector<2x288xbf16>, vector<288x128xbf16>, vector<2x128xf32> -> vector<2x128xf32>
    %7 = math.tanh %6 : vector<2x128xf32>
    %c0_4 = arith.constant 0 : index
    %c0_5 = arith.constant 0 : index
    %8 = vector.load %arg4[%c0_4, %c0_5] : memref<2x32xf32, #tpu.memory_space<vmem>>, vector<2x32xf32>
    %9 = arith.truncf %7 : vector<2x128xf32> to vector<2x128xbf16>
    %c0_6 = arith.constant 0 : index
    %c0_7 = arith.constant 0 : index
    %10 = vector.load %arg3[%c0_6, %c0_7] : memref<128x32xbf16, #tpu.memory_space<vmem>>, vector<128x32xbf16>
    %cst_8 = arith.constant dense<0.000000e+00> : vector<2x32xf32>
    %11 = tpu.matmul %9, %10, %cst_8 {dimension_numbers = #tpu.dot_dimension_numbers<[1], [0], [0], [1], [0, 0, 1, 1], [], []>} : vector<2x128xbf16>, vector<128x32xbf16>, vector<2x32xf32> -> vector<2x32xf32>
    %12 = arith.addf %8, %11 : vector<2x32xf32>
    %c0_9 = arith.constant 0 : index
    %c0_10 = arith.constant 0 : index
    %13 = vector.load %arg4[%c0_9, %c0_10] : memref<2x32xf32, #tpu.memory_space<vmem>>, vector<2x32xf32>
    tpu.vector_store %arg4[%c0_9, %c0_10], %12 {strides = array<i32>} : memref<2x32xf32, #tpu.memory_space<vmem>>, vector<2x32xf32>,
    return
  }
  func.func @transform_0(%arg0: i32) -> (i32, i32) {
    %c0_i32 = arith.constant 0 : i32
    %c0_i32_0 = arith.constant 0 : i32
    %c0_i32_1 = arith.constant 0 : i32
    return %c0_i32, %c0_i32_0 : i32, i32
  }
  func.func @transform_1(%arg0: i32) -> (i32, i32) {
    %c0_i32 = arith.constant 0 : i32
    %c0_i32_0 = arith.constant 0 : i32
    return %c0_i32, %arg0 : i32, i32
  }
  func.func @transform_2(%arg0: i32) -> (i32, i32) {
    %c0_i32 = arith.constant 0 : i32
    %c0_i32_0 = arith.constant 0 : i32
    return %arg0, %c0_i32 : i32, i32
  }
  func.func @transform_3(%arg0: i32) -> (i32, i32) {
    %c0_i32 = arith.constant 0 : i32
    %c0_i32_0 = arith.constant 0 : i32
    %c0_i32_1 = arith.constant 0 : i32
    return %c0_i32, %c0_i32_0 : i32, i32
  }
}

module attributes {stable_mosaic.version = 11 : i64} {
  func.func @_vnet_conv_kernel(%arg0: i32, %arg1: memref<1x225x25xf32, #tpu.memory_space<vmem>>, %arg2: memref<25x16xf32, #tpu.memory_space<vmem>>, %arg3: memref<144x32xf32, #tpu.memory_space<vmem>>, %arg4: memref<288x32xf32, #tpu.memory_space<vmem>>, %arg5: memref<1x9x32xf32, #tpu.memory_space<vmem>>, %arg6: memref<225x16xf32, #tpu.memory_space<vmem>>, %arg7: memref<49x144xf32, #tpu.memory_space<vmem>>, %arg8: memref<49x32xf32, #tpu.memory_space<vmem>>, %arg9: memref<9x288xf32, #tpu.memory_space<vmem>>) attributes {dimension_semantics = [#tpu.dimension_semantics<parallel>], iteration_bounds = array<i64: 2>, scalar_prefetch = 0 : i64, scratch_operands = 4 : i64, tpu.core_type = #tpu.core_type<tc>, window_params = [{transform_indices = @transform_0, window_bounds = array<i64: 1, 225, 25>}, {pipeline_mode = #tpu.pipeline_mode<synchronous>, transform_indices = @transform_1, window_bounds = array<i64: 25, 16>}, {pipeline_mode = #tpu.pipeline_mode<synchronous>, transform_indices = @transform_2, window_bounds = array<i64: 144, 32>}, {pipeline_mode = #tpu.pipeline_mode<synchronous>, transform_indices = @transform_3, window_bounds = array<i64: 288, 32>}, {transform_indices = @transform_4, window_bounds = array<i64: 1, 9, 32>}]} {
    %c0 = arith.constant 0 : index
    %c0_0 = arith.constant 0 : index
    %c0_1 = arith.constant 0 : index
    %0 = vector.load %arg1[%c0, %c0_0, %c0_1] : memref<1x225x25xf32, #tpu.memory_space<vmem>>, vector<1x225x25xf32>
    %1 = vector.shape_cast %0 : vector<1x225x25xf32> to vector<225x25xf32>
    %c0_2 = arith.constant 0 : index
    %c0_3 = arith.constant 0 : index
    %2 = vector.load %arg2[%c0_2, %c0_3] : memref<25x16xf32, #tpu.memory_space<vmem>>, vector<25x16xf32>
    %cst = arith.constant dense<0.000000e+00> : vector<225x16xf32>
    %3 = tpu.matmul %1, %2, %cst {dimension_numbers = #tpu.dot_dimension_numbers<[1], [0], [0], [1], [0, 0, 1, 1], [], []>} : vector<225x25xf32>, vector<25x16xf32>, vector<225x16xf32> -> vector<225x16xf32>
    %c0_4 = arith.constant 0 : index
    %c0_5 = arith.constant 0 : index
    %4 = vector.load %arg6[%c0_4, %c0_5] : memref<225x16xf32, #tpu.memory_space<vmem>>, vector<225x16xf32>
    tpu.vector_store %arg6[%c0_4, %c0_5], %3 {strides = array<i32>} : memref<225x16xf32, #tpu.memory_space<vmem>>, vector<225x16xf32>,
    %c0_6 = arith.constant 0 : index
    %c0_7 = arith.constant 0 : index
    %5 = tpu.strided_load %arg6[%c0_6, %c0_7] {strides = array<i32: 2, 1>} : memref<225x16xf32, #tpu.memory_space<vmem>>, vector<7x16xf32>
    %c0_8 = arith.constant 0 : index
    %c0_9 = arith.constant 0 : index
    %6 = vector.load %arg7[%c0_8, %c0_9] : memref<49x144xf32, #tpu.memory_space<vmem>>, vector<7x16xf32>
    tpu.vector_store %arg7[%c0_8, %c0_9], %5 {strides = array<i32>} : memref<49x144xf32, #tpu.memory_space<vmem>>, vector<7x16xf32>,
    %c30 = arith.constant 30 : index
    %c0_10 = arith.constant 0 : index
    %7 = tpu.strided_load %arg6[%c30, %c0_10] {strides = array<i32: 2, 1>} : memref<225x16xf32, #tpu.memory_space<vmem>>, vector<7x16xf32>
    %c7 = arith.constant 7 : index
    %c0_11 = arith.constant 0 : index
    %8 = vector.load %arg7[%c7, %c0_11] : memref<49x144xf32, #tpu.memory_space<vmem>>, vector<7x16xf32>
    tpu.vector_store %arg7[%c7, %c0_11], %7 {strides = array<i32>} : memref<49x144xf32, #tpu.memory_space<vmem>>, vector<7x16xf32>,
    %c60 = arith.constant 60 : index
    %c0_12 = arith.constant 0 : index
    %9 = tpu.strided_load %arg6[%c60, %c0_12] {strides = array<i32: 2, 1>} : memref<225x16xf32, #tpu.memory_space<vmem>>, vector<7x16xf32>
    %c14 = arith.constant 14 : index
    %c0_13 = arith.constant 0 : index
    %10 = vector.load %arg7[%c14, %c0_13] : memref<49x144xf32, #tpu.memory_space<vmem>>, vector<7x16xf32>
    tpu.vector_store %arg7[%c14, %c0_13], %9 {strides = array<i32>} : memref<49x144xf32, #tpu.memory_space<vmem>>, vector<7x16xf32>,
    %c90 = arith.constant 90 : index
    %c0_14 = arith.constant 0 : index
    %11 = tpu.strided_load %arg6[%c90, %c0_14] {strides = array<i32: 2, 1>} : memref<225x16xf32, #tpu.memory_space<vmem>>, vector<7x16xf32>
    %c21 = arith.constant 21 : index
    %c0_15 = arith.constant 0 : index
    %12 = vector.load %arg7[%c21, %c0_15] : memref<49x144xf32, #tpu.memory_space<vmem>>, vector<7x16xf32>
    tpu.vector_store %arg7[%c21, %c0_15], %11 {strides = array<i32>} : memref<49x144xf32, #tpu.memory_space<vmem>>, vector<7x16xf32>,
    %c120 = arith.constant 120 : index
    %c0_16 = arith.constant 0 : index
    %13 = tpu.strided_load %arg6[%c120, %c0_16] {strides = array<i32: 2, 1>} : memref<225x16xf32, #tpu.memory_space<vmem>>, vector<7x16xf32>
    %c28 = arith.constant 28 : index
    %c0_17 = arith.constant 0 : index
    %14 = vector.load %arg7[%c28, %c0_17] : memref<49x144xf32, #tpu.memory_space<vmem>>, vector<7x16xf32>
    tpu.vector_store %arg7[%c28, %c0_17], %13 {strides = array<i32>} : memref<49x144xf32, #tpu.memory_space<vmem>>, vector<7x16xf32>,
    %c150 = arith.constant 150 : index
    %c0_18 = arith.constant 0 : index
    %15 = tpu.strided_load %arg6[%c150, %c0_18] {strides = array<i32: 2, 1>} : memref<225x16xf32, #tpu.memory_space<vmem>>, vector<7x16xf32>
    %c35 = arith.constant 35 : index
    %c0_19 = arith.constant 0 : index
    %16 = vector.load %arg7[%c35, %c0_19] : memref<49x144xf32, #tpu.memory_space<vmem>>, vector<7x16xf32>
    tpu.vector_store %arg7[%c35, %c0_19], %15 {strides = array<i32>} : memref<49x144xf32, #tpu.memory_space<vmem>>, vector<7x16xf32>,
    %c180 = arith.constant 180 : index
    %c0_20 = arith.constant 0 : index
    %17 = tpu.strided_load %arg6[%c180, %c0_20] {strides = array<i32: 2, 1>} : memref<225x16xf32, #tpu.memory_space<vmem>>, vector<7x16xf32>
    %c42 = arith.constant 42 : index
    %c0_21 = arith.constant 0 : index
    %18 = vector.load %arg7[%c42, %c0_21] : memref<49x144xf32, #tpu.memory_space<vmem>>, vector<7x16xf32>
    tpu.vector_store %arg7[%c42, %c0_21], %17 {strides = array<i32>} : memref<49x144xf32, #tpu.memory_space<vmem>>, vector<7x16xf32>,
    %c1 = arith.constant 1 : index
    %c0_22 = arith.constant 0 : index
    %19 = tpu.strided_load %arg6[%c1, %c0_22] {strides = array<i32: 2, 1>} : memref<225x16xf32, #tpu.memory_space<vmem>>, vector<7x16xf32>
    %c0_23 = arith.constant 0 : index
    %c16 = arith.constant 16 : index
    %20 = vector.load %arg7[%c0_23, %c16] : memref<49x144xf32, #tpu.memory_space<vmem>>, vector<7x16xf32>
    tpu.vector_store %arg7[%c0_23, %c16], %19 {strides = array<i32>} : memref<49x144xf32, #tpu.memory_space<vmem>>, vector<7x16xf32>,
    %c31 = arith.constant 31 : index
    %c0_24 = arith.constant 0 : index
    %21 = tpu.strided_load %arg6[%c31, %c0_24] {strides = array<i32: 2, 1>} : memref<225x16xf32, #tpu.memory_space<vmem>>, vector<7x16xf32>
    %c7_25 = arith.constant 7 : index
    %c16_26 = arith.constant 16 : index
    %22 = vector.load %arg7[%c7_25, %c16_26] : memref<49x144xf32, #tpu.memory_space<vmem>>, vector<7x16xf32>
    tpu.vector_store %arg7[%c7_25, %c16_26], %21 {strides = array<i32>} : memref<49x144xf32, #tpu.memory_space<vmem>>, vector<7x16xf32>,
    %c61 = arith.constant 61 : index
    %c0_27 = arith.constant 0 : index
    %23 = tpu.strided_load %arg6[%c61, %c0_27] {strides = array<i32: 2, 1>} : memref<225x16xf32, #tpu.memory_space<vmem>>, vector<7x16xf32>
    %c14_28 = arith.constant 14 : index
    %c16_29 = arith.constant 16 : index
    %24 = vector.load %arg7[%c14_28, %c16_29] : memref<49x144xf32, #tpu.memory_space<vmem>>, vector<7x16xf32>
    tpu.vector_store %arg7[%c14_28, %c16_29], %23 {strides = array<i32>} : memref<49x144xf32, #tpu.memory_space<vmem>>, vector<7x16xf32>,
    %c91 = arith.constant 91 : index
    %c0_30 = arith.constant 0 : index
    %25 = tpu.strided_load %arg6[%c91, %c0_30] {strides = array<i32: 2, 1>} : memref<225x16xf32, #tpu.memory_space<vmem>>, vector<7x16xf32>
    %c21_31 = arith.constant 21 : index
    %c16_32 = arith.constant 16 : index
    %26 = vector.load %arg7[%c21_31, %c16_32] : memref<49x144xf32, #tpu.memory_space<vmem>>, vector<7x16xf32>
    tpu.vector_store %arg7[%c21_31, %c16_32], %25 {strides = array<i32>} : memref<49x144xf32, #tpu.memory_space<vmem>>, vector<7x16xf32>,
    %c121 = arith.constant 121 : index
    %c0_33 = arith.constant 0 : index
    %27 = tpu.strided_load %arg6[%c121, %c0_33] {strides = array<i32: 2, 1>} : memref<225x16xf32, #tpu.memory_space<vmem>>, vector<7x16xf32>
    %c28_34 = arith.constant 28 : index
    %c16_35 = arith.constant 16 : index
    %28 = vector.load %arg7[%c28_34, %c16_35] : memref<49x144xf32, #tpu.memory_space<vmem>>, vector<7x16xf32>
    tpu.vector_store %arg7[%c28_34, %c16_35], %27 {strides = array<i32>} : memref<49x144xf32, #tpu.memory_space<vmem>>, vector<7x16xf32>,
    %c151 = arith.constant 151 : index
    %c0_36 = arith.constant 0 : index
    %29 = tpu.strided_load %arg6[%c151, %c0_36] {strides = array<i32: 2, 1>} : memref<225x16xf32, #tpu.memory_space<vmem>>, vector<7x16xf32>
    %c35_37 = arith.constant 35 : index
    %c16_38 = arith.constant 16 : index
    %30 = vector.load %arg7[%c35_37, %c16_38] : memref<49x144xf32, #tpu.memory_space<vmem>>, vector<7x16xf32>
    tpu.vector_store %arg7[%c35_37, %c16_38], %29 {strides = array<i32>} : memref<49x144xf32, #tpu.memory_space<vmem>>, vector<7x16xf32>,
    %c181 = arith.constant 181 : index
    %c0_39 = arith.constant 0 : index
    %31 = tpu.strided_load %arg6[%c181, %c0_39] {strides = array<i32: 2, 1>} : memref<225x16xf32, #tpu.memory_space<vmem>>, vector<7x16xf32>
    %c42_40 = arith.constant 42 : index
    %c16_41 = arith.constant 16 : index
    %32 = vector.load %arg7[%c42_40, %c16_41] : memref<49x144xf32, #tpu.memory_space<vmem>>, vector<7x16xf32>
    tpu.vector_store %arg7[%c42_40, %c16_41], %31 {strides = array<i32>} : memref<49x144xf32, #tpu.memory_space<vmem>>, vector<7x16xf32>,
    %c2 = arith.constant 2 : index
    %c0_42 = arith.constant 0 : index
    %33 = tpu.strided_load %arg6[%c2, %c0_42] {strides = array<i32: 2, 1>} : memref<225x16xf32, #tpu.memory_space<vmem>>, vector<7x16xf32>
    %c0_43 = arith.constant 0 : index
    %c32 = arith.constant 32 : index
    %34 = vector.load %arg7[%c0_43, %c32] : memref<49x144xf32, #tpu.memory_space<vmem>>, vector<7x16xf32>
    tpu.vector_store %arg7[%c0_43, %c32], %33 {strides = array<i32>} : memref<49x144xf32, #tpu.memory_space<vmem>>, vector<7x16xf32>,
    %c32_44 = arith.constant 32 : index
    %c0_45 = arith.constant 0 : index
    %35 = tpu.strided_load %arg6[%c32_44, %c0_45] {strides = array<i32: 2, 1>} : memref<225x16xf32, #tpu.memory_space<vmem>>, vector<7x16xf32>
    %c7_46 = arith.constant 7 : index
    %c32_47 = arith.constant 32 : index
    %36 = vector.load %arg7[%c7_46, %c32_47] : memref<49x144xf32, #tpu.memory_space<vmem>>, vector<7x16xf32>
    tpu.vector_store %arg7[%c7_46, %c32_47], %35 {strides = array<i32>} : memref<49x144xf32, #tpu.memory_space<vmem>>, vector<7x16xf32>,
    %c62 = arith.constant 62 : index
    %c0_48 = arith.constant 0 : index
    %37 = tpu.strided_load %arg6[%c62, %c0_48] {strides = array<i32: 2, 1>} : memref<225x16xf32, #tpu.memory_space<vmem>>, vector<7x16xf32>
    %c14_49 = arith.constant 14 : index
    %c32_50 = arith.constant 32 : index
    %38 = vector.load %arg7[%c14_49, %c32_50] : memref<49x144xf32, #tpu.memory_space<vmem>>, vector<7x16xf32>
    tpu.vector_store %arg7[%c14_49, %c32_50], %37 {strides = array<i32>} : memref<49x144xf32, #tpu.memory_space<vmem>>, vector<7x16xf32>,
    %c92 = arith.constant 92 : index
    %c0_51 = arith.constant 0 : index
    %39 = tpu.strided_load %arg6[%c92, %c0_51] {strides = array<i32: 2, 1>} : memref<225x16xf32, #tpu.memory_space<vmem>>, vector<7x16xf32>
    %c21_52 = arith.constant 21 : index
    %c32_53 = arith.constant 32 : index
    %40 = vector.load %arg7[%c21_52, %c32_53] : memref<49x144xf32, #tpu.memory_space<vmem>>, vector<7x16xf32>
    tpu.vector_store %arg7[%c21_52, %c32_53], %39 {strides = array<i32>} : memref<49x144xf32, #tpu.memory_space<vmem>>, vector<7x16xf32>,
    %c122 = arith.constant 122 : index
    %c0_54 = arith.constant 0 : index
    %41 = tpu.strided_load %arg6[%c122, %c0_54] {strides = array<i32: 2, 1>} : memref<225x16xf32, #tpu.memory_space<vmem>>, vector<7x16xf32>
    %c28_55 = arith.constant 28 : index
    %c32_56 = arith.constant 32 : index
    %42 = vector.load %arg7[%c28_55, %c32_56] : memref<49x144xf32, #tpu.memory_space<vmem>>, vector<7x16xf32>
    tpu.vector_store %arg7[%c28_55, %c32_56], %41 {strides = array<i32>} : memref<49x144xf32, #tpu.memory_space<vmem>>, vector<7x16xf32>,
    %c152 = arith.constant 152 : index
    %c0_57 = arith.constant 0 : index
    %43 = tpu.strided_load %arg6[%c152, %c0_57] {strides = array<i32: 2, 1>} : memref<225x16xf32, #tpu.memory_space<vmem>>, vector<7x16xf32>
    %c35_58 = arith.constant 35 : index
    %c32_59 = arith.constant 32 : index
    %44 = vector.load %arg7[%c35_58, %c32_59] : memref<49x144xf32, #tpu.memory_space<vmem>>, vector<7x16xf32>
    tpu.vector_store %arg7[%c35_58, %c32_59], %43 {strides = array<i32>} : memref<49x144xf32, #tpu.memory_space<vmem>>, vector<7x16xf32>,
    %c182 = arith.constant 182 : index
    %c0_60 = arith.constant 0 : index
    %45 = tpu.strided_load %arg6[%c182, %c0_60] {strides = array<i32: 2, 1>} : memref<225x16xf32, #tpu.memory_space<vmem>>, vector<7x16xf32>
    %c42_61 = arith.constant 42 : index
    %c32_62 = arith.constant 32 : index
    %46 = vector.load %arg7[%c42_61, %c32_62] : memref<49x144xf32, #tpu.memory_space<vmem>>, vector<7x16xf32>
    tpu.vector_store %arg7[%c42_61, %c32_62], %45 {strides = array<i32>} : memref<49x144xf32, #tpu.memory_space<vmem>>, vector<7x16xf32>,
    %c15 = arith.constant 15 : index
    %c0_63 = arith.constant 0 : index
    %47 = tpu.strided_load %arg6[%c15, %c0_63] {strides = array<i32: 2, 1>} : memref<225x16xf32, #tpu.memory_space<vmem>>, vector<7x16xf32>
    %c0_64 = arith.constant 0 : index
    %c48 = arith.constant 48 : index
    %48 = vector.load %arg7[%c0_64, %c48] : memref<49x144xf32, #tpu.memory_space<vmem>>, vector<7x16xf32>
    tpu.vector_store %arg7[%c0_64, %c48], %47 {strides = array<i32>} : memref<49x144xf32, #tpu.memory_space<vmem>>, vector<7x16xf32>,
    %c45 = arith.constant 45 : index
    %c0_65 = arith.constant 0 : index
    %49 = tpu.strided_load %arg6[%c45, %c0_65] {strides = array<i32: 2, 1>} : memref<225x16xf32, #tpu.memory_space<vmem>>, vector<7x16xf32>
    %c7_66 = arith.constant 7 : index
    %c48_67 = arith.constant 48 : index
    %50 = vector.load %arg7[%c7_66, %c48_67] : memref<49x144xf32, #tpu.memory_space<vmem>>, vector<7x16xf32>
    tpu.vector_store %arg7[%c7_66, %c48_67], %49 {strides = array<i32>} : memref<49x144xf32, #tpu.memory_space<vmem>>, vector<7x16xf32>,
    %c75 = arith.constant 75 : index
    %c0_68 = arith.constant 0 : index
    %51 = tpu.strided_load %arg6[%c75, %c0_68] {strides = array<i32: 2, 1>} : memref<225x16xf32, #tpu.memory_space<vmem>>, vector<7x16xf32>
    %c14_69 = arith.constant 14 : index
    %c48_70 = arith.constant 48 : index
    %52 = vector.load %arg7[%c14_69, %c48_70] : memref<49x144xf32, #tpu.memory_space<vmem>>, vector<7x16xf32>
    tpu.vector_store %arg7[%c14_69, %c48_70], %51 {strides = array<i32>} : memref<49x144xf32, #tpu.memory_space<vmem>>, vector<7x16xf32>,
    %c105 = arith.constant 105 : index
    %c0_71 = arith.constant 0 : index
    %53 = tpu.strided_load %arg6[%c105, %c0_71] {strides = array<i32: 2, 1>} : memref<225x16xf32, #tpu.memory_space<vmem>>, vector<7x16xf32>
    %c21_72 = arith.constant 21 : index
    %c48_73 = arith.constant 48 : index
    %54 = vector.load %arg7[%c21_72, %c48_73] : memref<49x144xf32, #tpu.memory_space<vmem>>, vector<7x16xf32>
    tpu.vector_store %arg7[%c21_72, %c48_73], %53 {strides = array<i32>} : memref<49x144xf32, #tpu.memory_space<vmem>>, vector<7x16xf32>,
    %c135 = arith.constant 135 : index
    %c0_74 = arith.constant 0 : index
    %55 = tpu.strided_load %arg6[%c135, %c0_74] {strides = array<i32: 2, 1>} : memref<225x16xf32, #tpu.memory_space<vmem>>, vector<7x16xf32>
    %c28_75 = arith.constant 28 : index
    %c48_76 = arith.constant 48 : index
    %56 = vector.load %arg7[%c28_75, %c48_76] : memref<49x144xf32, #tpu.memory_space<vmem>>, vector<7x16xf32>
    tpu.vector_store %arg7[%c28_75, %c48_76], %55 {strides = array<i32>} : memref<49x144xf32, #tpu.memory_space<vmem>>, vector<7x16xf32>,
    %c165 = arith.constant 165 : index
    %c0_77 = arith.constant 0 : index
    %57 = tpu.strided_load %arg6[%c165, %c0_77] {strides = array<i32: 2, 1>} : memref<225x16xf32, #tpu.memory_space<vmem>>, vector<7x16xf32>
    %c35_78 = arith.constant 35 : index
    %c48_79 = arith.constant 48 : index
    %58 = vector.load %arg7[%c35_78, %c48_79] : memref<49x144xf32, #tpu.memory_space<vmem>>, vector<7x16xf32>
    tpu.vector_store %arg7[%c35_78, %c48_79], %57 {strides = array<i32>} : memref<49x144xf32, #tpu.memory_space<vmem>>, vector<7x16xf32>,
    %c195 = arith.constant 195 : index
    %c0_80 = arith.constant 0 : index
    %59 = tpu.strided_load %arg6[%c195, %c0_80] {strides = array<i32: 2, 1>} : memref<225x16xf32, #tpu.memory_space<vmem>>, vector<7x16xf32>
    %c42_81 = arith.constant 42 : index
    %c48_82 = arith.constant 48 : index
    %60 = vector.load %arg7[%c42_81, %c48_82] : memref<49x144xf32, #tpu.memory_space<vmem>>, vector<7x16xf32>
    tpu.vector_store %arg7[%c42_81, %c48_82], %59 {strides = array<i32>} : memref<49x144xf32, #tpu.memory_space<vmem>>, vector<7x16xf32>,
    %c16_83 = arith.constant 16 : index
    %c0_84 = arith.constant 0 : index
    %61 = tpu.strided_load %arg6[%c16_83, %c0_84] {strides = array<i32: 2, 1>} : memref<225x16xf32, #tpu.memory_space<vmem>>, vector<7x16xf32>
    %c0_85 = arith.constant 0 : index
    %c64 = arith.constant 64 : index
    %62 = vector.load %arg7[%c0_85, %c64] : memref<49x144xf32, #tpu.memory_space<vmem>>, vector<7x16xf32>
    tpu.vector_store %arg7[%c0_85, %c64], %61 {strides = array<i32>} : memref<49x144xf32, #tpu.memory_space<vmem>>, vector<7x16xf32>,
    %c46 = arith.constant 46 : index
    %c0_86 = arith.constant 0 : index
    %63 = tpu.strided_load %arg6[%c46, %c0_86] {strides = array<i32: 2, 1>} : memref<225x16xf32, #tpu.memory_space<vmem>>, vector<7x16xf32>
    %c7_87 = arith.constant 7 : index
    %c64_88 = arith.constant 64 : index
    %64 = vector.load %arg7[%c7_87, %c64_88] : memref<49x144xf32, #tpu.memory_space<vmem>>, vector<7x16xf32>
    tpu.vector_store %arg7[%c7_87, %c64_88], %63 {strides = array<i32>} : memref<49x144xf32, #tpu.memory_space<vmem>>, vector<7x16xf32>,
    %c76 = arith.constant 76 : index
    %c0_89 = arith.constant 0 : index
    %65 = tpu.strided_load %arg6[%c76, %c0_89] {strides = array<i32: 2, 1>} : memref<225x16xf32, #tpu.memory_space<vmem>>, vector<7x16xf32>
    %c14_90 = arith.constant 14 : index
    %c64_91 = arith.constant 64 : index
    %66 = vector.load %arg7[%c14_90, %c64_91] : memref<49x144xf32, #tpu.memory_space<vmem>>, vector<7x16xf32>
    tpu.vector_store %arg7[%c14_90, %c64_91], %65 {strides = array<i32>} : memref<49x144xf32, #tpu.memory_space<vmem>>, vector<7x16xf32>,
    %c106 = arith.constant 106 : index
    %c0_92 = arith.constant 0 : index
    %67 = tpu.strided_load %arg6[%c106, %c0_92] {strides = array<i32: 2, 1>} : memref<225x16xf32, #tpu.memory_space<vmem>>, vector<7x16xf32>
    %c21_93 = arith.constant 21 : index
    %c64_94 = arith.constant 64 : index
    %68 = vector.load %arg7[%c21_93, %c64_94] : memref<49x144xf32, #tpu.memory_space<vmem>>, vector<7x16xf32>
    tpu.vector_store %arg7[%c21_93, %c64_94], %67 {strides = array<i32>} : memref<49x144xf32, #tpu.memory_space<vmem>>, vector<7x16xf32>,
    %c136 = arith.constant 136 : index
    %c0_95 = arith.constant 0 : index
    %69 = tpu.strided_load %arg6[%c136, %c0_95] {strides = array<i32: 2, 1>} : memref<225x16xf32, #tpu.memory_space<vmem>>, vector<7x16xf32>
    %c28_96 = arith.constant 28 : index
    %c64_97 = arith.constant 64 : index
    %70 = vector.load %arg7[%c28_96, %c64_97] : memref<49x144xf32, #tpu.memory_space<vmem>>, vector<7x16xf32>
    tpu.vector_store %arg7[%c28_96, %c64_97], %69 {strides = array<i32>} : memref<49x144xf32, #tpu.memory_space<vmem>>, vector<7x16xf32>,
    %c166 = arith.constant 166 : index
    %c0_98 = arith.constant 0 : index
    %71 = tpu.strided_load %arg6[%c166, %c0_98] {strides = array<i32: 2, 1>} : memref<225x16xf32, #tpu.memory_space<vmem>>, vector<7x16xf32>
    %c35_99 = arith.constant 35 : index
    %c64_100 = arith.constant 64 : index
    %72 = vector.load %arg7[%c35_99, %c64_100] : memref<49x144xf32, #tpu.memory_space<vmem>>, vector<7x16xf32>
    tpu.vector_store %arg7[%c35_99, %c64_100], %71 {strides = array<i32>} : memref<49x144xf32, #tpu.memory_space<vmem>>, vector<7x16xf32>,
    %c196 = arith.constant 196 : index
    %c0_101 = arith.constant 0 : index
    %73 = tpu.strided_load %arg6[%c196, %c0_101] {strides = array<i32: 2, 1>} : memref<225x16xf32, #tpu.memory_space<vmem>>, vector<7x16xf32>
    %c42_102 = arith.constant 42 : index
    %c64_103 = arith.constant 64 : index
    %74 = vector.load %arg7[%c42_102, %c64_103] : memref<49x144xf32, #tpu.memory_space<vmem>>, vector<7x16xf32>
    tpu.vector_store %arg7[%c42_102, %c64_103], %73 {strides = array<i32>} : memref<49x144xf32, #tpu.memory_space<vmem>>, vector<7x16xf32>,
    %c17 = arith.constant 17 : index
    %c0_104 = arith.constant 0 : index
    %75 = tpu.strided_load %arg6[%c17, %c0_104] {strides = array<i32: 2, 1>} : memref<225x16xf32, #tpu.memory_space<vmem>>, vector<7x16xf32>
    %c0_105 = arith.constant 0 : index
    %c80 = arith.constant 80 : index
    %76 = vector.load %arg7[%c0_105, %c80] : memref<49x144xf32, #tpu.memory_space<vmem>>, vector<7x16xf32>
    tpu.vector_store %arg7[%c0_105, %c80], %75 {strides = array<i32>} : memref<49x144xf32, #tpu.memory_space<vmem>>, vector<7x16xf32>,
    %c47 = arith.constant 47 : index
    %c0_106 = arith.constant 0 : index
    %77 = tpu.strided_load %arg6[%c47, %c0_106] {strides = array<i32: 2, 1>} : memref<225x16xf32, #tpu.memory_space<vmem>>, vector<7x16xf32>
    %c7_107 = arith.constant 7 : index
    %c80_108 = arith.constant 80 : index
    %78 = vector.load %arg7[%c7_107, %c80_108] : memref<49x144xf32, #tpu.memory_space<vmem>>, vector<7x16xf32>
    tpu.vector_store %arg7[%c7_107, %c80_108], %77 {strides = array<i32>} : memref<49x144xf32, #tpu.memory_space<vmem>>, vector<7x16xf32>,
    %c77 = arith.constant 77 : index
    %c0_109 = arith.constant 0 : index
    %79 = tpu.strided_load %arg6[%c77, %c0_109] {strides = array<i32: 2, 1>} : memref<225x16xf32, #tpu.memory_space<vmem>>, vector<7x16xf32>
    %c14_110 = arith.constant 14 : index
    %c80_111 = arith.constant 80 : index
    %80 = vector.load %arg7[%c14_110, %c80_111] : memref<49x144xf32, #tpu.memory_space<vmem>>, vector<7x16xf32>
    tpu.vector_store %arg7[%c14_110, %c80_111], %79 {strides = array<i32>} : memref<49x144xf32, #tpu.memory_space<vmem>>, vector<7x16xf32>,
    %c107 = arith.constant 107 : index
    %c0_112 = arith.constant 0 : index
    %81 = tpu.strided_load %arg6[%c107, %c0_112] {strides = array<i32: 2, 1>} : memref<225x16xf32, #tpu.memory_space<vmem>>, vector<7x16xf32>
    %c21_113 = arith.constant 21 : index
    %c80_114 = arith.constant 80 : index
    %82 = vector.load %arg7[%c21_113, %c80_114] : memref<49x144xf32, #tpu.memory_space<vmem>>, vector<7x16xf32>
    tpu.vector_store %arg7[%c21_113, %c80_114], %81 {strides = array<i32>} : memref<49x144xf32, #tpu.memory_space<vmem>>, vector<7x16xf32>,
    %c137 = arith.constant 137 : index
    %c0_115 = arith.constant 0 : index
    %83 = tpu.strided_load %arg6[%c137, %c0_115] {strides = array<i32: 2, 1>} : memref<225x16xf32, #tpu.memory_space<vmem>>, vector<7x16xf32>
    %c28_116 = arith.constant 28 : index
    %c80_117 = arith.constant 80 : index
    %84 = vector.load %arg7[%c28_116, %c80_117] : memref<49x144xf32, #tpu.memory_space<vmem>>, vector<7x16xf32>
    tpu.vector_store %arg7[%c28_116, %c80_117], %83 {strides = array<i32>} : memref<49x144xf32, #tpu.memory_space<vmem>>, vector<7x16xf32>,
    %c167 = arith.constant 167 : index
    %c0_118 = arith.constant 0 : index
    %85 = tpu.strided_load %arg6[%c167, %c0_118] {strides = array<i32: 2, 1>} : memref<225x16xf32, #tpu.memory_space<vmem>>, vector<7x16xf32>
    %c35_119 = arith.constant 35 : index
    %c80_120 = arith.constant 80 : index
    %86 = vector.load %arg7[%c35_119, %c80_120] : memref<49x144xf32, #tpu.memory_space<vmem>>, vector<7x16xf32>
    tpu.vector_store %arg7[%c35_119, %c80_120], %85 {strides = array<i32>} : memref<49x144xf32, #tpu.memory_space<vmem>>, vector<7x16xf32>,
    %c197 = arith.constant 197 : index
    %c0_121 = arith.constant 0 : index
    %87 = tpu.strided_load %arg6[%c197, %c0_121] {strides = array<i32: 2, 1>} : memref<225x16xf32, #tpu.memory_space<vmem>>, vector<7x16xf32>
    %c42_122 = arith.constant 42 : index
    %c80_123 = arith.constant 80 : index
    %88 = vector.load %arg7[%c42_122, %c80_123] : memref<49x144xf32, #tpu.memory_space<vmem>>, vector<7x16xf32>
    tpu.vector_store %arg7[%c42_122, %c80_123], %87 {strides = array<i32>} : memref<49x144xf32, #tpu.memory_space<vmem>>, vector<7x16xf32>,
    %c30_124 = arith.constant 30 : index
    %c0_125 = arith.constant 0 : index
    %89 = tpu.strided_load %arg6[%c30_124, %c0_125] {strides = array<i32: 2, 1>} : memref<225x16xf32, #tpu.memory_space<vmem>>, vector<7x16xf32>
    %c0_126 = arith.constant 0 : index
    %c96 = arith.constant 96 : index
    %90 = vector.load %arg7[%c0_126, %c96] : memref<49x144xf32, #tpu.memory_space<vmem>>, vector<7x16xf32>
    tpu.vector_store %arg7[%c0_126, %c96], %89 {strides = array<i32>} : memref<49x144xf32, #tpu.memory_space<vmem>>, vector<7x16xf32>,
    %c60_127 = arith.constant 60 : index
    %c0_128 = arith.constant 0 : index
    %91 = tpu.strided_load %arg6[%c60_127, %c0_128] {strides = array<i32: 2, 1>} : memref<225x16xf32, #tpu.memory_space<vmem>>, vector<7x16xf32>
    %c7_129 = arith.constant 7 : index
    %c96_130 = arith.constant 96 : index
    %92 = vector.load %arg7[%c7_129, %c96_130] : memref<49x144xf32, #tpu.memory_space<vmem>>, vector<7x16xf32>
    tpu.vector_store %arg7[%c7_129, %c96_130], %91 {strides = array<i32>} : memref<49x144xf32, #tpu.memory_space<vmem>>, vector<7x16xf32>,
    %c90_131 = arith.constant 90 : index
    %c0_132 = arith.constant 0 : index
    %93 = tpu.strided_load %arg6[%c90_131, %c0_132] {strides = array<i32: 2, 1>} : memref<225x16xf32, #tpu.memory_space<vmem>>, vector<7x16xf32>
    %c14_133 = arith.constant 14 : index
    %c96_134 = arith.constant 96 : index
    %94 = vector.load %arg7[%c14_133, %c96_134] : memref<49x144xf32, #tpu.memory_space<vmem>>, vector<7x16xf32>
    tpu.vector_store %arg7[%c14_133, %c96_134], %93 {strides = array<i32>} : memref<49x144xf32, #tpu.memory_space<vmem>>, vector<7x16xf32>,
    %c120_135 = arith.constant 120 : index
    %c0_136 = arith.constant 0 : index
    %95 = tpu.strided_load %arg6[%c120_135, %c0_136] {strides = array<i32: 2, 1>} : memref<225x16xf32, #tpu.memory_space<vmem>>, vector<7x16xf32>
    %c21_137 = arith.constant 21 : index
    %c96_138 = arith.constant 96 : index
    %96 = vector.load %arg7[%c21_137, %c96_138] : memref<49x144xf32, #tpu.memory_space<vmem>>, vector<7x16xf32>
    tpu.vector_store %arg7[%c21_137, %c96_138], %95 {strides = array<i32>} : memref<49x144xf32, #tpu.memory_space<vmem>>, vector<7x16xf32>,
    %c150_139 = arith.constant 150 : index
    %c0_140 = arith.constant 0 : index
    %97 = tpu.strided_load %arg6[%c150_139, %c0_140] {strides = array<i32: 2, 1>} : memref<225x16xf32, #tpu.memory_space<vmem>>, vector<7x16xf32>
    %c28_141 = arith.constant 28 : index
    %c96_142 = arith.constant 96 : index
    %98 = vector.load %arg7[%c28_141, %c96_142] : memref<49x144xf32, #tpu.memory_space<vmem>>, vector<7x16xf32>
    tpu.vector_store %arg7[%c28_141, %c96_142], %97 {strides = array<i32>} : memref<49x144xf32, #tpu.memory_space<vmem>>, vector<7x16xf32>,
    %c180_143 = arith.constant 180 : index
    %c0_144 = arith.constant 0 : index
    %99 = tpu.strided_load %arg6[%c180_143, %c0_144] {strides = array<i32: 2, 1>} : memref<225x16xf32, #tpu.memory_space<vmem>>, vector<7x16xf32>
    %c35_145 = arith.constant 35 : index
    %c96_146 = arith.constant 96 : index
    %100 = vector.load %arg7[%c35_145, %c96_146] : memref<49x144xf32, #tpu.memory_space<vmem>>, vector<7x16xf32>
    tpu.vector_store %arg7[%c35_145, %c96_146], %99 {strides = array<i32>} : memref<49x144xf32, #tpu.memory_space<vmem>>, vector<7x16xf32>,
    %c210 = arith.constant 210 : index
    %c0_147 = arith.constant 0 : index
    %101 = tpu.strided_load %arg6[%c210, %c0_147] {strides = array<i32: 2, 1>} : memref<225x16xf32, #tpu.memory_space<vmem>>, vector<7x16xf32>
    %c42_148 = arith.constant 42 : index
    %c96_149 = arith.constant 96 : index
    %102 = vector.load %arg7[%c42_148, %c96_149] : memref<49x144xf32, #tpu.memory_space<vmem>>, vector<7x16xf32>
    tpu.vector_store %arg7[%c42_148, %c96_149], %101 {strides = array<i32>} : memref<49x144xf32, #tpu.memory_space<vmem>>, vector<7x16xf32>,
    %c31_150 = arith.constant 31 : index
    %c0_151 = arith.constant 0 : index
    %103 = tpu.strided_load %arg6[%c31_150, %c0_151] {strides = array<i32: 2, 1>} : memref<225x16xf32, #tpu.memory_space<vmem>>, vector<7x16xf32>
    %c0_152 = arith.constant 0 : index
    %c112 = arith.constant 112 : index
    %104 = vector.load %arg7[%c0_152, %c112] : memref<49x144xf32, #tpu.memory_space<vmem>>, vector<7x16xf32>
    tpu.vector_store %arg7[%c0_152, %c112], %103 {strides = array<i32>} : memref<49x144xf32, #tpu.memory_space<vmem>>, vector<7x16xf32>,
    %c61_153 = arith.constant 61 : index
    %c0_154 = arith.constant 0 : index
    %105 = tpu.strided_load %arg6[%c61_153, %c0_154] {strides = array<i32: 2, 1>} : memref<225x16xf32, #tpu.memory_space<vmem>>, vector<7x16xf32>
    %c7_155 = arith.constant 7 : index
    %c112_156 = arith.constant 112 : index
    %106 = vector.load %arg7[%c7_155, %c112_156] : memref<49x144xf32, #tpu.memory_space<vmem>>, vector<7x16xf32>
    tpu.vector_store %arg7[%c7_155, %c112_156], %105 {strides = array<i32>} : memref<49x144xf32, #tpu.memory_space<vmem>>, vector<7x16xf32>,
    %c91_157 = arith.constant 91 : index
    %c0_158 = arith.constant 0 : index
    %107 = tpu.strided_load %arg6[%c91_157, %c0_158] {strides = array<i32: 2, 1>} : memref<225x16xf32, #tpu.memory_space<vmem>>, vector<7x16xf32>
    %c14_159 = arith.constant 14 : index
    %c112_160 = arith.constant 112 : index
    %108 = vector.load %arg7[%c14_159, %c112_160] : memref<49x144xf32, #tpu.memory_space<vmem>>, vector<7x16xf32>
    tpu.vector_store %arg7[%c14_159, %c112_160], %107 {strides = array<i32>} : memref<49x144xf32, #tpu.memory_space<vmem>>, vector<7x16xf32>,
    %c121_161 = arith.constant 121 : index
    %c0_162 = arith.constant 0 : index
    %109 = tpu.strided_load %arg6[%c121_161, %c0_162] {strides = array<i32: 2, 1>} : memref<225x16xf32, #tpu.memory_space<vmem>>, vector<7x16xf32>
    %c21_163 = arith.constant 21 : index
    %c112_164 = arith.constant 112 : index
    %110 = vector.load %arg7[%c21_163, %c112_164] : memref<49x144xf32, #tpu.memory_space<vmem>>, vector<7x16xf32>
    tpu.vector_store %arg7[%c21_163, %c112_164], %109 {strides = array<i32>} : memref<49x144xf32, #tpu.memory_space<vmem>>, vector<7x16xf32>,
    %c151_165 = arith.constant 151 : index
    %c0_166 = arith.constant 0 : index
    %111 = tpu.strided_load %arg6[%c151_165, %c0_166] {strides = array<i32: 2, 1>} : memref<225x16xf32, #tpu.memory_space<vmem>>, vector<7x16xf32>
    %c28_167 = arith.constant 28 : index
    %c112_168 = arith.constant 112 : index
    %112 = vector.load %arg7[%c28_167, %c112_168] : memref<49x144xf32, #tpu.memory_space<vmem>>, vector<7x16xf32>
    tpu.vector_store %arg7[%c28_167, %c112_168], %111 {strides = array<i32>} : memref<49x144xf32, #tpu.memory_space<vmem>>, vector<7x16xf32>,
    %c181_169 = arith.constant 181 : index
    %c0_170 = arith.constant 0 : index
    %113 = tpu.strided_load %arg6[%c181_169, %c0_170] {strides = array<i32: 2, 1>} : memref<225x16xf32, #tpu.memory_space<vmem>>, vector<7x16xf32>
    %c35_171 = arith.constant 35 : index
    %c112_172 = arith.constant 112 : index
    %114 = vector.load %arg7[%c35_171, %c112_172] : memref<49x144xf32, #tpu.memory_space<vmem>>, vector<7x16xf32>
    tpu.vector_store %arg7[%c35_171, %c112_172], %113 {strides = array<i32>} : memref<49x144xf32, #tpu.memory_space<vmem>>, vector<7x16xf32>,
    %c211 = arith.constant 211 : index
    %c0_173 = arith.constant 0 : index
    %115 = tpu.strided_load %arg6[%c211, %c0_173] {strides = array<i32: 2, 1>} : memref<225x16xf32, #tpu.memory_space<vmem>>, vector<7x16xf32>
    %c42_174 = arith.constant 42 : index
    %c112_175 = arith.constant 112 : index
    %116 = vector.load %arg7[%c42_174, %c112_175] : memref<49x144xf32, #tpu.memory_space<vmem>>, vector<7x16xf32>
    tpu.vector_store %arg7[%c42_174, %c112_175], %115 {strides = array<i32>} : memref<49x144xf32, #tpu.memory_space<vmem>>, vector<7x16xf32>,
    %c32_176 = arith.constant 32 : index
    %c0_177 = arith.constant 0 : index
    %117 = tpu.strided_load %arg6[%c32_176, %c0_177] {strides = array<i32: 2, 1>} : memref<225x16xf32, #tpu.memory_space<vmem>>, vector<7x16xf32>
    %c0_178 = arith.constant 0 : index
    %c128 = arith.constant 128 : index
    %118 = vector.load %arg7[%c0_178, %c128] : memref<49x144xf32, #tpu.memory_space<vmem>>, vector<7x16xf32>
    tpu.vector_store %arg7[%c0_178, %c128], %117 {strides = array<i32>} : memref<49x144xf32, #tpu.memory_space<vmem>>, vector<7x16xf32>,
    %c62_179 = arith.constant 62 : index
    %c0_180 = arith.constant 0 : index
    %119 = tpu.strided_load %arg6[%c62_179, %c0_180] {strides = array<i32: 2, 1>} : memref<225x16xf32, #tpu.memory_space<vmem>>, vector<7x16xf32>
    %c7_181 = arith.constant 7 : index
    %c128_182 = arith.constant 128 : index
    %120 = vector.load %arg7[%c7_181, %c128_182] : memref<49x144xf32, #tpu.memory_space<vmem>>, vector<7x16xf32>
    tpu.vector_store %arg7[%c7_181, %c128_182], %119 {strides = array<i32>} : memref<49x144xf32, #tpu.memory_space<vmem>>, vector<7x16xf32>,
    %c92_183 = arith.constant 92 : index
    %c0_184 = arith.constant 0 : index
    %121 = tpu.strided_load %arg6[%c92_183, %c0_184] {strides = array<i32: 2, 1>} : memref<225x16xf32, #tpu.memory_space<vmem>>, vector<7x16xf32>
    %c14_185 = arith.constant 14 : index
    %c128_186 = arith.constant 128 : index
    %122 = vector.load %arg7[%c14_185, %c128_186] : memref<49x144xf32, #tpu.memory_space<vmem>>, vector<7x16xf32>
    tpu.vector_store %arg7[%c14_185, %c128_186], %121 {strides = array<i32>} : memref<49x144xf32, #tpu.memory_space<vmem>>, vector<7x16xf32>,
    %c122_187 = arith.constant 122 : index
    %c0_188 = arith.constant 0 : index
    %123 = tpu.strided_load %arg6[%c122_187, %c0_188] {strides = array<i32: 2, 1>} : memref<225x16xf32, #tpu.memory_space<vmem>>, vector<7x16xf32>
    %c21_189 = arith.constant 21 : index
    %c128_190 = arith.constant 128 : index
    %124 = vector.load %arg7[%c21_189, %c128_190] : memref<49x144xf32, #tpu.memory_space<vmem>>, vector<7x16xf32>
    tpu.vector_store %arg7[%c21_189, %c128_190], %123 {strides = array<i32>} : memref<49x144xf32, #tpu.memory_space<vmem>>, vector<7x16xf32>,
    %c152_191 = arith.constant 152 : index
    %c0_192 = arith.constant 0 : index
    %125 = tpu.strided_load %arg6[%c152_191, %c0_192] {strides = array<i32: 2, 1>} : memref<225x16xf32, #tpu.memory_space<vmem>>, vector<7x16xf32>
    %c28_193 = arith.constant 28 : index
    %c128_194 = arith.constant 128 : index
    %126 = vector.load %arg7[%c28_193, %c128_194] : memref<49x144xf32, #tpu.memory_space<vmem>>, vector<7x16xf32>
    tpu.vector_store %arg7[%c28_193, %c128_194], %125 {strides = array<i32>} : memref<49x144xf32, #tpu.memory_space<vmem>>, vector<7x16xf32>,
    %c182_195 = arith.constant 182 : index
    %c0_196 = arith.constant 0 : index
    %127 = tpu.strided_load %arg6[%c182_195, %c0_196] {strides = array<i32: 2, 1>} : memref<225x16xf32, #tpu.memory_space<vmem>>, vector<7x16xf32>
    %c35_197 = arith.constant 35 : index
    %c128_198 = arith.constant 128 : index
    %128 = vector.load %arg7[%c35_197, %c128_198] : memref<49x144xf32, #tpu.memory_space<vmem>>, vector<7x16xf32>
    tpu.vector_store %arg7[%c35_197, %c128_198], %127 {strides = array<i32>} : memref<49x144xf32, #tpu.memory_space<vmem>>, vector<7x16xf32>,
    %c212 = arith.constant 212 : index
    %c0_199 = arith.constant 0 : index
    %129 = tpu.strided_load %arg6[%c212, %c0_199] {strides = array<i32: 2, 1>} : memref<225x16xf32, #tpu.memory_space<vmem>>, vector<7x16xf32>
    %c42_200 = arith.constant 42 : index
    %c128_201 = arith.constant 128 : index
    %130 = vector.load %arg7[%c42_200, %c128_201] : memref<49x144xf32, #tpu.memory_space<vmem>>, vector<7x16xf32>
    tpu.vector_store %arg7[%c42_200, %c128_201], %129 {strides = array<i32>} : memref<49x144xf32, #tpu.memory_space<vmem>>, vector<7x16xf32>,
    %c0_202 = arith.constant 0 : index
    %c0_203 = arith.constant 0 : index
    %131 = vector.load %arg7[%c0_202, %c0_203] : memref<49x144xf32, #tpu.memory_space<vmem>>, vector<49x144xf32>
    %c0_204 = arith.constant 0 : index
    %c0_205 = arith.constant 0 : index
    %132 = vector.load %arg3[%c0_204, %c0_205] : memref<144x32xf32, #tpu.memory_space<vmem>>, vector<144x32xf32>
    %cst_206 = arith.constant dense<0.000000e+00> : vector<49x32xf32>
    %133 = tpu.matmul %131, %132, %cst_206 {dimension_numbers = #tpu.dot_dimension_numbers<[1], [0], [0], [1], [0, 0, 1, 1], [], []>} : vector<49x144xf32>, vector<144x32xf32>, vector<49x32xf32> -> vector<49x32xf32>
    %c0_207 = arith.constant 0 : index
    %c0_208 = arith.constant 0 : index
    %134 = vector.load %arg8[%c0_207, %c0_208] : memref<49x32xf32, #tpu.memory_space<vmem>>, vector<49x32xf32>
    tpu.vector_store %arg8[%c0_207, %c0_208], %133 {strides = array<i32>} : memref<49x32xf32, #tpu.memory_space<vmem>>, vector<49x32xf32>,
    %c0_209 = arith.constant 0 : index
    %c0_210 = arith.constant 0 : index
    %135 = tpu.strided_load %arg8[%c0_209, %c0_210] {strides = array<i32: 2, 1>} : memref<49x32xf32, #tpu.memory_space<vmem>>, vector<3x32xf32>
    %c0_211 = arith.constant 0 : index
    %c0_212 = arith.constant 0 : index
    %136 = vector.load %arg9[%c0_211, %c0_212] : memref<9x288xf32, #tpu.memory_space<vmem>>, vector<3x32xf32>
    tpu.vector_store %arg9[%c0_211, %c0_212], %135 {strides = array<i32>} : memref<9x288xf32, #tpu.memory_space<vmem>>, vector<3x32xf32>,
    %c14_213 = arith.constant 14 : index
    %c0_214 = arith.constant 0 : index
    %137 = tpu.strided_load %arg8[%c14_213, %c0_214] {strides = array<i32: 2, 1>} : memref<49x32xf32, #tpu.memory_space<vmem>>, vector<3x32xf32>
    %c3 = arith.constant 3 : index
    %c0_215 = arith.constant 0 : index
    %138 = vector.load %arg9[%c3, %c0_215] : memref<9x288xf32, #tpu.memory_space<vmem>>, vector<3x32xf32>
    tpu.vector_store %arg9[%c3, %c0_215], %137 {strides = array<i32>} : memref<9x288xf32, #tpu.memory_space<vmem>>, vector<3x32xf32>,
    %c28_216 = arith.constant 28 : index
    %c0_217 = arith.constant 0 : index
    %139 = tpu.strided_load %arg8[%c28_216, %c0_217] {strides = array<i32: 2, 1>} : memref<49x32xf32, #tpu.memory_space<vmem>>, vector<3x32xf32>
    %c6 = arith.constant 6 : index
    %c0_218 = arith.constant 0 : index
    %140 = vector.load %arg9[%c6, %c0_218] : memref<9x288xf32, #tpu.memory_space<vmem>>, vector<3x32xf32>
    tpu.vector_store %arg9[%c6, %c0_218], %139 {strides = array<i32>} : memref<9x288xf32, #tpu.memory_space<vmem>>, vector<3x32xf32>,
    %c1_219 = arith.constant 1 : index
    %c0_220 = arith.constant 0 : index
    %141 = tpu.strided_load %arg8[%c1_219, %c0_220] {strides = array<i32: 2, 1>} : memref<49x32xf32, #tpu.memory_space<vmem>>, vector<3x32xf32>
    %c0_221 = arith.constant 0 : index
    %c32_222 = arith.constant 32 : index
    %142 = vector.load %arg9[%c0_221, %c32_222] : memref<9x288xf32, #tpu.memory_space<vmem>>, vector<3x32xf32>
    tpu.vector_store %arg9[%c0_221, %c32_222], %141 {strides = array<i32>} : memref<9x288xf32, #tpu.memory_space<vmem>>, vector<3x32xf32>,
    %c15_223 = arith.constant 15 : index
    %c0_224 = arith.constant 0 : index
    %143 = tpu.strided_load %arg8[%c15_223, %c0_224] {strides = array<i32: 2, 1>} : memref<49x32xf32, #tpu.memory_space<vmem>>, vector<3x32xf32>
    %c3_225 = arith.constant 3 : index
    %c32_226 = arith.constant 32 : index
    %144 = vector.load %arg9[%c3_225, %c32_226] : memref<9x288xf32, #tpu.memory_space<vmem>>, vector<3x32xf32>
    tpu.vector_store %arg9[%c3_225, %c32_226], %143 {strides = array<i32>} : memref<9x288xf32, #tpu.memory_space<vmem>>, vector<3x32xf32>,
    %c29 = arith.constant 29 : index
    %c0_227 = arith.constant 0 : index
    %145 = tpu.strided_load %arg8[%c29, %c0_227] {strides = array<i32: 2, 1>} : memref<49x32xf32, #tpu.memory_space<vmem>>, vector<3x32xf32>
    %c6_228 = arith.constant 6 : index
    %c32_229 = arith.constant 32 : index
    %146 = vector.load %arg9[%c6_228, %c32_229] : memref<9x288xf32, #tpu.memory_space<vmem>>, vector<3x32xf32>
    tpu.vector_store %arg9[%c6_228, %c32_229], %145 {strides = array<i32>} : memref<9x288xf32, #tpu.memory_space<vmem>>, vector<3x32xf32>,
    %c2_230 = arith.constant 2 : index
    %c0_231 = arith.constant 0 : index
    %147 = tpu.strided_load %arg8[%c2_230, %c0_231] {strides = array<i32: 2, 1>} : memref<49x32xf32, #tpu.memory_space<vmem>>, vector<3x32xf32>
    %c0_232 = arith.constant 0 : index
    %c64_233 = arith.constant 64 : index
    %148 = vector.load %arg9[%c0_232, %c64_233] : memref<9x288xf32, #tpu.memory_space<vmem>>, vector<3x32xf32>
    tpu.vector_store %arg9[%c0_232, %c64_233], %147 {strides = array<i32>} : memref<9x288xf32, #tpu.memory_space<vmem>>, vector<3x32xf32>,
    %c16_234 = arith.constant 16 : index
    %c0_235 = arith.constant 0 : index
    %149 = tpu.strided_load %arg8[%c16_234, %c0_235] {strides = array<i32: 2, 1>} : memref<49x32xf32, #tpu.memory_space<vmem>>, vector<3x32xf32>
    %c3_236 = arith.constant 3 : index
    %c64_237 = arith.constant 64 : index
    %150 = vector.load %arg9[%c3_236, %c64_237] : memref<9x288xf32, #tpu.memory_space<vmem>>, vector<3x32xf32>
    tpu.vector_store %arg9[%c3_236, %c64_237], %149 {strides = array<i32>} : memref<9x288xf32, #tpu.memory_space<vmem>>, vector<3x32xf32>,
    %c30_238 = arith.constant 30 : index
    %c0_239 = arith.constant 0 : index
    %151 = tpu.strided_load %arg8[%c30_238, %c0_239] {strides = array<i32: 2, 1>} : memref<49x32xf32, #tpu.memory_space<vmem>>, vector<3x32xf32>
    %c6_240 = arith.constant 6 : index
    %c64_241 = arith.constant 64 : index
    %152 = vector.load %arg9[%c6_240, %c64_241] : memref<9x288xf32, #tpu.memory_space<vmem>>, vector<3x32xf32>
    tpu.vector_store %arg9[%c6_240, %c64_241], %151 {strides = array<i32>} : memref<9x288xf32, #tpu.memory_space<vmem>>, vector<3x32xf32>,
    %c7_242 = arith.constant 7 : index
    %c0_243 = arith.constant 0 : index
    %153 = tpu.strided_load %arg8[%c7_242, %c0_243] {strides = array<i32: 2, 1>} : memref<49x32xf32, #tpu.memory_space<vmem>>, vector<3x32xf32>
    %c0_244 = arith.constant 0 : index
    %c96_245 = arith.constant 96 : index
    %154 = vector.load %arg9[%c0_244, %c96_245] : memref<9x288xf32, #tpu.memory_space<vmem>>, vector<3x32xf32>
    tpu.vector_store %arg9[%c0_244, %c96_245], %153 {strides = array<i32>} : memref<9x288xf32, #tpu.memory_space<vmem>>, vector<3x32xf32>,
    %c21_246 = arith.constant 21 : index
    %c0_247 = arith.constant 0 : index
    %155 = tpu.strided_load %arg8[%c21_246, %c0_247] {strides = array<i32: 2, 1>} : memref<49x32xf32, #tpu.memory_space<vmem>>, vector<3x32xf32>
    %c3_248 = arith.constant 3 : index
    %c96_249 = arith.constant 96 : index
    %156 = vector.load %arg9[%c3_248, %c96_249] : memref<9x288xf32, #tpu.memory_space<vmem>>, vector<3x32xf32>
    tpu.vector_store %arg9[%c3_248, %c96_249], %155 {strides = array<i32>} : memref<9x288xf32, #tpu.memory_space<vmem>>, vector<3x32xf32>,
    %c35_250 = arith.constant 35 : index
    %c0_251 = arith.constant 0 : index
    %157 = tpu.strided_load %arg8[%c35_250, %c0_251] {strides = array<i32: 2, 1>} : memref<49x32xf32, #tpu.memory_space<vmem>>, vector<3x32xf32>
    %c6_252 = arith.constant 6 : index
    %c96_253 = arith.constant 96 : index
    %158 = vector.load %arg9[%c6_252, %c96_253] : memref<9x288xf32, #tpu.memory_space<vmem>>, vector<3x32xf32>
    tpu.vector_store %arg9[%c6_252, %c96_253], %157 {strides = array<i32>} : memref<9x288xf32, #tpu.memory_space<vmem>>, vector<3x32xf32>,
    %c8 = arith.constant 8 : index
    %c0_254 = arith.constant 0 : index
    %159 = tpu.strided_load %arg8[%c8, %c0_254] {strides = array<i32: 2, 1>} : memref<49x32xf32, #tpu.memory_space<vmem>>, vector<3x32xf32>
    %c0_255 = arith.constant 0 : index
    %c128_256 = arith.constant 128 : index
    %160 = vector.load %arg9[%c0_255, %c128_256] : memref<9x288xf32, #tpu.memory_space<vmem>>, vector<3x32xf32>
    tpu.vector_store %arg9[%c0_255, %c128_256], %159 {strides = array<i32>} : memref<9x288xf32, #tpu.memory_space<vmem>>, vector<3x32xf32>,
    %c22 = arith.constant 22 : index
    %c0_257 = arith.constant 0 : index
    %161 = tpu.strided_load %arg8[%c22, %c0_257] {strides = array<i32: 2, 1>} : memref<49x32xf32, #tpu.memory_space<vmem>>, vector<3x32xf32>
    %c3_258 = arith.constant 3 : index
    %c128_259 = arith.constant 128 : index
    %162 = vector.load %arg9[%c3_258, %c128_259] : memref<9x288xf32, #tpu.memory_space<vmem>>, vector<3x32xf32>
    tpu.vector_store %arg9[%c3_258, %c128_259], %161 {strides = array<i32>} : memref<9x288xf32, #tpu.memory_space<vmem>>, vector<3x32xf32>,
    %c36 = arith.constant 36 : index
    %c0_260 = arith.constant 0 : index
    %163 = tpu.strided_load %arg8[%c36, %c0_260] {strides = array<i32: 2, 1>} : memref<49x32xf32, #tpu.memory_space<vmem>>, vector<3x32xf32>
    %c6_261 = arith.constant 6 : index
    %c128_262 = arith.constant 128 : index
    %164 = vector.load %arg9[%c6_261, %c128_262] : memref<9x288xf32, #tpu.memory_space<vmem>>, vector<3x32xf32>
    tpu.vector_store %arg9[%c6_261, %c128_262], %163 {strides = array<i32>} : memref<9x288xf32, #tpu.memory_space<vmem>>, vector<3x32xf32>,
    %c9 = arith.constant 9 : index
    %c0_263 = arith.constant 0 : index
    %165 = tpu.strided_load %arg8[%c9, %c0_263] {strides = array<i32: 2, 1>} : memref<49x32xf32, #tpu.memory_space<vmem>>, vector<3x32xf32>
    %c0_264 = arith.constant 0 : index
    %c160 = arith.constant 160 : index
    %166 = vector.load %arg9[%c0_264, %c160] : memref<9x288xf32, #tpu.memory_space<vmem>>, vector<3x32xf32>
    tpu.vector_store %arg9[%c0_264, %c160], %165 {strides = array<i32>} : memref<9x288xf32, #tpu.memory_space<vmem>>, vector<3x32xf32>,
    %c23 = arith.constant 23 : index
    %c0_265 = arith.constant 0 : index
    %167 = tpu.strided_load %arg8[%c23, %c0_265] {strides = array<i32: 2, 1>} : memref<49x32xf32, #tpu.memory_space<vmem>>, vector<3x32xf32>
    %c3_266 = arith.constant 3 : index
    %c160_267 = arith.constant 160 : index
    %168 = vector.load %arg9[%c3_266, %c160_267] : memref<9x288xf32, #tpu.memory_space<vmem>>, vector<3x32xf32>
    tpu.vector_store %arg9[%c3_266, %c160_267], %167 {strides = array<i32>} : memref<9x288xf32, #tpu.memory_space<vmem>>, vector<3x32xf32>,
    %c37 = arith.constant 37 : index
    %c0_268 = arith.constant 0 : index
    %169 = tpu.strided_load %arg8[%c37, %c0_268] {strides = array<i32: 2, 1>} : memref<49x32xf32, #tpu.memory_space<vmem>>, vector<3x32xf32>
    %c6_269 = arith.constant 6 : index
    %c160_270 = arith.constant 160 : index
    %170 = vector.load %arg9[%c6_269, %c160_270] : memref<9x288xf32, #tpu.memory_space<vmem>>, vector<3x32xf32>
    tpu.vector_store %arg9[%c6_269, %c160_270], %169 {strides = array<i32>} : memref<9x288xf32, #tpu.memory_space<vmem>>, vector<3x32xf32>,
    %c14_271 = arith.constant 14 : index
    %c0_272 = arith.constant 0 : index
    %171 = tpu.strided_load %arg8[%c14_271, %c0_272] {strides = array<i32: 2, 1>} : memref<49x32xf32, #tpu.memory_space<vmem>>, vector<3x32xf32>
    %c0_273 = arith.constant 0 : index
    %c192 = arith.constant 192 : index
    %172 = vector.load %arg9[%c0_273, %c192] : memref<9x288xf32, #tpu.memory_space<vmem>>, vector<3x32xf32>
    tpu.vector_store %arg9[%c0_273, %c192], %171 {strides = array<i32>} : memref<9x288xf32, #tpu.memory_space<vmem>>, vector<3x32xf32>,
    %c28_274 = arith.constant 28 : index
    %c0_275 = arith.constant 0 : index
    %173 = tpu.strided_load %arg8[%c28_274, %c0_275] {strides = array<i32: 2, 1>} : memref<49x32xf32, #tpu.memory_space<vmem>>, vector<3x32xf32>
    %c3_276 = arith.constant 3 : index
    %c192_277 = arith.constant 192 : index
    %174 = vector.load %arg9[%c3_276, %c192_277] : memref<9x288xf32, #tpu.memory_space<vmem>>, vector<3x32xf32>
    tpu.vector_store %arg9[%c3_276, %c192_277], %173 {strides = array<i32>} : memref<9x288xf32, #tpu.memory_space<vmem>>, vector<3x32xf32>,
    %c42_278 = arith.constant 42 : index
    %c0_279 = arith.constant 0 : index
    %175 = tpu.strided_load %arg8[%c42_278, %c0_279] {strides = array<i32: 2, 1>} : memref<49x32xf32, #tpu.memory_space<vmem>>, vector<3x32xf32>
    %c6_280 = arith.constant 6 : index
    %c192_281 = arith.constant 192 : index
    %176 = vector.load %arg9[%c6_280, %c192_281] : memref<9x288xf32, #tpu.memory_space<vmem>>, vector<3x32xf32>
    tpu.vector_store %arg9[%c6_280, %c192_281], %175 {strides = array<i32>} : memref<9x288xf32, #tpu.memory_space<vmem>>, vector<3x32xf32>,
    %c15_282 = arith.constant 15 : index
    %c0_283 = arith.constant 0 : index
    %177 = tpu.strided_load %arg8[%c15_282, %c0_283] {strides = array<i32: 2, 1>} : memref<49x32xf32, #tpu.memory_space<vmem>>, vector<3x32xf32>
    %c0_284 = arith.constant 0 : index
    %c224 = arith.constant 224 : index
    %178 = vector.load %arg9[%c0_284, %c224] : memref<9x288xf32, #tpu.memory_space<vmem>>, vector<3x32xf32>
    tpu.vector_store %arg9[%c0_284, %c224], %177 {strides = array<i32>} : memref<9x288xf32, #tpu.memory_space<vmem>>, vector<3x32xf32>,
    %c29_285 = arith.constant 29 : index
    %c0_286 = arith.constant 0 : index
    %179 = tpu.strided_load %arg8[%c29_285, %c0_286] {strides = array<i32: 2, 1>} : memref<49x32xf32, #tpu.memory_space<vmem>>, vector<3x32xf32>
    %c3_287 = arith.constant 3 : index
    %c224_288 = arith.constant 224 : index
    %180 = vector.load %arg9[%c3_287, %c224_288] : memref<9x288xf32, #tpu.memory_space<vmem>>, vector<3x32xf32>
    tpu.vector_store %arg9[%c3_287, %c224_288], %179 {strides = array<i32>} : memref<9x288xf32, #tpu.memory_space<vmem>>, vector<3x32xf32>,
    %c43 = arith.constant 43 : index
    %c0_289 = arith.constant 0 : index
    %181 = tpu.strided_load %arg8[%c43, %c0_289] {strides = array<i32: 2, 1>} : memref<49x32xf32, #tpu.memory_space<vmem>>, vector<3x32xf32>
    %c6_290 = arith.constant 6 : index
    %c224_291 = arith.constant 224 : index
    %182 = vector.load %arg9[%c6_290, %c224_291] : memref<9x288xf32, #tpu.memory_space<vmem>>, vector<3x32xf32>
    tpu.vector_store %arg9[%c6_290, %c224_291], %181 {strides = array<i32>} : memref<9x288xf32, #tpu.memory_space<vmem>>, vector<3x32xf32>,
    %c16_292 = arith.constant 16 : index
    %c0_293 = arith.constant 0 : index
    %183 = tpu.strided_load %arg8[%c16_292, %c0_293] {strides = array<i32: 2, 1>} : memref<49x32xf32, #tpu.memory_space<vmem>>, vector<3x32xf32>
    %c0_294 = arith.constant 0 : index
    %c256 = arith.constant 256 : index
    %184 = vector.load %arg9[%c0_294, %c256] : memref<9x288xf32, #tpu.memory_space<vmem>>, vector<3x32xf32>
    tpu.vector_store %arg9[%c0_294, %c256], %183 {strides = array<i32>} : memref<9x288xf32, #tpu.memory_space<vmem>>, vector<3x32xf32>,
    %c30_295 = arith.constant 30 : index
    %c0_296 = arith.constant 0 : index
    %185 = tpu.strided_load %arg8[%c30_295, %c0_296] {strides = array<i32: 2, 1>} : memref<49x32xf32, #tpu.memory_space<vmem>>, vector<3x32xf32>
    %c3_297 = arith.constant 3 : index
    %c256_298 = arith.constant 256 : index
    %186 = vector.load %arg9[%c3_297, %c256_298] : memref<9x288xf32, #tpu.memory_space<vmem>>, vector<3x32xf32>
    tpu.vector_store %arg9[%c3_297, %c256_298], %185 {strides = array<i32>} : memref<9x288xf32, #tpu.memory_space<vmem>>, vector<3x32xf32>,
    %c44 = arith.constant 44 : index
    %c0_299 = arith.constant 0 : index
    %187 = tpu.strided_load %arg8[%c44, %c0_299] {strides = array<i32: 2, 1>} : memref<49x32xf32, #tpu.memory_space<vmem>>, vector<3x32xf32>
    %c6_300 = arith.constant 6 : index
    %c256_301 = arith.constant 256 : index
    %188 = vector.load %arg9[%c6_300, %c256_301] : memref<9x288xf32, #tpu.memory_space<vmem>>, vector<3x32xf32>
    tpu.vector_store %arg9[%c6_300, %c256_301], %187 {strides = array<i32>} : memref<9x288xf32, #tpu.memory_space<vmem>>, vector<3x32xf32>,
    %c0_302 = arith.constant 0 : index
    %c0_303 = arith.constant 0 : index
    %189 = vector.load %arg9[%c0_302, %c0_303] : memref<9x288xf32, #tpu.memory_space<vmem>>, vector<9x288xf32>
    %c0_304 = arith.constant 0 : index
    %c0_305 = arith.constant 0 : index
    %190 = vector.load %arg4[%c0_304, %c0_305] : memref<288x32xf32, #tpu.memory_space<vmem>>, vector<288x32xf32>
    %cst_306 = arith.constant dense<0.000000e+00> : vector<9x32xf32>
    %191 = tpu.matmul %189, %190, %cst_306 {dimension_numbers = #tpu.dot_dimension_numbers<[1], [0], [0], [1], [0, 0, 1, 1], [], []>} : vector<9x288xf32>, vector<288x32xf32>, vector<9x32xf32> -> vector<9x32xf32>
    %c0_307 = arith.constant 0 : index
    %c0_308 = arith.constant 0 : index
    %c0_309 = arith.constant 0 : index
    %192 = vector.load %arg5[%c0_307, %c0_308, %c0_309] : memref<1x9x32xf32, #tpu.memory_space<vmem>>, vector<1x9x32xf32>
    %193 = vector.shape_cast %192 : vector<1x9x32xf32> to vector<9x32xf32>
    %194 = vector.shape_cast %191 : vector<9x32xf32> to vector<1x9x32xf32>
    tpu.vector_store %arg5[%c0_307, %c0_308, %c0_309], %194 {strides = array<i32>} : memref<1x9x32xf32, #tpu.memory_space<vmem>>, vector<1x9x32xf32>,
    return
  }
  func.func @transform_0(%arg0: i32) -> (i32, i32, i32) {
    %c0_i32 = arith.constant 0 : i32
    %c0_i32_0 = arith.constant 0 : i32
    %c0_i32_1 = arith.constant 0 : i32
    return %arg0, %c0_i32, %c0_i32_0 : i32, i32, i32
  }
  func.func @transform_1(%arg0: i32) -> (i32, i32) {
    %c0_i32 = arith.constant 0 : i32
    %c0_i32_0 = arith.constant 0 : i32
    %c0_i32_1 = arith.constant 0 : i32
    return %c0_i32, %c0_i32_0 : i32, i32
  }
  func.func @transform_2(%arg0: i32) -> (i32, i32) {
    %c0_i32 = arith.constant 0 : i32
    %c0_i32_0 = arith.constant 0 : i32
    %c0_i32_1 = arith.constant 0 : i32
    return %c0_i32, %c0_i32_0 : i32, i32
  }
  func.func @transform_3(%arg0: i32) -> (i32, i32) {
    %c0_i32 = arith.constant 0 : i32
    %c0_i32_0 = arith.constant 0 : i32
    %c0_i32_1 = arith.constant 0 : i32
    return %c0_i32, %c0_i32_0 : i32, i32
  }
  func.func @transform_4(%arg0: i32) -> (i32, i32, i32) {
    %c0_i32 = arith.constant 0 : i32
    %c0_i32_0 = arith.constant 0 : i32
    %c0_i32_1 = arith.constant 0 : i32
    return %arg0, %c0_i32, %c0_i32_0 : i32, i32, i32
  }
}

</mosaic_0001>

<bundles_post_ra>
// kernel: vnet_forward.3
= control target key start
LH: loop header
LB: loop body
LE: loop exit
PB: predicated region body
PF: predicated region fallthrough
CT: control target
= control target key end

     0   :  { %v544_v2 = vmov 0.0   ;;  %vm545_vm0 = vmmov 0   ;;  %v28_v12 = vlaneseq  ;;  %v546_v17 = vmov 1983009808   ;;  %s678_s0 = inlined_call_operand.vmem [shape: f32[2,288], index: 0, kind: input, shape index: {}]   ;;  %s679_s1 = inlined_call_operand.vmem [shape: bf16[288,128], index: 1, kind: input, shape index: {}]   ;;  %s680_s2 = inlined_call_operand.vmem [shape: bf16[128,32], index: 2, kind: input, shape index: {}]   ;;  %s681_s3 = inlined_call_operand.hbm [shape: f32[2,32], index: 3, kind: output, shape index: {}]  }
   0x1   :  { %v491_v0 = vld [vmem:[%s679_s1 + $0x40] sm:$0xff]   ;;  %459 = vmatprep.subr.bf16.mxu1 %v544_v2  ;;  %v493_v3 = vld [vmem:[%s679_s1 + $0x48] sm:$0xff]   ;;  %463 = vmatprep.mubr.msk.bf16.mxu1 %vm545_vm0, %v544_v2  ;;  %v495_v5 = vld [vmem:[%s679_s1 + $0x50] sm:$0xff]   ;;  %v26_v18 = vunpack.c.l.s4 %v546_v17 }
   0x2   :  { %v492_v1 = vld [vmem:[%s679_s1] sm:$0xff]   ;;  %425 = vmatprep.subr.bf16.mxu0 %v491_v0  ;;  %v494_v4 = vld [vmem:[%s679_s1 + $0x8] sm:$0xff]   ;;  %v496_v6 = vld [vmem:[%s679_s1 + $0x10] sm:$0xff]   ;;  %v29_v19 = vshrl.u32 %v28_v12, 7 }
   0x3   :  { %426 = vmatpush3.bf16.msra.mxu0 %v492_v1  ;;  %v497_v7 = vld [vmem:[%s679_s1 + $0x58] sm:$0xff]   ;;  %v499_v9 = vld [vmem:[%s679_s1 + $0x60] sm:$0xff]   ;;  %v501_v13 = vld [vmem:[%s679_s1 + $0x68] sm:$0xff]   ;;  %v27_v23 = vunpack.c.0.s8 %v26_v18 }
   0x4   :  { %427 = vmatprep.subr.bf16.mxu0 %v493_v3  ;;  %v498_v8 = vld [vmem:[%s679_s1 + $0x18] sm:$0xff]   ;;  %v505_v10 = vld [vmem:[%s679_s1 + $0x80] sm:$0xff]   ;;  %v508_v14 = vld [vmem:[%s679_s1 + $0x88] sm:$0xff]  }
   0x5   :  { %v500_v11 = vld [vmem:[%s679_s1 + $0x20] sm:$0xff]   ;;  %460 = vmatpush3.bf16.msra.mxu1 %v505_v10  ;;  %v502_v16 = vld [vmem:[%s679_s1 + $0x28] sm:$0xff]   ;;  %v503_v20 = vld [vmem:[%s679_s1 + $0x70] sm:$0xff]   ;;  %v30_v25 = vsub.s32 %v27_v23, %v29_v19 }
   0x6   :  { %461 = vmatprep.subr.bf16.mxu1 %v544_v2  ;;  %v22_v15 = vld [vmem:[%s678_s0] sm:$0x3f]  ;;  %v504_v21 = vld [vmem:[%s679_s1 + $0x30] sm:$0xff]   ;;  %v506_v24 = vld [vmem:[%s679_s1 + $0x78] sm:$0xff]  }
   0x7   :  { %428 = vmatpush3.bf16.msra.mxu0 %v494_v4  ;;  %v24_v22 = vcombine.high %v22_v15, %v22_v15  ;;  %v31_v26 = vrot.slane %v22_v15, %v30_v25 }
   0x8   :  { %429 = vmatprep.subr.bf16.mxu0 %v495_v5 }
   0x9   :  { %462 = vmatpush3.bf16.msra.mxu1 %v508_v14  ;;  %v38_v27 = vrot.slane %v24_v22, %v30_v25 }
   0xa   :  { %467 = vmatprep.subr.bf16.mxu1 %v544_v2 }
   0xb   :  { %430 = vmatpush3.bf16.msra.mxu0 %v496_v6 }
   0xc   :  { %431 = vmatprep.subr.bf16.mxu0 %v497_v7 }
   0xf   :  { %432 = vmatpush3.bf16.msra.mxu0 %v498_v8 }
  0x10   :  { %433 = vmatprep.subr.bf16.mxu0 %v499_v9 }
  0x13   :  { %434 = vmatpush3.bf16.msra.mxu0 %v500_v11 }
  0x14   :  { %435 = vmatprep.subr.bf16.mxu0 %v501_v13 }
  0x17   :  { %436 = vmatpush3.bf16.msra.mxu0 %v502_v16 }
  0x18   :  { %437 = vmatprep.subr.bf16.mxu0 %v503_v20 }
  0x19   :  { %8 = vsyncpa [#allocation3], 0  ;;  %vm190_vm1 = vcmask 261120   ;;  %v510_v28 = vld [vmem:[%s680_s2] sm:$0xff]   ;;  %v507_v29 = vld [vmem:[%s679_s1 + $0x38] sm:$0xff]   ;;  %v39_v30 = vcombine.high %v31_v26, %v31_v26  ;;  %v45_v31 = vpack.c.bf16 %v38_v27, %v38_v27  ;;  %v43_v33 = vpack.c.bf16 %v31_v26, %v31_v26 }
  0x1a   :  { %v511_v34 = vld [vmem:[%s680_s2 + $0x8] sm:$0xff]   ;;  %v512_v35 = vld [vmem:[%s680_s2 + $0x10] sm:$0xff]   ;;  %v513_v36 = vld [vmem:[%s680_s2 + $0x18] sm:$0xff]   ;;  %vm20_vm2 = vcmask 254976  }
  0x1b   :  { %438 = vmatpush3.bf16.msra.mxu0 %v504_v21  ;;  %v44_v32 = vpack.c.bf16 %v39_v30, %v39_v30  ;;  %464 = vmatmul.mubr.msk.bf16.vlgmr.msra.gmra.mrb[0].mxu1 %vm190_vm1, %v45_v31  ;;  %v514_v37 = vld [vmem:[%s680_s2 + $0x20] sm:$0xff]   ;;  %v515_v38 = vld [vmem:[%s680_s2 + $0x28] sm:$0xff]   ;;  %v516_v39 = vld [vmem:[%s680_s2 + $0x30] sm:$0xff]   ;;  %21 = vst.msk [vmem:[#allocation2] sm:$0x3] %vm20_vm2, %v544_v2 }
  0x1c   :  { %439 = vmatprep.subr.bf16.mxu0 %v506_v24  ;;  %468 = vmatpush3.bf16.msra.mxu1 %v510_v28  ;;  %v517_v40 = vld [vmem:[%s680_s2 + $0x38] sm:$0xff]   ;;  %s547_s2 = smov [#allocation2]  }
  0x1d   :  { %483 = vmatprep.mubr.msk.bf16.mxu1 %vm545_vm0, %v544_v2  ;;  %226 = vmatprep.mubr.bf16.mxu0 %v44_v32  ;;  %s390_s10 = sshll.u32 %s547_s2, 4  ;;  %s391_s10 = int_to_ptr.vmem [resolvable:$true] %s390_s10 }
  0x1e   :  { %469 = vmatprep.subr.bf16.mxu1 %v544_v2  ;;  %s520_s11 = scalar_lea.vmem %s391_s10, 32  ;;  %p525_p1 = scmp.lt.s32.totalorder %s391_s10, %s391_s10 }
  0x1f   :  { %440 = vmatpush3.bf16.msra.mxu0 %v507_v29  ;;  %p521_p0 = scmp.ne.s32.totalorder %s391_s10, %s520_s11  ;;  %p526_p2 = scmp.lt.s32.totalorder %s520_s11, %s520_s11 }
  0x20   :  { %470 = vmatpush3.bf16.msra.mxu1 %v511_v34 }
  0x21   :  { %471 = vmatprep.subr.bf16.mxu1 %v544_v2  ;;  %p527_p3 = por %p526_p2, %p525_p1 }
  0x22   :  { %227 = vmatmul.mubr.bf16.vlgmr.msra.gmra.mrb[0].mxu0 %v43_v33  ;;  %v275_v53 = vld [vmem:[#allocation2] sm:$0x3] }
  0x23   :  { %p528_p4 = pnand %p527_p3, %p521_p0 }
  0x24   :  { %472 = vmatpush3.bf16.msra.mxu1 %v512_v35 }
  0x25   :  { %473 = vmatprep.subr.bf16.mxu1 %v544_v2 }
  0x28   :  { %474 = vmatpush3.bf16.msra.mxu1 %v513_v36 }
  0x29   :  { %475 = vmatprep.subr.bf16.mxu1 %v544_v2 }
  0x2c   :  { %476 = vmatpush3.bf16.msra.mxu1 %v514_v37 }
  0x2d   :  { %477 = vmatprep.subr.bf16.mxu1 %v544_v2 }
  0x30   :  { %478 = vmatpush3.bf16.msra.mxu1 %v515_v38 }
  0x31   :  { %479 = vmatprep.subr.bf16.mxu1 %v544_v2 }
  0x34   :  { %480 = vmatpush3.bf16.msra.mxu1 %v516_v39 }
  0x35   :  { %481 = vmatprep.subr.bf16.mxu1 %v544_v2 }
  0x38   :  { %482 = vmatpush3.bf16.msra.mxu1 %v517_v40 }
  0xee   :  { %v268_v41 = vpop.f32.mrb[0].mxu1 }
  0xef   :  { %v465_v42 = vpop.f32.mrb[1].mxu1 }
  0xf0   :  { %v271_v43 = vpop.f32.mrb[2].mxu1 }
  0xf1   :  { %v466_v44 = vpop.f32.mrb[3].mxu1 }
  0xf5   :  { %v441_v45 = vpop.f32.mrb[0].mxu0 }
  0xf6   :  { %v442_v46 = vpop.f32.mrb[1].mxu0 }
  0xf7   :  { %v443_v47 = vadd.f32 %v442_v46, %v441_v45  ;;  %v444_v48 = vpop.f32.mrb[2].mxu0 }
  0xf8   :  { %v445_v49 = vpop.f32.mrb[3].mxu0 }
  0xf9   :  { %v269_v50 = vadd.f32 %v443_v47, %v268_v41 }
  0xfb   :  { %518 = vtanh.f32 %v269_v50 }
 0x105   :  { %v519_v51 = vpop.eup %518 }
 0x106   :  { %v276_v52 = vpack.c.bf16 %v519_v51, %v519_v51 }
 0x108   :  { %484 = vmatmul.mubr.bf16.vlgmr.msra.gmra.mrb[4].mxu1 %v276_v52 }
 0x1db   :  { %v375_v54 = vpop.f32.mrb[4].mxu1 }
 0x1dc   :  { %v381_v55 = vadd.f32 %v375_v54, %v275_v53  ;;  %v485_v56 = vpop.f32.mrb[5].mxu1 }
 0x1dd   :  { %v378_v57 = vpop.f32.mrb[6].mxu1 }
 0x1de   :  { %383 = vst.msk [vmem:[#allocation2] sm:$0x3] %vm20_vm2, %v381_v55  ;;  %v486_v58 = vpop.f32.mrb[7].mxu1 }
 0x1df   :  { %531 = shalt.err (!%p528_p4)
}
 0x1e0   :  { %s532_s14 = scalar_lea.hbm %s681_s3, 32 }
 0x1e1   :  { %p533_p5 = scmp.ne.s32.totalorder %s681_s3, %s532_s14  ;;  %p536_p6 = scmp.lt.u32.totalorder %s532_s14, %s681_s3 }
 0x1e3   :  { %p538_p7 = pnand %p536_p6, %p533_p5 }
 0x1e5   :  { %541 = shalt.err (!%p538_p7)
}
 0x1e6   :  { %393 = dma.vmem_to_hbm [thread:$0]  %s391_s10, 32, %s681_s3, [#allocation3]  }
 0x1e7   :  { %542 = dma.done.wait [#allocation3], 32  }
 0x1e8   :  { %543 = vsyncadd [#allocation3], 4294967264 }
 0x1e9   :  { %397 = vsyncpa [#allocation3], 1 }

// kernel: vnet_forward.2
= control target key start
LH: loop header
LB: loop body
LE: loop exit
PB: predicated region body
PF: predicated region fallthrough
CT: control target
= control target key end

     0   :  { %s2157_s15 = smov 0   ;;  %s2660_s0 = inlined_call_operand.vmem [shape: f32[2,225,25], index: 0, kind: input, shape index: {}]   ;;  %s2661_s1 = inlined_call_operand.vmem [shape: f32[25,16], index: 1, kind: input, shape index: {}]   ;;  %s2662_s2 = inlined_call_operand.vmem [shape: f32[144,32], index: 2, kind: input, shape index: {}]   ;;  %s2663_s3 = inlined_call_operand.vmem [shape: f32[288,32], index: 3, kind: input, shape index: {}]   ;;  %s2664_s4 = inlined_call_operand.vmem [shape: f32[2,9,32], index: 4, kind: output, shape index: {}]  }
   0x1 LB: > { %s1782_s16 = sadd.s32 4294967295, %s2119_s15   ;;  %p1786_p0 = scmp.ge.s32.totalorder %s2119_s15, 1  ;;  %s2119_s15 = sphi %s2157_s15, %s14_s15  }
   0x2   : > { %p162_p1 = scmp.lt.s32.totalorder %s2119_s15, 3 }
   0x4   : > { %p163_p2 = pnand %p1786_p0, %p162_p1 }
   0x5   : > { %v227_v0 = vld [vmem:[%s2661_s1] sm:$0xff] (!%p163_p2)  ;;  %v228_v1 = vld [vmem:[%s2661_s1 + $0x8] sm:$0xff] (!%p163_p2)  ;;  %v229_v2 = vld [vmem:[%s2661_s1 + $0x10] sm:$0xff] (!%p163_p2)  ;;  %vm319_vm0 = vcmask (!%p163_p2), 1040384   ;;  %v2121_v3 = vmov (!%p163_p2), 0.0|0.0   ;;  %p188_p3 = scmp.lt.s32.totalorder (!%p163_p2), %s1782_s16, 1 }
   0x6   : > { %166 = sbr.rel (%p163_p2) target bundleno = 1057 (0x421), region = 36  ;;  %2015 = vmatprep.subr.bf16.mxu0 (!%p163_p2), %v2121_v3  ;;  %2089 = vmatprep.subr.bf16.mxu1 (!%p163_p2), %v2121_v3  ;;  %v2016_v4 = vpack.c.bf16 (!%p163_p2), %v228_v1, %v227_v0  ;;  %v230_v5 = vld [vmem:[%s2661_s1 + $0x18] sm:$0x1] (!%p163_p2)  ;;  %vm2122_vm1 = vmmov (!%p163_p2), 0   ;;  %v2123_v6 = vmov (!%p163_p2), 0.0   ;;  %vm2124_vm2 = vmmov (!%p163_p2), 1  }
   0x7   : > { %1917 = vmatprep.mubr.msk.f32.mxu0 (!%p163_p2), %vm2122_vm1, %v2123_v6  ;;  %1977 = vmatprep.mubr.msk.f32.mxu1 (!%p163_p2), %vm2122_vm1, %v2123_v6  ;;  %v2019_v7 = vpack.c.bf16 (!%p163_p2), %v230_v5, %v229_v2  ;;  %vm2020_vm3 = vmpackc.low (!%p163_p2), %vm319_vm0, %vm2124_vm2  ;;  %vm231_vm4 = vcmask (!%p163_p2), 203776   ;;  %vm533_vm5 = vcmask (!%p163_p2), 130048   ;;  %vm565_vm6 = vcmask (!%p163_p2), 129024   ;;  %s2125_s29 = smov (!%p163_p2), 32   ;;  %s2126_s30 = smov (!%p163_p2), 16   ;;  %v1179_v63 = vld [vmem:[%s2662_s2] sm:$0xff] (!%p163_p2) }
   0x8   : > { %2017 = vmatpush3.bf16.msra.mxu0 (!%p163_p2), %v2016_v4  ;;  %2091 = vmatpush3.bf16.msra.mxu1 (!%p163_p2), %v2016_v4  ;;  %s2127_s7 = smov (!%p163_p2), 48   ;;  %v1180_v0 = vld [vmem:[%s2662_s2 + $0x8] sm:$0xff] (!%p163_p2)  ;;  %s2128_s10 = smov (!%p163_p2), 80   ;;  %vm562_vm7 = vcmask (!%p163_p2), 122880   ;;  %vm617_vm8 = vcmask (!%p163_p2), 130050   ;;  %vm572_vm9 = vcmask (!%p163_p2), 130055  }
   0x9   : > { %2018 = vmatprep.subr.bf16.mxu0 (!%p163_p2), %v2121_v3  ;;  %2090 = vmatprep.subr.bf16.mxu1 (!%p163_p2), %v2121_v3  ;;  %v2023_v5 = vpack.c.bf16 (!%p163_p2), %v1180_v0, %v1179_v63  ;;  %s2129_s17 = smov (!%p163_p2), 64   ;;  %s2130_s26 = smov (!%p163_p2), 112   ;;  %vm574_vm10 = vcmask (!%p163_p2), 128000   ;;  %v1191_v0 = vld [vmem:[%s2662_s2 + $0x60] sm:$0xff] (!%p163_p2)  ;;  %vm581_vm11 = vcmask (!%p163_p2), 130054   ;;  %vm583_vm12 = vcmask (!%p163_p2), 126976  }
   0xa   : > { %s2131_s5 = smov (!%p163_p2), 96   ;;  %vm608_vm13 = vcmask (!%p163_p2), 130051   ;;  %vm610_vm14 = vcmask (!%p163_p2), 123904   ;;  %vm590_vm15 = vcmask (!%p163_p2), 130053   ;;  %vm592_vm0 = vcmask (!%p163_p2), 125952  }
   0xb   : > { %vm601_vm2 = vcmask (!%p163_p2), 124928  }
   0xc   : > { %2021 = vmatpush3.bf16.msk.msra.mxu0 (!%p163_p2), %vm2020_vm3, %v2019_v7  ;;  %2092 = vmatpush3.bf16.msk.msra.mxu1 (!%p163_p2), %vm2020_vm3, %v2019_v7  ;;  %vm626_vm3 = vcmask (!%p163_p2), 260224  }
   0xd   : > { %s2666_s16 = smov (!%p188_p3, %s1782_s16), 1  ;;  %2022 = vmatprep.subr.bf16.mxu1 %v2121_v3 }
   0xe   : > { %s2093_s25 = smul.u32 232, %s2666_s16  ;;  %s1831_s11 = sshll.u32 %s2666_s16, 4 }
   0xf   : > { %s197_s14 = scalar_lea.vmem %s2664_s4, %s1831_s11 }
  0x10   : > { %s2192_s28 = scalar_lea.vmem %s2660_s0, %s2093_s25 }
  0x11   : > { %v198_v8 = vld [vmem:[%s2192_s28] sm:$0xff]  ;;  %v199_v10 = vld [vmem:[%s2192_s28 + $0x8] sm:$0xff]  ;;  %v200_v12 = vld [vmem:[%s2192_s28 + $0x10] sm:$0xff] }
  0x12   : > { %v218_v9 = vld [vmem:[%s2192_s28 + $0xa0] sm:$0xff]  ;;  %1918 = vmatmul.mubr.msk.f32.vlgmr.msra.gmra.mrb[0].mxu0 %vm231_vm4, %v198_v8  ;;  %v219_v11 = vld [vmem:[%s2192_s28 + $0xa8] sm:$0xff]  ;;  %v220_v13 = vld [vmem:[%s2192_s28 + $0xb0] sm:$0xff] }
  0x13   : > { %1978 = vmatmul.mubr.msk.f32.vlgmr.msra.gmra.mrb[0].mxu1 %vm231_vm4, %v218_v9  ;;  %1920 = vmatprep.mubr.msk.f32.mxu0 %vm2122_vm1, %v2123_v6  ;;  %v201_v14 = vld [vmem:[%s2192_s28 + $0x18] sm:$0xff]  ;;  %v202_v16 = vld [vmem:[%s2192_s28 + $0x20] sm:$0xff]  ;;  %v203_v18 = vld [vmem:[%s2192_s28 + $0x28] sm:$0xff] }
  0x14   : > { %1980 = vmatprep.mubr.msk.f32.mxu1 %vm2122_vm1, %v2123_v6  ;;  %v221_v15 = vld [vmem:[%s2192_s28 + $0xb8] sm:$0xff]  ;;  %v222_v17 = vld [vmem:[%s2192_s28 + $0xc0] sm:$0xff]  ;;  %v223_v19 = vld [vmem:[%s2192_s28 + $0xc8] sm:$0xff]  ;;  %2024 = vmatpush1.bf16.msra.mxu1 %v2023_v5 }
  0x15   : > { %v204_v20 = vld [vmem:[%s2192_s28 + $0x30] sm:$0xff]  ;;  %v205_v22 = vld [vmem:[%s2192_s28 + $0x38] sm:$0xff]  ;;  %v206_v24 = vld [vmem:[%s2192_s28 + $0x40] sm:$0xff]  ;;  %2025 = vmatprep.subr.bf16.mxu1 %v2121_v3 }
  0x16   : > { %1921 = vmatmul.mubr.msk.f32.gmra.mrb[2].mxu0 %vm231_vm4, %v199_v10  ;;  %v224_v21 = vld [vmem:[%s2192_s28 + $0xd0] sm:$0xff]  ;;  %v225_v23 = vld [vmem:[%s2192_s28 + $0xd8] sm:$0xff]  ;;  %v226_v25 = vld [vmem:[%s2192_s28 + $0xe0] sm:$0x1] }
  0x17   : > { %1981 = vmatmul.mubr.msk.f32.gmra.mrb[2].mxu1 %vm231_vm4, %v219_v11  ;;  %1923 = vmatprep.mubr.msk.f32.mxu0 %vm2122_vm1, %v2123_v6  ;;  %v207_v26 = vld [vmem:[%s2192_s28 + $0x48] sm:$0xff]  ;;  %v208_v27 = vld [vmem:[%s2192_s28 + $0x50] sm:$0xff]  ;;  %v209_v28 = vld [vmem:[%s2192_s28 + $0x58] sm:$0xff] }
  0x18   : > { %1983 = vmatprep.mubr.msk.f32.mxu1 %vm2122_vm1, %v2123_v6  ;;  %v210_v29 = vld [vmem:[%s2192_s28 + $0x60] sm:$0xff]  ;;  %v211_v30 = vld [vmem:[%s2192_s28 + $0x68] sm:$0xff]  ;;  %v212_v31 = vld [vmem:[%s2192_s28 + $0x70] sm:$0xff] }
  0x19   : > { %v213_v32 = vld [vmem:[%s2192_s28 + $0x78] sm:$0xff]  ;;  %v214_v33 = vld [vmem:[%s2192_s28 + $0x80] sm:$0xff]  ;;  %v215_v34 = vld [vmem:[%s2192_s28 + $0x88] sm:$0xff] }
  0x1a   : > { %1924 = vmatmul.mubr.msk.f32.gmra.mrb[4].mxu0 %vm231_vm4, %v200_v12  ;;  %v216_v35 = vld [vmem:[%s2192_s28 + $0x90] sm:$0xff]  ;;  %v217_v36 = vld [vmem:[%s2192_s28 + $0x98] sm:$0xff] }
  0x1b   : > { %1984 = vmatmul.mubr.msk.f32.gmra.mrb[4].mxu1 %vm231_vm4, %v220_v13  ;;  %1926 = vmatprep.mubr.msk.f32.mxu0 %vm2122_vm1, %v2123_v6  ;;  %v1181_v10 = vld [vmem:[%s2662_s2 + $0x10] sm:$0xff]  ;;  %v1182_v11 = vld [vmem:[%s2662_s2 + $0x18] sm:$0xff] }
  0x1c   : > { %1986 = vmatprep.mubr.msk.f32.mxu1 %vm2122_vm1, %v2123_v6  ;;  %v2026_v12 = vpack.c.bf16 %v1182_v11, %v1181_v10 }
  0x1e   : > { %1927 = vmatmul.mubr.msk.f32.gmra.mrb[6].mxu0 %vm231_vm4, %v201_v14  ;;  %2027 = vmatpush1.bf16.msra.mxu1 %v2026_v12 }
  0x1f   : > { %1987 = vmatmul.mubr.msk.f32.gmra.mrb[6].mxu1 %vm231_vm4, %v221_v15  ;;  %1929 = vmatprep.mubr.msk.f32.mxu0 %vm2122_vm1, %v2123_v6 }
  0x20   : > { %1989 = vmatprep.mubr.msk.f32.mxu1 %vm2122_vm1, %v2123_v6  ;;  %2028 = vmatprep.subr.bf16.mxu1 %v2121_v3 }
  0x22   : > { %1930 = vmatmul.mubr.msk.f32.gmra.mrb[8].mxu0 %vm231_vm4, %v202_v16 }
  0x23   : > { %1990 = vmatmul.mubr.msk.f32.gmra.mrb[8].mxu1 %vm231_vm4, %v222_v17  ;;  %1932 = vmatprep.mubr.msk.f32.mxu0 %vm2122_vm1, %v2123_v6 }
  0x24   : > { %1992 = vmatprep.mubr.msk.f32.mxu1 %vm2122_vm1, %v2123_v6 }
  0x26   : > { %1933 = vmatmul.mubr.msk.f32.gmra.mrb[10].mxu0 %vm231_vm4, %v203_v18 }
  0x27   : > { %1993 = vmatmul.mubr.msk.f32.gmra.mrb[10].mxu1 %vm231_vm4, %v223_v19  ;;  %1935 = vmatprep.mubr.msk.f32.mxu0 %vm2122_vm1, %v2123_v6 }
  0x28   : > { %1995 = vmatprep.mubr.msk.f32.mxu1 %vm2122_vm1, %v2123_v6 }
  0x2a   : > { %1936 = vmatmul.mubr.msk.f32.gmra.mrb[12].mxu0 %vm231_vm4, %v204_v20 }
  0x2b   : > { %1996 = vmatmul.mubr.msk.f32.gmra.mrb[12].mxu1 %vm231_vm4, %v224_v21  ;;  %1938 = vmatprep.mubr.msk.f32.mxu0 %vm2122_vm1, %v2123_v6  ;;  %v1183_v21 = vld [vmem:[%s2662_s2 + $0x20] sm:$0xff] }
  0x2c   : > { %1998 = vmatprep.mubr.msk.f32.mxu1 %vm2122_vm1, %v2123_v6 }
  0x2e   : > { %1939 = vmatmul.mubr.msk.f32.gmra.mrb[14].mxu0 %vm231_vm4, %v205_v22  ;;  %v1184_v22 = vld [vmem:[%s2662_s2 + $0x28] sm:$0xff] }
  0x2f   : > { %1999 = vmatmul.mubr.msk.f32.gmra.mrb[14].mxu1 %vm231_vm4, %v225_v23  ;;  %1941 = vmatprep.mubr.msk.f32.mxu0 %vm2122_vm1, %v2123_v6  ;;  %v2029_v23 = vpack.c.bf16 %v1184_v22, %v1183_v21 }
  0x30   : > { %2001 = vmatprep.mubr.msk.f32.mxu1 %vm2122_vm1, %v2123_v6 }
  0x31   : > { %2030 = vmatpush1.bf16.msra.mxu1 %v2029_v23 }
  0x32   : > { %1942 = vmatmul.mubr.msk.f32.gmra.mrb[16].mxu0 %vm231_vm4, %v206_v24  ;;  %2031 = vmatprep.subr.bf16.mxu1 %v2121_v3 }
  0x33   : > { %2002 = vmatmul.mubr.msk.f32.gmra.mrb[16].mxu1 %vm231_vm4, %v226_v25  ;;  %1944 = vmatprep.mubr.msk.f32.mxu0 %vm2122_vm1, %v2123_v6 }
  0x36   : > { %1945 = vmatmul.mubr.msk.f32.gmra.mrb[18].mxu0 %vm231_vm4, %v207_v26 }
  0x37   : > { %1947 = vmatprep.mubr.msk.f32.mxu0 %vm2122_vm1, %v2123_v6 }
  0x3a   : > { %1948 = vmatmul.mubr.msk.f32.gmra.mrb[20].mxu0 %vm231_vm4, %v208_v27 }
  0x3b   : > { %1950 = vmatprep.mubr.msk.f32.mxu0 %vm2122_vm1, %v2123_v6 }
  0x3e   : > { %1951 = vmatmul.mubr.msk.f32.gmra.mrb[22].mxu0 %vm231_vm4, %v209_v28 }
  0x3f   : > { %1953 = vmatprep.mubr.msk.f32.mxu0 %vm2122_vm1, %v2123_v6 }
  0x42   : > { %1954 = vmatmul.mubr.msk.f32.gmra.mrb[24].mxu0 %vm231_vm4, %v210_v29 }
  0x43   : > { %1956 = vmatprep.mubr.msk.f32.mxu0 %vm2122_vm1, %v2123_v6 }
  0x46   : > { %1957 = vmatmul.mubr.msk.f32.gmra.mrb[26].mxu0 %vm231_vm4, %v211_v30 }
  0x47   : > { %1959 = vmatprep.mubr.msk.f32.mxu0 %vm2122_vm1, %v2123_v6 }
  0x4a   : > { %1960 = vmatmul.mubr.msk.f32.gmra.mrb[28].mxu0 %vm231_vm4, %v212_v31 }
  0x4b   : > { %1962 = vmatprep.mubr.msk.f32.mxu0 %vm2122_vm1, %v2123_v6 }
  0x4e   : > { %1963 = vmatmul.mubr.msk.f32.gmra.mrb[30].mxu0 %vm231_vm4, %v213_v32 }
  0x4f   : > { %1965 = vmatprep.mubr.msk.f32.mxu0 %vm2122_vm1, %v2123_v6 }
  0x52   : > { %1966 = vmatmul.mubr.msk.f32.gmra.mrb[32].mxu0 %vm231_vm4, %v214_v33 }
  0x53   : > { %1968 = vmatprep.mubr.msk.f32.mxu0 %vm2122_vm1, %v2123_v6 }
  0x56   : > { %1969 = vmatmul.mubr.msk.f32.gmra.mrb[34].mxu0 %vm231_vm4, %v215_v34 }
  0x57   : > { %1971 = vmatprep.mubr.msk.f32.mxu0 %vm2122_vm1, %v2123_v6 }
  0x5a   : > { %1972 = vmatmul.mubr.msk.f32.gmra.mrb[36].mxu0 %vm231_vm4, %v216_v35 }
  0x5b   : > { %1974 = vmatprep.mubr.msk.f32.mxu0 %vm2122_vm1, %v2123_v6  ;;  %vm599_vm1 = vcmask 130052  }
  0x5e   : > { %1975 = vmatmul.mubr.msk.f32.gmra.mrb[38].mxu0 %vm231_vm4, %v217_v36  ;;  %vm700_vm4 = vcmask 391424  }
  0xe5   : > { %v389_v38 = vpop.f32.mrb[0].mxu0 }
  0xe6   : > { %v489_v37 = vpop.f32.mrb[0].mxu1  ;;  %534 = vst.msk [vmem:[#allocation2] sm:$0xff] %vm533_vm5, %v389_v38  ;;  %v1919_v40 = vpop.f32.mrb[1].mxu0 }
  0xe7   : > { %554 = vst.msk [vmem:[#allocation2 + $0xa0] sm:$0xff] %vm533_vm5, %v489_v37  ;;  %v1979_v39 = vpop.f32.mrb[1].mxu1  ;;  %v1185_v37 = vld [vmem:[%s2662_s2 + $0x30] sm:$0xff] }
  0xe8   : > { %v1186_v39 = vld [vmem:[%s2662_s2 + $0x38] sm:$0xff] }
  0xe9   : > { %v394_v41 = vpop.f32.mrb[2].mxu0 }
  0xea   : > { %v494_v42 = vpop.f32.mrb[2].mxu1  ;;  %535 = vst.msk [vmem:[#allocation2 + $0x8] sm:$0xff] %vm533_vm5, %v394_v41  ;;  %v1922_v44 = vpop.f32.mrb[3].mxu0  ;;  %v2032_v41 = vpack.c.bf16 %v1186_v39, %v1185_v37 }
  0xeb   : > { %555 = vst.msk [vmem:[#allocation2 + $0xa8] sm:$0xff] %vm533_vm5, %v494_v42  ;;  %v1982_v43 = vpop.f32.mrb[3].mxu1 }
  0xec   : > { %2033 = vmatpush1.bf16.msra.mxu1 %v2032_v41 }
  0xed   : > { %v399_v46 = vpop.f32.mrb[4].mxu0  ;;  %2034 = vmatprep.subr.bf16.mxu1 %v2121_v3 }
  0xee   : > { %v499_v45 = vpop.f32.mrb[4].mxu1  ;;  %536 = vst.msk [vmem:[#allocation2 + $0x10] sm:$0xff] %vm533_vm5, %v399_v46  ;;  %v1925_v48 = vpop.f32.mrb[5].mxu0 }
  0xef   : > { %556 = vst.msk [vmem:[#allocation2 + $0xb0] sm:$0xff] %vm533_vm5, %v499_v45  ;;  %v1985_v47 = vpop.f32.mrb[5].mxu1  ;;  %v1187_v48 = vld [vmem:[%s2662_s2 + $0x40] sm:$0xff] }
  0xf1   : > { %v404_v49 = vpop.f32.mrb[6].mxu0  ;;  %v695_v51 = vld [vmem:[#allocation2 + $0x2] ss:$2 sm:$0x7f] }
  0xf2   : > { %v504_v50 = vpop.f32.mrb[6].mxu1  ;;  %537 = vst.msk [vmem:[#allocation2 + $0x18] sm:$0xff] %vm533_vm5, %v404_v49  ;;  %697 = vrot.lane.b32.xlu1 %v695_v51, %s2125_s29  ;;  %v621_v53 = vld [vmem:[#allocation2 + $0x1] ss:$2 sm:$0x7f]  ;;  %v1928_v54 = vpop.f32.mrb[7].mxu0 }
  0xf3   : > { %557 = vst.msk [vmem:[#allocation2 + $0xb8] sm:$0xff] %vm533_vm5, %v504_v50  ;;  %v1988_v52 = vpop.f32.mrb[7].mxu1  ;;  %623 = vrot.lane.b32.xlu0 %v621_v53, %s2126_s30  ;;  %v564_v55 = vld [vmem:[#allocation2] ss:$2 sm:$0x7f] }
  0xf4   : > { %566 = vst.msk [vmem:[#allocation3] sm:$0x7f] %vm565_vm6, %v564_v55  ;;  %v1188_v49 = vld [vmem:[%s2662_s2 + $0x48] sm:$0xff] }
  0xf5   : > { %v409_v57 = vpop.f32.mrb[8].mxu0  ;;  %v2035_v55 = vpack.c.bf16 %v1188_v49, %v1187_v48 }
  0xf6   : > { %v509_v56 = vpop.f32.mrb[8].mxu1  ;;  %v821_v58 = vld [vmem:[#allocation2 + $0xa5] ss:$2 sm:$0x7f]  ;;  %538 = vst.msk [vmem:[#allocation2 + $0x20] sm:$0xff] %vm533_vm5, %v409_v57  ;;  %v1931_v61 = vpop.f32.mrb[9].mxu0 }
  0xf7   : > { %558 = vst.msk [vmem:[#allocation2 + $0xc0] sm:$0xff] %vm533_vm5, %v509_v56  ;;  %v1991_v59 = vpop.f32.mrb[9].mxu1  ;;  %v823_v60 = vrot.slane %v821_v58, 5  ;;  %v895_v62 = vld [vmem:[#allocation2 + $0xa6] ss:$2 sm:$0x7f]  ;;  %2036 = vmatpush1.bf16.msra.mxu1 %v2035_v55 }
  0xf8   : > { %v897_v7 = vrot.slane %v895_v62, 5  ;;  %v969_v9 = vld [vmem:[#allocation2 + $0xa7] ss:$2 sm:$0x7f]  ;;  %v1190_v61 = vld [vmem:[%s2662_s2 + $0x58] sm:$0xff]  ;;  %2037 = vmatprep.subr.bf16.mxu1 %v2121_v3 }
  0xf9   : > { %824 = vrot.lane.b32.xlu0 %v823_v60, %s2127_s7  ;;  %v414_v1 = vpop.f32.mrb[10].mxu0  ;;  %v917_v4 = vld [vmem:[#allocation2 + $0x11] ss:$2 sm:$0x7f]  ;;  %v971_v16 = vrot.slane %v969_v9, 5 }
  0xfa   : > { %v514_v2 = vpop.f32.mrb[10].mxu1  ;;  %539 = vst.msk [vmem:[#allocation2 + $0x28] sm:$0xff] %vm533_vm5, %v414_v1  ;;  %919 = vrot.lane.b32.xlu1 %v917_v4, %s2128_s10  ;;  %v1934_v8 = vpop.f32.mrb[11].mxu0  ;;  %v769_v30 = vld [vmem:[#allocation2 + $0xf] ss:$2 sm:$0x7f] }
  0xfb   : > { %559 = vst.msk [vmem:[#allocation2 + $0xc8] sm:$0xff] %vm533_vm5, %v514_v2  ;;  %v1994_v6 = vpop.f32.mrb[11].mxu1  ;;  %v843_v33 = vld [vmem:[#allocation2 + $0x10] ss:$2 sm:$0x7f]  ;;  %v1192_v1 = vld [vmem:[%s2662_s2 + $0x68] sm:$0xff] }
  0xfc   : > { %v1189_v59 = vld [vmem:[%s2662_s2 + $0x50] sm:$0xff]  ;;  %v2041_v12 = vpack.c.bf16 %v1192_v1, %v1191_v0 }
  0xfd   : > { %898 = vrot.lane.b32.xlu0 %v897_v7, %s2129_s17  ;;  %v419_v14 = vpop.f32.mrb[12].mxu0  ;;  %v2038_v63 = vpack.c.bf16 %v1190_v61, %v1189_v59 }
  0xfe   : > { %v519_v13 = vpop.f32.mrb[12].mxu1  ;;  %v684_v15 = vld [vmem:[#allocation2 + $0xb5] ss:$2 sm:$0x7f]  ;;  %540 = vst.msk [vmem:[#allocation2 + $0x30] sm:$0xff] %vm533_vm5, %v419_v14  ;;  %v1937_v18 = vpop.f32.mrb[13].mxu0 }
  0xff   : > { %560 = vst.msk [vmem:[#allocation2 + $0xd0] sm:$0xff] %vm533_vm5, %v519_v13  ;;  %v686_v17 = vrot.slane %v684_v15, 6  ;;  %v1997_v19 = vpop.f32.mrb[13].mxu1  ;;  %v758_v20 = vld [vmem:[#allocation2 + $0xb6] ss:$2 sm:$0x7f]  ;;  %2039 = vmatpush1.bf16.msra.mxu1 %v2038_v63 }
 0x100   : > { %v760_v28 = vrot.slane %v758_v20, 6  ;;  %v1037_v34 = vld [vmem:[#allocation2 + $0xb4] ss:$2 sm:$0x7f]  ;;  %2040 = vmatprep.subr.bf16.mxu1 %v2121_v3 }
 0x101   : > { %972 = vrot.lane.b32.xlu0 %v971_v16, %s2128_s10  ;;  %687 = vrot.lane.b32.xlu1 %v686_v17, %s2126_s30  ;;  %v1126_v24 = vld [vmem:[#allocation2 + $0x20] ss:$2 sm:$0x7f]  ;;  %v424_v25 = vpop.f32.mrb[14].mxu0  ;;  %v1039_v44 = vrot.slane %v1037_v34, 5  ;;  %v1193_v13 = vld [vmem:[%s2662_s2 + $0x70] sm:$0xff] }
 0x102   : > { %v524_v26 = vpop.f32.mrb[14].mxu1  ;;  %1127 = vst.msk [vmem:[#allocation3 + $0x8] sm:$0x7f] %vm565_vm6, %v1126_v24  ;;  %v1940_v29 = vpop.f32.mrb[15].mxu0  ;;  %v1194_v14 = vld [vmem:[%s2662_s2 + $0x78] sm:$0xff]  ;;  %vm690_vm6 = vcmask 261250  }
 0x103   : > { %541 = vst.msk [vmem:[#allocation2 + $0x38] sm:$0xff] %vm533_vm5, %v424_v25  ;;  %561 = vst.msk [vmem:[#allocation2 + $0xd8] sm:$0xff] %vm533_vm5, %v524_v26  ;;  %v2000_v27 = vpop.f32.mrb[15].mxu1  ;;  %v1058_v35 = vld [vmem:[#allocation2 + $0x1f] ss:$2 sm:$0x7f]  ;;  %2042 = vmatpush1.bf16.msra.mxu1 %v2041_v12  ;;  %v2044_v21 = vpack.c.bf16 %v1194_v14, %v1193_v13 }
 0x104   : > { %v703_v38 = vld [vmem:[#allocation2 + $0x20] ss:$2 sm:$0x7f]  ;;  %v832_v47 = vld [vmem:[#allocation2 + $0xc3] ss:$2 sm:$0x7f]  ;;  %2043 = vmatprep.subr.bf16.mxu1 %v2121_v3 }
 0x105   : > { %761 = vrot.lane.b32.xlu1 %v760_v28, %s2125_s29  ;;  %771 = vrot.lane.b32.xlu0 %v769_v30, %s2127_s7  ;;  %v429_v32 = vpop.f32.mrb[16].mxu0  ;;  %v613_v40 = vld [vmem:[#allocation2 + $0xb4] ss:$2 sm:$0x7f]  ;;  %v705_v45 = vrot.slane %v703_v38, 1  ;;  %v834_v53 = vrot.slane %v832_v47, 6 }
 0x106   : > { %v529_v31 = vpop.f32.mrb[16].mxu1  ;;  %542 = vst.msk [vmem:[#allocation2 + $0x40] sm:$0xff] %vm533_vm5, %v429_v32  ;;  %v1943_v36 = vpop.f32.mrb[17].mxu0  ;;  %v615_v43 = vrot.slane %v613_v40, 6  ;;  %v1195_v25 = vld [vmem:[%s2662_s2 + $0x80] sm:$0xff]  ;;  %v1196_v26 = vld [vmem:[%s2662_s2 + $0x88] sm:$0xff] }
 0x107   : > { %563 = vst.msk [vmem:[#allocation2 + $0xe0] sm:$0x1] %vm562_vm7, %v529_v31  ;;  %v990_v52 = vld [vmem:[#allocation2 + $0x1e] ss:$2 sm:$0x7f]  ;;  %v2003_v2 = vpop.f32.mrb[17].mxu1  ;;  %2045 = vmatpush1.bf16.msra.mxu1 %v2044_v21 }
 0x108   : > { %618 = vst.msk [vmem:[#allocation3 + $0x50] sm:$0xfc] %vm617_vm8, %v615_v43  ;;  %v629_v54 = vld [vmem:[#allocation2 + $0x1f] ss:$2 sm:$0x7f]  ;;  %2046 = vmatprep.subr.bf16.mxu1 %v2121_v3 }
 0x109   : > { %845 = vrot.lane.b32.xlu0 %v843_v33, %s2129_s17  ;;  %1060 = vrot.lane.b32.xlu1 %v1058_v35, %s2130_s26  ;;  %v434_v42 = vpop.f32.mrb[18].mxu0  ;;  %619 = vst.msk [vmem:[#allocation3 + $0x60] sm:$0x1] %vm562_vm7, %v615_v43  ;;  %v568_v60 = vld [vmem:[#allocation2 + $0x1e] ss:$2 sm:$0x7f]  ;;  %v2047_v33 = vpack.c.bf16 %v1196_v26, %v1195_v25 }
 0x10a   : > { %543 = vst.msk [vmem:[#allocation2 + $0x48] sm:$0xff] %vm533_vm5, %v434_v42  ;;  %v1946_v46 = vpop.f32.mrb[19].mxu0  ;;  %v777_v58 = vld [vmem:[#allocation2 + $0x2d] ss:$2 sm:$0x7f]  ;;  %v570_v62 = vrot.slane %v568_v60, 1 }
 0x10b   : > { %v631_v7 = vrot.slane %v629_v54, 1  ;;  %v779_v8 = vrot.slane %v777_v58, 1  ;;  %v925_v10 = vld [vmem:[#allocation2 + $0x2f] ss:$2 sm:$0x7f]  ;;  %2048 = vmatpush1.bf16.msra.mxu1 %v2047_v33 }
 0x10c   : > { %573 = vst.msk [vmem:[#allocation3] sm:$0x80] %vm572_vm9, %v570_v62  ;;  %v851_v11 = vld [vmem:[#allocation2 + $0x2e] ss:$2 sm:$0x7f]  ;;  %v927_v16 = vrot.slane %v925_v10, 1 }
 0x10d   : > { %1040 = vrot.lane.b32.xlu0 %v1039_v44, %s2131_s5  ;;  %706 = vrot.lane.b32.xlu1 %v705_v45, %s2125_s29  ;;  %v439_v51 = vpop.f32.mrb[20].mxu0  ;;  %575 = vst.msk [vmem:[#allocation3 + $0x10] sm:$0x3f] %vm574_vm10, %v570_v62  ;;  %v853_v17 = vrot.slane %v851_v11, 1 }
 0x10e   : > { %v1159_v50 = vld [vmem:[#allocation2 + $0xd4] ss:$2 sm:$0x7f]  ;;  %544 = vst.msk [vmem:[#allocation2 + $0x50] sm:$0xff] %vm533_vm5, %v439_v51  ;;  %v1949_v57 = vpop.f32.mrb[21].mxu0 }
 0x10f   : > { %v1161_v56 = vrot.slane %v1159_v50, 6  ;;  %v1152_v27 = vld [vmem:[#allocation2 + $0xb6] ss:$2 sm:$0x7f] }
 0x110   : > { %v1154_v35 = vrot.slane %v1152_v27, 5 }
 0x111   : > { %1164 = vst.msk [vmem:[#allocation3 + $0x68] sm:$0x1] %vm562_vm7, %v1161_v56  ;;  %992 = vrot.lane.b32.xlu0 %v990_v52, %s2131_s5  ;;  %835 = vrot.lane.b32.xlu1 %v834_v53, %s2127_s7  ;;  %v1128_v4 = vld [vmem:[#allocation2 + $0x3e] ss:$2 sm:$0x7f]  ;;  %v444_v5 = vpop.f32.mrb[22].mxu0 }
 0x112   : > { %1163 = vst.msk [vmem:[#allocation3 + $0x58] sm:$0xfc] %vm617_vm8, %v1161_v56  ;;  %v1130_v6 = vrot.slane %v1128_v4, 1  ;;  %v1952_v9 = vpop.f32.mrb[23].mxu0  ;;  %vm692_vm7 = vcmask 254080   ;;  %vm764_vm8 = vcmask 392450  }
 0x113   : > { %545 = vst.msk [vmem:[#allocation2 + $0x58] sm:$0xff] %vm533_vm5, %v444_v5  ;;  %v714_v19 = vld [vmem:[#allocation2 + $0x3e] ss:$2 sm:$0x7f] }
 0x114   : > { %1132 = vst.msk [vmem:[#allocation3 + $0x8] sm:$0x80] %vm572_vm9, %v1130_v6  ;;  %v577_v20 = vld [vmem:[#allocation2 + $0x3c] ss:$2 sm:$0x7f]  ;;  %v716_v28 = vrot.slane %v714_v19, 2 }
 0x115   : > { %632 = vrot.lane.b32.xlu0 %v631_v7, %s2126_s30  ;;  %780 = vrot.lane.b32.xlu1 %v779_v8, %s2127_s7  ;;  %1133 = vst.msk [vmem:[#allocation3 + $0x18] sm:$0x3f] %vm574_vm10, %v1130_v6  ;;  %v449_v15 = vpop.f32.mrb[24].mxu0  ;;  %v640_v22 = vld [vmem:[#allocation2 + $0x3d] ss:$2 sm:$0x7f] }
 0x116   : > { %546 = vst.msk [vmem:[#allocation2 + $0x60] sm:$0xff] %vm533_vm5, %v449_v15  ;;  %v1955_v18 = vpop.f32.mrb[25].mxu0  ;;  %v579_v23 = vrot.slane %v577_v20, 2  ;;  %v642_v31 = vrot.slane %v640_v22, 2  ;;  %vm766_vm9 = vcmask 385280   ;;  %vm774_vm10 = vcmask 522624  }
 0x117   : > { %v997_v32 = vld [vmem:[#allocation2 + $0x3c] ss:$2 sm:$0x7f]  ;;  %v1065_v34 = vld [vmem:[#allocation2 + $0x3d] ss:$2 sm:$0x7f] }
 0x118   : > { %582 = vst.msk [vmem:[#allocation3 + $0x10] sm:$0xc0] %vm581_vm11, %v579_v23  ;;  %v999_v37 = vrot.slane %v997_v32, 1  ;;  %v1067_v39 = vrot.slane %v1065_v34, 1 }
 0x119   : > { %928 = vrot.lane.b32.xlu0 %v927_v16, %s2128_s10  ;;  %854 = vrot.lane.b32.xlu1 %v853_v17, %s2129_s17  ;;  %v454_v24 = vpop.f32.mrb[26].mxu0  ;;  %584 = vst.msk [vmem:[#allocation3 + $0x20] sm:$0x1f] %vm583_vm12, %v579_v23  ;;  %v788_v41 = vld [vmem:[#allocation2 + $0x4b] ss:$2 sm:$0x7f] }
 0x11a   : > { %547 = vst.msk [vmem:[#allocation2 + $0x68] sm:$0xff] %vm533_vm5, %v454_v24  ;;  %v1958_v29 = vpop.f32.mrb[27].mxu0  ;;  %v862_v40 = vld [vmem:[#allocation2 + $0x4c] ss:$2 sm:$0x7f]  ;;  %v790_v47 = vrot.slane %v788_v41, 2 }
 0x11b   : > { %v1166_v30 = vld [vmem:[#allocation3 + $0x8] sm:$0xff]  ;;  %1156 = vst.msk [vmem:[#allocation3 + $0x48] sm:$0xf8] %vm608_vm13, %v1154_v35  ;;  %v864_v44 = vrot.slane %v862_v40, 2 }
 0x11c   : > { %1820 = vmatprep.mubr.msk.f32.mxu1 %vm533_vm5, %v1166_v30  ;;  %1157 = vst.msk [vmem:[#allocation3 + $0x58] sm:$0x3] %vm610_vm14, %v1154_v35  ;;  %v936_v48 = vld [vmem:[#allocation2 + $0x4d] ss:$2 sm:$0x7f] }
 0x11d   : > { %717 = vrot.lane.b32.xlu1 %v716_v28, %s2125_s29  ;;  %643 = vrot.lane.b32.xlu0 %v642_v31, %s2126_s30  ;;  %v459_v36 = vpop.f32.mrb[28].mxu0  ;;  %v586_v42 = vld [vmem:[#allocation2 + $0x5a] ss:$2 sm:$0x7f]  ;;  %v938_v52 = vrot.slane %v936_v48, 2 }
 0x11e   : > { %548 = vst.msk [vmem:[#allocation2 + $0x70] sm:$0xff] %vm533_vm5, %v459_v36  ;;  %v1961_v38 = vpop.f32.mrb[29].mxu0  ;;  %v588_v43 = vrot.slane %v586_v42, 3  ;;  %v651_v50 = vld [vmem:[#allocation2 + $0x5b] ss:$2 sm:$0x7f] }
 0x11f   : > { %v653_v54 = vrot.slane %v651_v50, 3  ;;  %v1007_v55 = vld [vmem:[#allocation2 + $0x5a] ss:$2 sm:$0x7f] }
 0x120   : > { %591 = vst.msk [vmem:[#allocation3 + $0x20] sm:$0xe0] %vm590_vm15, %v588_v43  ;;  %v1009_v58 = vrot.slane %v1007_v55, 2  ;;  %v1075_v61 = vld [vmem:[#allocation2 + $0x5b] ss:$2 sm:$0x7f] }
 0x121   : > { %1000 = vrot.lane.b32.xlu1 %v999_v37, %s2131_s5  ;;  %1068 = vrot.lane.b32.xlu0 %v1067_v39, %s2130_s26  ;;  %v464_v3 = vpop.f32.mrb[30].mxu0  ;;  %v1134_v46 = vld [vmem:[#allocation2 + $0x5c] ss:$2 sm:$0x7f]  ;;  %593 = vst.msk [vmem:[#allocation3 + $0x30] sm:$0xf] %vm592_vm0, %v588_v43 }
 0x122   : > { %549 = vst.msk [vmem:[#allocation2 + $0x78] sm:$0xff] %vm533_vm5, %v464_v3  ;;  %v1964_v45 = vpop.f32.mrb[31].mxu0  ;;  %v1136_v49 = vrot.slane %v1134_v46, 2  ;;  %v725_v56 = vld [vmem:[#allocation2 + $0x5c] ss:$2 sm:$0x7f] }
 0x123   : > { %v727_v60 = vrot.slane %v725_v56, 3  ;;  %v1077_v0 = vrot.slane %v1075_v61, 2  ;;  %v1105_v39 = vld [vmem:[#allocation2 + $0xb5] ss:$2 sm:$0x7f] }
 0x124   : > { %1138 = vst.msk [vmem:[#allocation3 + $0x18] sm:$0xc0] %vm581_vm11, %v1136_v49  ;;  %v1107_v41 = vrot.slane %v1105_v39, 5  ;;  %v906_v42 = vld [vmem:[#allocation2 + $0xc4] ss:$2 sm:$0x7f] }
 0x125   : > { %865 = vrot.lane.b32.xlu1 %v864_v44, %s2129_s17  ;;  %791 = vrot.lane.b32.xlu0 %v790_v47, %s2127_s7  ;;  %v469_v51 = vpop.f32.mrb[32].mxu0  ;;  %1139 = vst.msk [vmem:[#allocation3 + $0x28] sm:$0x1f] %vm583_vm12, %v1136_v49  ;;  %v799_v62 = vld [vmem:[#allocation2 + $0x69] ss:$2 sm:$0x7f] }
 0x126   : > { %550 = vst.msk [vmem:[#allocation2 + $0x80] sm:$0xff] %vm533_vm5, %v469_v51  ;;  %v1967_v53 = vpop.f32.mrb[33].mxu0  ;;  %v801_v2 = vrot.slane %v799_v62, 3  ;;  %v873_v5 = vld [vmem:[#allocation2 + $0x6a] ss:$2 sm:$0x7f] }
 0x127   : > { %v875_v12 = vrot.slane %v873_v5, 3  ;;  %v947_v15 = vld [vmem:[#allocation2 + $0x6b] ss:$2 sm:$0x7f]  ;;  %v908_v43 = vrot.slane %v906_v42, 6  ;;  %vm848_vm11 = vcmask 653824  }
 0x128   : > { %v949_v17 = vrot.slane %v947_v15, 3  ;;  %v980_v3 = vld [vmem:[#allocation2 + $0xc5] ss:$2 sm:$0x7f]  ;;  %vm922_vm12 = vcmask 785024  }
 0x129   : > { %939 = vrot.lane.b32.xlu1 %v938_v52, %s2128_s10  ;;  %654 = vrot.lane.b32.xlu0 %v653_v54, %s2126_s30  ;;  %v474_v57 = vpop.f32.mrb[34].mxu0  ;;  %v982_v44 = vrot.slane %v980_v3, 6  ;;  %v1048_v45 = vld [vmem:[#allocation2 + $0xd2] ss:$2 sm:$0x7f] }
 0x12a   : > { %551 = vst.msk [vmem:[#allocation2 + $0x88] sm:$0xff] %vm533_vm5, %v474_v57  ;;  %v1970_v59 = vpop.f32.mrb[35].mxu0  ;;  %v1116_v46 = vld [vmem:[#allocation2 + $0xd3] ss:$2 sm:$0x7f]  ;;  %v1050_v47 = vrot.slane %v1048_v45, 6 }
 0x12b   : > { %v1118_v48 = vrot.slane %v1116_v46, 6  ;;  %v1178_v45 = vld [vmem:[#allocation3 + $0x68] sm:$0x1] }
 0x12d   : > { %1010 = vrot.lane.b32.xlu1 %v1009_v58, %s2131_s5  ;;  %728 = vrot.lane.b32.xlu0 %v727_v60, %s2125_s29  ;;  %v479_v63 = vpop.f32.mrb[36].mxu0  ;;  %v662_v4 = vld [vmem:[#allocation2 + $0x79] ss:$2 sm:$0x7f] }
 0x12e   : > { %552 = vst.msk [vmem:[#allocation2 + $0x90] sm:$0xff] %vm533_vm5, %v479_v63  ;;  %v1973_v1 = vpop.f32.mrb[37].mxu0  ;;  %v1140_v7 = vld [vmem:[#allocation2 + $0x7a] ss:$2 sm:$0x7f]  ;;  %v664_v8 = vrot.slane %v662_v4, 4 }
 0x12f   : > { %v1142_v10 = vrot.slane %v1140_v7, 3  ;;  %v595_v11 = vld [vmem:[#allocation2 + $0x78] ss:$2 sm:$0x7f] }
 0x130   : > { %v736_v13 = vld [vmem:[#allocation2 + $0x7a] ss:$2 sm:$0x7f]  ;;  %v597_v14 = vrot.slane %v595_v11, 4 }
 0x131   : > { %1078 = vrot.lane.b32.xlu1 %v1077_v0, %s2130_s26  ;;  %802 = vrot.lane.b32.xlu0 %v801_v2, %s2127_s7  ;;  %v484_v6 = vpop.f32.mrb[38].mxu0  ;;  %1144 = vst.msk [vmem:[#allocation3 + $0x28] sm:$0xe0] %vm590_vm15, %v1142_v10  ;;  %v738_v16 = vrot.slane %v736_v13, 4  ;;  %vm840_vm15 = vcmask 516480  }
 0x132   : > { %553 = vst.msk [vmem:[#allocation2 + $0x98] sm:$0xff] %vm533_vm5, %v484_v6  ;;  %v1976_v9 = vpop.f32.mrb[39].mxu0  ;;  %v1017_v19 = vld [vmem:[#allocation2 + $0x78] ss:$2 sm:$0x7f] }
 0x133   : > { %1145 = vst.msk [vmem:[#allocation3 + $0x38] sm:$0xf] %vm592_vm0, %v1142_v10  ;;  %v1019_v21 = vrot.slane %v1017_v19, 3  ;;  %v1085_v23 = vld [vmem:[#allocation2 + $0x79] ss:$2 sm:$0x7f] }
 0x134   : > { %600 = vst.msk [vmem:[#allocation3 + $0x30] sm:$0xf0] %vm599_vm1, %v597_v14  ;;  %v1087_v29 = vrot.slane %v1085_v23, 3  ;;  %vm1063_vm0 = vcmask 1047424  }
 0x135   : > { %665 = vrot.lane.b32.xlu1 %v664_v8, %s2126_s30  ;;  %876 = vrot.lane.b32.xlu0 %v875_v12, %s2129_s17  ;;  %602 = vst.msk [vmem:[#allocation3 + $0x40] sm:$0x7] %vm601_vm2, %v597_v14  ;;  %v810_v18 = vld [vmem:[#allocation2 + $0x87] ss:$2 sm:$0x7f] }
 0x136   : > { %v812_v20 = vrot.slane %v810_v18, 4  ;;  %v884_v22 = vld [vmem:[#allocation2 + $0x88] ss:$2 sm:$0x7f]  ;;  %v1168_v14 = vld [vmem:[#allocation3 + $0x18] sm:$0xff] }
 0x137   : > { %v886_v27 = vrot.slane %v884_v22, 4  ;;  %v958_v30 = vld [vmem:[#allocation2 + $0x89] ss:$2 sm:$0x7f] }
 0x138   : > { %v960_v32 = vrot.slane %v958_v30, 4 }
 0x139   : > { %739 = vrot.lane.b32.xlu1 %v738_v16, %s2125_s29  ;;  %950 = vrot.lane.b32.xlu0 %v949_v17, %s2128_s10  ;;  %v1146_v24 = vld [vmem:[#allocation2 + $0x98] ss:$2 sm:$0x7f]  ;;  %v673_v31 = vld [vmem:[#allocation2 + $0x97] ss:$2 sm:$0x7f] }
 0x13a   : > { %v1148_v25 = vrot.slane %v1146_v24, 4  ;;  %v604_v26 = vld [vmem:[#allocation2 + $0x96] ss:$2 sm:$0x7f]  ;;  %v675_v33 = vrot.slane %v673_v31, 5 }
 0x13b   : > { %v606_v28 = vrot.slane %v604_v26, 5  ;;  %v1027_v34 = vld [vmem:[#allocation2 + $0x96] ss:$2 sm:$0x7f] }
 0x13c   : > { %1150 = vst.msk [vmem:[#allocation3 + $0x38] sm:$0xf0] %vm599_vm1, %v1148_v25  ;;  %v747_v35 = vld [vmem:[#allocation2 + $0x98] ss:$2 sm:$0x7f]  ;;  %v1029_v36 = vrot.slane %v1027_v34, 4 }
 0x13d   : > { %813 = vrot.lane.b32.xlu1 %v812_v20, %s2127_s7  ;;  %1020 = vrot.lane.b32.xlu0 %v1019_v21, %s2131_s5  ;;  %1151 = vst.msk [vmem:[#allocation3 + $0x48] sm:$0x7] %vm601_vm2, %v1148_v25  ;;  %v749_v37 = vrot.slane %v747_v35, 5  ;;  %v1095_v38 = vld [vmem:[#allocation2 + $0x97] ss:$2 sm:$0x7f] }
 0x13e   : > { %609 = vst.msk [vmem:[#allocation3 + $0x40] sm:$0xf8] %vm608_vm13, %v606_v28  ;;  %v1097_v40 = vrot.slane %v1095_v38, 4  ;;  %vm995_vm13 = vcmask 916224   ;;  %vm635_vm1 = vcmask 261255   ;;  %vm637_vm2 = vcmask 259200  }
 0x13f   : > { %611 = vst.msk [vmem:[#allocation3 + $0x50] sm:$0x3] %vm610_vm14, %v606_v28  ;;  %vm838_vm14 = vcmask 523650   ;;  %v1170_v24 = vld [vmem:[#allocation3 + $0x28] sm:$0xff] }
 0x141   : > { %887 = vrot.lane.b32.xlu1 %v886_v27, %s2129_s17  ;;  %1088 = vrot.lane.b32.xlu0 %v1087_v29, %s2130_s26 }
 0x143   : > { %v1172_v34 = vld [vmem:[#allocation3 + $0x38] sm:$0xff] }
 0x144   : > { %v1174_v42 = vld [vmem:[#allocation3 + $0x48] sm:$0xff] }
 0x145   : > { %961 = vrot.lane.b32.xlu1 %v960_v32, %s2128_s10  ;;  %676 = vrot.lane.b32.xlu0 %v675_v33, %s2126_s30 }
 0x149   : > { %1030 = vrot.lane.b32.xlu1 %v1029_v36, %s2131_s5  ;;  %750 = vrot.lane.b32.xlu0 %v749_v37, %s2125_s29 }
 0x14d   : > { %1098 = vrot.lane.b32.xlu1 %v1097_v40, %s2130_s26  ;;  %1108 = vrot.lane.b32.xlu0 %v1107_v41, %s2130_s26 }
 0x151   : > { %909 = vrot.lane.b32.xlu1 %v908_v43, %s2129_s17  ;;  %983 = vrot.lane.b32.xlu0 %v982_v44, %s2128_s10  ;;  %v1176_v43 = vld [vmem:[#allocation3 + $0x58] sm:$0xff] }
 0x155   : > { %1051 = vrot.lane.b32.xlu1 %v1050_v47, %s2131_s5  ;;  %1119 = vrot.lane.b32.xlu0 %v1118_v48, %s2130_s26 }
 0x164   : > { %v698_v49 = vpop.permute.xlu1 %697 }
 0x165   : > { %v624_v50 = vpop.permute.xlu0 %623 }
 0x166   : > { %627 = vst.msk [vmem:[#allocation3] sm:$0x7f] %vm626_vm3, %v624_v50  ;;  %vm709_vm3 = vcmask 392455  }
 0x167   : > { %701 = vst.msk [vmem:[#allocation3] sm:$0x7f] %vm700_vm4, %v698_v49  ;;  %vm711_vm4 = vcmask 390400  }
 0x16b   : > { %v2474_v51 = vpop.permute.xlu0 %824 }
 0x16c   : > { %v920_v52 = vpop.permute.xlu1 %919 }
 0x16f   : > { %v2476_v53 = vpop.permute.xlu0 %898 }
 0x173   : > { %v2478_v54 = vpop.permute.xlu0 %972  ;;  %v688_v55 = vpop.permute.xlu1 %687 }
 0x174   : > { %691 = vst.msk [vmem:[#allocation3 + $0x50] sm:$0xfc] %vm690_vm6, %v688_v55  ;;  %vm783_vm6 = vcmask 523655  }
 0x175   : > { %693 = vst.msk [vmem:[#allocation3 + $0x60] sm:$0x1] %vm692_vm7, %v688_v55  ;;  %vm785_vm7 = vcmask 521600  }
 0x177   : > { %v762_v56 = vpop.permute.xlu1 %761  ;;  %v772_v57 = vpop.permute.xlu0 %771 }
 0x178   : > { %765 = vst.msk [vmem:[#allocation3 + $0x50] sm:$0xfc] %vm764_vm8, %v762_v56  ;;  %vm857_vm8 = vcmask 654855  }
 0x179   : > { %767 = vst.msk [vmem:[#allocation3 + $0x60] sm:$0x1] %vm766_vm9, %v762_v56  ;;  %vm859_vm9 = vcmask 652800  }
 0x17a   : > { %775 = vst.msk [vmem:[#allocation3] sm:$0x7f] %vm774_vm10, %v772_v57  ;;  %vm931_vm10 = vcmask 786055  }
 0x17b   : > { %v846_v58 = vpop.permute.xlu0 %845  ;;  %v1061_v59 = vpop.permute.xlu1 %1060 }
 0x17c   : > { %849 = vst.msk [vmem:[#allocation3] sm:$0x7f] %vm848_vm11, %v846_v58  ;;  %vm933_vm11 = vcmask 784000  }
 0x17d   : > { %923 = vst.msk [vmem:[#allocation3] sm:$0x7f] %vm922_vm12, %v920_v52  ;;  %vm646_vm12 = vcmask 261254  }
 0x17f   : > { %v2480_v60 = vpop.permute.xlu0 %1040  ;;  %v707_v61 = vpop.permute.xlu1 %706 }
 0x183   : > { %v993_v62 = vpop.permute.xlu0 %992  ;;  %v836_v63 = vpop.permute.xlu1 %835 }
 0x184   : > { %996 = vst.msk [vmem:[#allocation3] sm:$0x7f] %vm995_vm13, %v993_v62  ;;  %vm648_vm13 = vcmask 258176  }
 0x185   : > { %839 = vst.msk [vmem:[#allocation3 + $0x50] sm:$0xfc] %vm838_vm14, %v836_v63  ;;  %vm720_vm14 = vcmask 392454  }
 0x186   : > { %841 = vst.msk [vmem:[#allocation3 + $0x60] sm:$0x1] %vm840_vm15, %v836_v63  ;;  %vm722_vm15 = vcmask 389376   ;;  %v1534_v63 = vld [vmem:[%s2663_s3 + $0x8] sm:$0xff] }
 0x187   : > { %1064 = vst.msk [vmem:[#allocation3] sm:$0x7f] %vm1063_vm0, %v1061_v59  ;;  %v633_v0 = vpop.permute.xlu0 %632  ;;  %v781_v1 = vpop.permute.xlu1 %780  ;;  %vm1003_vm0 = vcmask 917255   ;;  %v1549_v59 = vld [vmem:[%s2663_s3 + $0x80] sm:$0xff] }
 0x188   : > { %636 = vst.msk [vmem:[#allocation3] sm:$0x80] %vm635_vm1, %v633_v0  ;;  %vm1005_vm1 = vcmask 915200  }
 0x189   : > { %638 = vst.msk [vmem:[#allocation3 + $0x10] sm:$0x3f] %vm637_vm2, %v633_v0  ;;  %vm1071_vm2 = vcmask 1048455  }
 0x18a   : > { %710 = vst.msk [vmem:[#allocation3] sm:$0x80] %vm709_vm3, %v707_v61  ;;  %vm1073_vm3 = vcmask 1046400  }
 0x18b   : > { %712 = vst.msk [vmem:[#allocation3 + $0x10] sm:$0x3f] %vm711_vm4, %v707_v61  ;;  %v929_v2 = vpop.permute.xlu0 %928  ;;  %v855_v4 = vpop.permute.xlu1 %854  ;;  %vm794_vm4 = vcmask 523654   ;;  %v1533_v61 = vld [vmem:[%s2663_s3] sm:$0xff] }
 0x18c   : > { %784 = vst.msk [vmem:[#allocation3] sm:$0x80] %vm783_vm6, %v781_v1  ;;  %vm796_vm6 = vcmask 520576   ;;  %v2051_v0 = vpack.c.bf16 %v1534_v63, %v1533_v61  ;;  %v1561_v63 = vld [vmem:[%s2663_s3 + $0xe0] sm:$0xff] }
 0x18d   : > { %786 = vst.msk [vmem:[#allocation3 + $0x10] sm:$0x3f] %vm785_vm7, %v781_v1  ;;  %vm868_vm7 = vcmask 654854  }
 0x18e   : > { %858 = vst.msk [vmem:[#allocation3] sm:$0x80] %vm857_vm8, %v855_v4  ;;  %vm870_vm8 = vcmask 651776  }
 0x18f   : > { %860 = vst.msk [vmem:[#allocation3 + $0x10] sm:$0x3f] %vm859_vm9, %v855_v4  ;;  %v718_v5 = vpop.permute.xlu1 %717  ;;  %v644_v6 = vpop.permute.xlu0 %643  ;;  %vm942_vm9 = vcmask 786054  }
 0x190   : > { %932 = vst.msk [vmem:[#allocation3] sm:$0x80] %vm931_vm10, %v929_v2  ;;  %vm944_vm10 = vcmask 782976  }
 0x191   : > { %934 = vst.msk [vmem:[#allocation3 + $0x10] sm:$0x3f] %vm933_vm11, %v929_v2  ;;  %vm657_vm11 = vcmask 261253  }
 0x192   : > { %647 = vst.msk [vmem:[#allocation3 + $0x10] sm:$0xc0] %vm646_vm12, %v644_v6  ;;  %vm659_vm12 = vcmask 257152  }
 0x193   : > { %649 = vst.msk [vmem:[#allocation3 + $0x20] sm:$0x1f] %vm648_vm13, %v644_v6  ;;  %v1001_v7 = vpop.permute.xlu1 %1000  ;;  %v1069_v8 = vpop.permute.xlu0 %1068  ;;  %vm1013_vm13 = vcmask 917254  }
 0x194   : > { %721 = vst.msk [vmem:[#allocation3 + $0x10] sm:$0xc0] %vm720_vm14, %v718_v5  ;;  %vm1015_vm14 = vcmask 914176  }
 0x195   : > { %723 = vst.msk [vmem:[#allocation3 + $0x20] sm:$0x1f] %vm722_vm15, %v718_v5  ;;  %vm731_vm15 = vcmask 392453   ;;  %v1551_v5 = vld [vmem:[%s2663_s3 + $0x90] sm:$0xff] }
 0x196   : > { %1004 = vst.msk [vmem:[#allocation3] sm:$0x80] %vm1003_vm0, %v1001_v7  ;;  %vm733_vm0 = vcmask 388352  }
 0x197   : > { %1006 = vst.msk [vmem:[#allocation3 + $0x10] sm:$0x3f] %vm1005_vm1, %v1001_v7  ;;  %v866_v9 = vpop.permute.xlu1 %865  ;;  %v792_v10 = vpop.permute.xlu0 %791  ;;  %vm1081_vm1 = vcmask 1048454  }
 0x198   : > { %1072 = vst.msk [vmem:[#allocation3] sm:$0x80] %vm1071_vm2, %v1069_v8  ;;  %vm1083_vm2 = vcmask 1045376  }
 0x199   : > { %1074 = vst.msk [vmem:[#allocation3 + $0x10] sm:$0x3f] %vm1073_vm3, %v1069_v8  ;;  %vm805_vm3 = vcmask 523653   ;;  %v1552_v8 = vld [vmem:[%s2663_s3 + $0x98] sm:$0xff] }
 0x19a   : > { %795 = vst.msk [vmem:[#allocation3 + $0x10] sm:$0xc0] %vm794_vm4, %v792_v10  ;;  %vm807_vm4 = vcmask 519552  }
 0x19b   : > { %797 = vst.msk [vmem:[#allocation3 + $0x20] sm:$0x1f] %vm796_vm6, %v792_v10  ;;  %v940_v11 = vpop.permute.xlu1 %939  ;;  %v655_v12 = vpop.permute.xlu0 %654  ;;  %vm668_vm6 = vcmask 261252  }
 0x19c   : > { %869 = vst.msk [vmem:[#allocation3 + $0x10] sm:$0xc0] %vm868_vm7, %v866_v9  ;;  %vm670_vm7 = vcmask 256128  }
 0x19d   : > { %871 = vst.msk [vmem:[#allocation3 + $0x20] sm:$0x1f] %vm870_vm8, %v866_v9  ;;  %vm879_vm8 = vcmask 654853   ;;  %v1535_v9 = vld [vmem:[%s2663_s3 + $0x10] sm:$0xff] }
 0x19e   : > { %943 = vst.msk [vmem:[#allocation3 + $0x10] sm:$0xc0] %vm942_vm9, %v940_v11  ;;  %vm881_vm9 = vcmask 650752  }
 0x19f   : > { %945 = vst.msk [vmem:[#allocation3 + $0x20] sm:$0x1f] %vm944_vm10, %v940_v11  ;;  %v1165_v13 = vld [vmem:[#allocation3] sm:$0xff]  ;;  %v1011_v15 = vpop.permute.xlu1 %1010  ;;  %v729_v16 = vpop.permute.xlu0 %728  ;;  %vm742_vm10 = vcmask 392452  }
 0x1a0   : > { %658 = vst.msk [vmem:[#allocation3 + $0x20] sm:$0xe0] %vm657_vm11, %v655_v12  ;;  %1283 = vmatmul.mubr.f32.vlgmr.msra.gmra.mrb[18].mxu1 %v1165_v13  ;;  %vm744_vm11 = vcmask 387328   ;;  %v2053_v13 = vpack.c.bf16 %v1552_v8, %v1551_v5  ;;  %v1545_v5 = vld [vmem:[%s2663_s3 + $0x60] sm:$0xff] }
 0x1a1   : > { %660 = vst.msk [vmem:[#allocation3 + $0x30] sm:$0xf] %vm659_vm12, %v655_v12  ;;  %1821 = vmatprep.mubr.msk.f32.mxu1 %vm533_vm5, %v1168_v14  ;;  %vm953_vm12 = vcmask 786053   ;;  %v1536_v14 = vld [vmem:[%s2663_s3 + $0x18] sm:$0xff] }
 0x1a2   : > { %1014 = vst.msk [vmem:[#allocation3 + $0x10] sm:$0xc0] %vm1013_vm13, %v1011_v15  ;;  %vm955_vm13 = vcmask 781952  }
 0x1a3   : > { %1016 = vst.msk [vmem:[#allocation3 + $0x20] sm:$0x1f] %vm1015_vm14, %v1011_v15  ;;  %v1079_v17 = vpop.permute.xlu1 %1078  ;;  %v803_v18 = vpop.permute.xlu0 %802  ;;  %vm816_vm14 = vcmask 523652   ;;  %v2055_v15 = vpack.c.bf16 %v1536_v14, %v1535_v9  ;;  %v1546_v9 = vld [vmem:[%s2663_s3 + $0x68] sm:$0xff] }
 0x1a4   : > { %732 = vst.msk [vmem:[#allocation3 + $0x20] sm:$0xe0] %vm731_vm15, %v729_v16  ;;  %vm818_vm15 = vcmask 518528   ;;  %v2075_v14 = vpack.c.bf16 %v1546_v9, %v1545_v5 }
 0x1a5   : > { %734 = vst.msk [vmem:[#allocation3 + $0x30] sm:$0xf] %vm733_vm0, %v729_v16  ;;  %vm1023_vm0 = vcmask 917253   ;;  %v1553_v16 = vld [vmem:[%s2663_s3 + $0xa0] sm:$0xff] }
 0x1a6   : > { %1082 = vst.msk [vmem:[#allocation3 + $0x10] sm:$0xc0] %vm1081_vm1, %v1079_v17  ;;  %vm1025_vm1 = vcmask 913152  }
 0x1a7   : > { %1084 = vst.msk [vmem:[#allocation3 + $0x20] sm:$0x1f] %vm1083_vm2, %v1079_v17  ;;  %v666_v19 = vpop.permute.xlu1 %665  ;;  %v877_v20 = vpop.permute.xlu0 %876  ;;  %vm890_vm2 = vcmask 654852   ;;  %v1554_v17 = vld [vmem:[%s2663_s3 + $0xa8] sm:$0xff] }
 0x1a8   : > { %806 = vst.msk [vmem:[#allocation3 + $0x20] sm:$0xe0] %vm805_vm3, %v803_v18  ;;  %vm892_vm3 = vcmask 649728  }
 0x1a9   : > { %808 = vst.msk [vmem:[#allocation3 + $0x30] sm:$0xf] %vm807_vm4, %v803_v18  ;;  %vm1091_vm4 = vcmask 1048453   ;;  %v1537_v18 = vld [vmem:[%s2663_s3 + $0x20] sm:$0xff] }
 0x1aa   : > { %669 = vst.msk [vmem:[#allocation3 + $0x30] sm:$0xf0] %vm668_vm6, %v666_v19  ;;  %vm1093_vm6 = vcmask 1044352  }
 0x1ab   : > { %671 = vst.msk [vmem:[#allocation3 + $0x40] sm:$0x7] %vm670_vm7, %v666_v19  ;;  %v740_v21 = vpop.permute.xlu1 %739  ;;  %v951_v23 = vpop.permute.xlu0 %950  ;;  %vm964_vm7 = vcmask 786052   ;;  %v2057_v19 = vpack.c.bf16 %v1554_v17, %v1553_v16 }
 0x1ac   : > { %880 = vst.msk [vmem:[#allocation3 + $0x20] sm:$0xe0] %vm879_vm8, %v877_v20  ;;  %vm966_vm8 = vcmask 780928  }
 0x1ad   : > { %882 = vst.msk [vmem:[#allocation3 + $0x30] sm:$0xf] %vm881_vm9, %v877_v20  ;;  %v1167_v22 = vld [vmem:[#allocation3 + $0x10] sm:$0xff]  ;;  %vm679_vm9 = vcmask 261251   ;;  %v1538_v20 = vld [vmem:[%s2663_s3 + $0x28] sm:$0xff] }
 0x1ae   : > { %743 = vst.msk [vmem:[#allocation3 + $0x30] sm:$0xf0] %vm742_vm10, %v740_v21  ;;  %1288 = vmatmul.mubr.f32.gmra.mrb[20].mxu1 %v1167_v22  ;;  %vm681_vm10 = vcmask 255104  }
 0x1af   : > { %745 = vst.msk [vmem:[#allocation3 + $0x40] sm:$0x7] %vm744_vm11, %v740_v21  ;;  %1822 = vmatprep.mubr.msk.f32.mxu1 %vm533_vm5, %v1170_v24  ;;  %v814_v25 = vpop.permute.xlu1 %813  ;;  %v1021_v26 = vpop.permute.xlu0 %1020  ;;  %vm1033_vm11 = vcmask 917252  }
 0x1b0   : > { %954 = vst.msk [vmem:[#allocation3 + $0x20] sm:$0xe0] %vm953_vm12, %v951_v23  ;;  %vm1035_vm12 = vcmask 912128  }
 0x1b1   : > { %956 = vst.msk [vmem:[#allocation3 + $0x30] sm:$0xf] %vm955_vm13, %v951_v23  ;;  %vm753_vm13 = vcmask 392451   ;;  %v2059_v23 = vpack.c.bf16 %v1538_v20, %v1537_v18  ;;  %v1547_v18 = vld [vmem:[%s2663_s3 + $0x70] sm:$0xff]  ;;  %v1565_v20 = vld [vmem:[%s2663_s3 + $0x100] sm:$0xff] }
 0x1b2   : > { %817 = vst.msk [vmem:[#allocation3 + $0x30] sm:$0xf0] %vm816_vm14, %v814_v25  ;;  %vm755_vm14 = vcmask 386304  }
 0x1b3   : > { %819 = vst.msk [vmem:[#allocation3 + $0x40] sm:$0x7] %vm818_vm15, %v814_v25  ;;  %v888_v27 = vpop.permute.xlu1 %887  ;;  %v1089_v28 = vpop.permute.xlu0 %1088  ;;  %vm827_vm15 = vcmask 523651  }
 0x1b4   : > { %1024 = vst.msk [vmem:[#allocation3 + $0x20] sm:$0xe0] %vm1023_vm0, %v1021_v26  ;;  %vm829_vm0 = vcmask 517504  }
 0x1b5   : > { %1026 = vst.msk [vmem:[#allocation3 + $0x30] sm:$0xf] %vm1025_vm1, %v1021_v26  ;;  %vm901_vm1 = vcmask 654851   ;;  %v1555_v26 = vld [vmem:[%s2663_s3 + $0xb0] sm:$0xff] }
 0x1b6   : > { %891 = vst.msk [vmem:[#allocation3 + $0x30] sm:$0xf0] %vm890_vm2, %v888_v27  ;;  %vm903_vm2 = vcmask 648704  }
 0x1b7   : > { %893 = vst.msk [vmem:[#allocation3 + $0x40] sm:$0x7] %vm892_vm3, %v888_v27  ;;  %v962_v29 = vpop.permute.xlu1 %961  ;;  %v677_v30 = vpop.permute.xlu0 %676  ;;  %vm1101_vm3 = vcmask 1048452   ;;  %v1556_v27 = vld [vmem:[%s2663_s3 + $0xb8] sm:$0xff] }
 0x1b8   : > { %1092 = vst.msk [vmem:[#allocation3 + $0x20] sm:$0xe0] %vm1091_vm4, %v1089_v28  ;;  %vm1103_vm4 = vcmask 1043328  }
 0x1b9   : > { %1094 = vst.msk [vmem:[#allocation3 + $0x30] sm:$0xf] %vm1093_vm6, %v1089_v28  ;;  %vm975_vm6 = vcmask 786051   ;;  %v2061_v28 = vpack.c.bf16 %v1556_v27, %v1555_v26 }
 0x1ba   : > { %965 = vst.msk [vmem:[#allocation3 + $0x30] sm:$0xf0] %vm964_vm7, %v962_v29  ;;  %vm977_vm7 = vcmask 779904  }
 0x1bb   : > { %967 = vst.msk [vmem:[#allocation3 + $0x40] sm:$0x7] %vm966_vm8, %v962_v29  ;;  %v1031_v31 = vpop.permute.xlu1 %1030  ;;  %v751_v32 = vpop.permute.xlu0 %750  ;;  %vm1043_vm8 = vcmask 917251   ;;  %v1539_v29 = vld [vmem:[%s2663_s3 + $0x30] sm:$0xff] }
 0x1bc   : > { %680 = vst.msk [vmem:[#allocation3 + $0x40] sm:$0xf8] %vm679_vm9, %v677_v30  ;;  %vm1045_vm9 = vcmask 911104  }
 0x1bd   : > { %682 = vst.msk [vmem:[#allocation3 + $0x50] sm:$0x3] %vm681_vm10, %v677_v30  ;;  %vm1111_vm10 = vcmask 1048451   ;;  %v1540_v30 = vld [vmem:[%s2663_s3 + $0x38] sm:$0xff] }
 0x1be   : > { %1034 = vst.msk [vmem:[#allocation3 + $0x30] sm:$0xf0] %vm1033_vm11, %v1031_v31  ;;  %vm1113_vm11 = vcmask 1042304  }
 0x1bf   : > { %1036 = vst.msk [vmem:[#allocation3 + $0x40] sm:$0x7] %vm1035_vm12, %v1031_v31  ;;  %v1169_v33 = vld [vmem:[#allocation3 + $0x20] sm:$0xff]  ;;  %v1099_v35 = vpop.permute.xlu1 %1098  ;;  %v1109_v36 = vpop.permute.xlu0 %1108  ;;  %vm912_vm12 = vcmask 654850  }
 0x1c0   : > { %754 = vst.msk [vmem:[#allocation3 + $0x40] sm:$0xf8] %vm753_vm13, %v751_v32  ;;  %1293 = vmatmul.mubr.f32.gmra.mrb[22].mxu1 %v1169_v33  ;;  %vm914_vm13 = vcmask 647680   ;;  %v2063_v33 = vpack.c.bf16 %v1540_v30, %v1539_v29 }
 0x1c1   : > { %756 = vst.msk [vmem:[#allocation3 + $0x50] sm:$0x3] %vm755_vm14, %v751_v32  ;;  %1823 = vmatprep.mubr.msk.f32.mxu1 %vm533_vm5, %v1172_v34  ;;  %vm986_vm14 = vcmask 786050  }
 0x1c2   : > { %828 = vst.msk [vmem:[#allocation3 + $0x40] sm:$0xf8] %vm827_vm15, %v2474_v51  ;;  %vm988_vm15 = vcmask 778880  }
 0x1c3   : > { %830 = vst.msk [vmem:[#allocation3 + $0x50] sm:$0x3] %vm829_vm0, %v2474_v51  ;;  %v910_v37 = vpop.permute.xlu1 %909  ;;  %v984_v38 = vpop.permute.xlu0 %983  ;;  %vm1054_vm0 = vcmask 917250  }
 0x1c4   : > { %902 = vst.msk [vmem:[#allocation3 + $0x40] sm:$0xf8] %vm901_vm1, %v2476_v53  ;;  %vm1056_vm1 = vcmask 910080  }
 0x1c5   : > { %904 = vst.msk [vmem:[#allocation3 + $0x50] sm:$0x3] %vm903_vm2, %v2476_v53  ;;  %vm1122_vm2 = vcmask 1048450  }
 0x1c6   : > { %1102 = vst.msk [vmem:[#allocation3 + $0x30] sm:$0xf0] %vm1101_vm3, %v1099_v35  ;;  %vm1124_vm3 = vcmask 1041280  }
 0x1c7   : > { %1104 = vst.msk [vmem:[#allocation3 + $0x40] sm:$0x7] %vm1103_vm4, %v1099_v35  ;;  %v1052_v39 = vpop.permute.xlu1 %1051  ;;  %v1120_v41 = vpop.permute.xlu0 %1119  ;;  %vm1318_vm4 = vcmask 261120  }
 0x1c8   : > { %976 = vst.msk [vmem:[#allocation3 + $0x40] sm:$0xf8] %vm975_vm6, %v2478_v54  ;;  %vm1328_vm6 = vcmask 256000  }
 0x1c9   : > { %978 = vst.msk [vmem:[#allocation3 + $0x50] sm:$0x3] %vm977_vm7, %v2478_v54  ;;  %vm1325_vm7 = vcmask 253952  }
 0x1ca   : > { %1044 = vst.msk [vmem:[#allocation3 + $0x40] sm:$0xf8] %vm1043_vm8, %v2480_v60  ;;  %vm1342_vm8 = vcmask 261126  }
 0x1cb   : > { %1046 = vst.msk [vmem:[#allocation3 + $0x50] sm:$0x3] %vm1045_vm9, %v2480_v60  ;;  %v1550_v60 = vld [vmem:[%s2663_s3 + $0x88] sm:$0xff]  ;;  %vm1351_vm9 = vcmask 518400  }
 0x1cc   : > { %1112 = vst.msk [vmem:[#allocation3 + $0x40] sm:$0xf8] %vm1111_vm10, %v1109_v36  ;;  %v2049_v62 = vpack.c.bf16 %v1550_v60, %v1549_v59  ;;  %vm1379_vm10 = vcmask 780800  }
 0x1cd   : > { %1114 = vst.msk [vmem:[#allocation3 + $0x50] sm:$0x3] %vm1113_vm11, %v1109_v36  ;;  %v1171_v40 = vld [vmem:[#allocation3 + $0x30] sm:$0xff]  ;;  %vm1407_vm11 = vcmask 1043200  }
 0x1ce   : > { %913 = vst.msk [vmem:[#allocation3 + $0x50] sm:$0xfc] %vm912_vm12, %v910_v37  ;;  %1298 = vmatmul.mubr.f32.gmra.mrb[24].mxu1 %v1171_v40  ;;  %2050 = vmatprep.subr.bf16.mxu1 %v2049_v62  ;;  %v1558_v40 = vld [vmem:[%s2663_s3 + $0xc8] sm:$0xff]  ;;  %v1544_v62 = vld [vmem:[%s2663_s3 + $0x58] sm:$0xff]  ;;  %vm1360_vm12 = vcmask 521475  }
 0x1cf   : > { %915 = vst.msk [vmem:[#allocation3 + $0x60] sm:$0x1] %vm914_vm13, %v910_v37  ;;  %1824 = vmatprep.mubr.msk.f32.mxu1 %vm533_vm5, %v1174_v42  ;;  %2052 = vmatpush3.bf16.msra.mxu1 %v2051_v0  ;;  %v1541_v42 = vld [vmem:[%s2663_s3 + $0x40] sm:$0xff]  ;;  %vm1388_vm13 = vcmask 783875  }
 0x1d0   : > { %987 = vst.msk [vmem:[#allocation3 + $0x50] sm:$0xfc] %vm986_vm14, %v984_v38  ;;  %2054 = vmatprep.subr.bf16.mxu1 %v2053_v13  ;;  %vm1369_vm14 = vcmask 523526  }
 0x1d1   : > { %989 = vst.msk [vmem:[#allocation3 + $0x60] sm:$0x1] %vm988_vm15, %v984_v38  ;;  %vm1371_vm15 = vcmask 516352  }
 0x1d2   : > { %1055 = vst.msk [vmem:[#allocation3 + $0x50] sm:$0xfc] %vm1054_vm0, %v1052_v39  ;;  %vm1397_vm0 = vcmask 785926  }
 0x1d3   : > { %1057 = vst.msk [vmem:[#allocation3 + $0x60] sm:$0x1] %vm1056_vm1, %v1052_v39  ;;  %v1173_v3 = vld [vmem:[#allocation3 + $0x40] sm:$0xff]  ;;  %2056 = vmatpush3.bf16.msra.mxu1 %v2055_v15  ;;  %v1557_v39 = vld [vmem:[%s2663_s3 + $0xc0] sm:$0xff]  ;;  %v1564_v15 = vld [vmem:[%s2663_s3 + $0xf8] sm:$0xff]  ;;  %vm1399_vm1 = vcmask 778752  }
 0x1d4   : > { %1123 = vst.msk [vmem:[#allocation3 + $0x50] sm:$0xfc] %vm1122_vm2, %v1120_v41  ;;  %1303 = vmatmul.mubr.f32.gmra.mrb[26].mxu1 %v1173_v3  ;;  %2058 = vmatprep.subr.bf16.mxu1 %v2057_v19  ;;  %v1542_v3 = vld [vmem:[%s2663_s3 + $0x48] sm:$0xff]  ;;  %v1548_v19 = vld [vmem:[%s2663_s3 + $0x78] sm:$0xff]  ;;  %vm1416_vm2 = vcmask 1046275  }
 0x1d5   : > { %1125 = vst.msk [vmem:[#allocation3 + $0x60] sm:$0x1] %vm1124_vm3, %v1120_v41  ;;  %1825 = vmatprep.mubr.msk.f32.mxu1 %vm533_vm5, %v1176_v43  ;;  %v2065_v41 = vpack.c.bf16 %v1558_v40, %v1557_v39  ;;  %vm1425_vm3 = vcmask 1048326  }
 0x1d7   : > { %2060 = vmatpush3.bf16.msra.mxu1 %v2059_v23 }
 0x1d8   : > { %2062 = vmatprep.subr.bf16.mxu1 %v2061_v28 }
 0x1db   : > { %v1175_v44 = vld [vmem:[#allocation3 + $0x50] sm:$0xff]  ;;  %2064 = vmatpush3.bf16.msra.mxu1 %v2063_v33 }
 0x1dc   : > { %1308 = vmatmul.mubr.f32.gmra.mrb[28].mxu1 %v1175_v44  ;;  %v1177_v46 = vld [vmem:[#allocation3 + $0x60] sm:$0x1]  ;;  %v2067_v44 = vpack.c.bf16 %v1542_v3, %v1541_v42  ;;  %2066 = vmatprep.subr.bf16.mxu1 %v2065_v41 }
 0x1dd   : > { %1826 = vmatprep.mubr.msk.f32.mxu1 %vm533_vm5, %v1178_v45  ;;  %vm1335_vm5 = vcmask 259075  }
 0x1df   : > { %2068 = vmatpush3.bf16.msra.mxu1 %v2067_v44 }
 0x1e0   : > { %1313 = vmatmul.mubr.f32.gmra.mrb[30].mxu1 %v1177_v46 }
 0x273   : > { %v1284_v47 = vpop.f32.mrb[18].mxu1 }
 0x274   : > { %1319 = vst.msk [vmem:[#allocation4] sm:$0xff] %vm1318_vm4, %v1284_v47  ;;  %v1286_v48 = vpop.f32.mrb[19].mxu1 }
 0x27b   : > { %v1346_v49 = vld [vmem:[#allocation4 + $0x1] ss:$2 sm:$0x7]  ;;  %v1327_v50 = vld [vmem:[#allocation4] ss:$2 sm:$0x7] }
 0x27c   : > { %1348 = vrot.lane.b32.xlu0 %v1346_v49, %s2125_s29  ;;  %1329 = vst.msk [vmem:[#allocation5] sm:$0x7] %vm1328_vm6, %v1327_v50  ;;  %v1374_v51 = vld [vmem:[#allocation4 + $0x2] ss:$2 sm:$0x7]  ;;  %v1559_v49 = vld [vmem:[%s2663_s3 + $0xd0] sm:$0xff] }
 0x27d   : > { %v1560_v50 = vld [vmem:[%s2663_s3 + $0xd8] sm:$0xff] }
 0x280   : > { %1376 = vrot.lane.b32.xlu0 %v1374_v51, %s2129_s17 }
 0x281   : > { %v1289_v52 = vpop.f32.mrb[20].mxu1 }
 0x282   : > { %1320 = vst.msk [vmem:[#allocation4 + $0x8] sm:$0xff] %vm1318_vm4, %v1289_v52  ;;  %v1291_v53 = vpop.f32.mrb[21].mxu1 }
 0x283   : > { %v2069_v53 = vpack.c.bf16 %v1560_v50, %v1559_v49  ;;  %v1568_v49 = vld [vmem:[%s2663_s3 + $0x118] sm:$0xff] }
 0x285   : > { %2070 = vmatprep.subr.bf16.mxu1 %v2069_v53 }
 0x289   : > { %v1446_v54 = vld [vmem:[#allocation4 + $0x9] ss:$2 sm:$0x7]  ;;  %v1430_v56 = vld [vmem:[#allocation4 + $0x8] ss:$2 sm:$0x7] }
 0x28a   : > { %v1402_v55 = vld [vmem:[#allocation4 + $0x7] ss:$2 sm:$0x7]  ;;  %1448 = vrot.lane.b32.xlu1 %v1446_v54, %s2125_s29  ;;  %1431 = vst.msk [vmem:[#allocation5 + $0x8] sm:$0x7] %vm1328_vm6, %v1430_v56  ;;  %v1543_v56 = vld [vmem:[%s2663_s3 + $0x50] sm:$0xff] }
 0x28b   : > { %1404 = vrot.lane.b32.xlu0 %v1402_v55, %s2131_s5 }
 0x293   : > { %v1294_v57 = vpop.f32.mrb[22].mxu1 }
 0x294   : > { %1321 = vst.msk [vmem:[#allocation4 + $0x10] sm:$0xff] %vm1318_vm4, %v1294_v57  ;;  %v1296_v58 = vpop.f32.mrb[23].mxu1 }
 0x29b   : > { %v1469_v1 = vld [vmem:[#allocation4 + $0xe] ss:$2 sm:$0x7]  ;;  %v1491_v2 = vld [vmem:[#allocation4 + $0xf] ss:$2 sm:$0x7] }
 0x29c   : > { %1471 = vrot.lane.b32.xlu1 %v1469_v1, %s2129_s17  ;;  %v1513_v4 = vld [vmem:[#allocation4 + $0x10] ss:$2 sm:$0x7]  ;;  %v1354_v11 = vld [vmem:[#allocation4 + $0xf] ss:$2 sm:$0x7] }
 0x29d   : > { %1514 = vst.msk [vmem:[#allocation5 + $0x10] sm:$0x7] %vm1328_vm6, %v1513_v4  ;;  %v1331_v7 = vld [vmem:[#allocation4 + $0xe] ss:$2 sm:$0x7]  ;;  %v1356_v22 = vrot.slane %v1354_v11, 5 }
 0x29e   : > { %v1333_v12 = vrot.slane %v1331_v7, 5  ;;  %v1382_v25 = vld [vmem:[#allocation4 + $0x10] ss:$2 sm:$0x7]  ;;  %vm1427_vm6 = vcmask 1041152  }
 0x29f   : > { %v1384_v31 = vrot.slane %v1382_v25, 5  ;;  %v1562_v4 = vld [vmem:[%s2663_s3 + $0xe8] sm:$0xff]  ;;  %v2079_v25 = vpack.c.bf16 %v1548_v19, %v1547_v18 }
 0x2a0   : > { %1493 = vrot.lane.b32.xlu1 %v1491_v2, %s2131_s5  ;;  %1336 = vst.msk [vmem:[#allocation5] sm:$0x38] %vm1335_vm5, %v1333_v12  ;;  %v2071_v2 = vpack.c.bf16 %v1544_v62, %v1543_v56  ;;  %v2073_v8 = vpack.c.bf16 %v1562_v4, %v1561_v63 }
 0x2a1   : > { %v1299_v6 = vpop.f32.mrb[24].mxu1 }
 0x2a2   : > { %1322 = vst.msk [vmem:[#allocation4 + $0x18] sm:$0xff] %vm1318_vm4, %v1299_v6  ;;  %v1301_v10 = vpop.f32.mrb[25].mxu1  ;;  %2072 = vmatpush3.bf16.msra.mxu1 %v2071_v2 }
 0x2a3   : > { %v1563_v10 = vld [vmem:[%s2663_s3 + $0xf0] sm:$0xff]  ;;  %2074 = vmatprep.subr.bf16.mxu1 %v2073_v8 }
 0x2a4   : > { %1357 = vrot.lane.b32.xlu1 %v1356_v22, %s2125_s29  ;;  %v2077_v17 = vpack.c.bf16 %v1564_v15, %v1563_v10 }
 0x2a6   : > { %2076 = vmatpush3.bf16.msra.mxu1 %v2075_v14 }
 0x2a7   : > { %v1304_v21 = vpop.f32.mrb[26].mxu1  ;;  %2078 = vmatprep.subr.bf16.mxu1 %v2077_v17 }
 0x2a8   : > { %1323 = vst.msk [vmem:[#allocation4 + $0x20] sm:$0xff] %vm1318_vm4, %v1304_v21  ;;  %v1306_v24 = vpop.f32.mrb[27].mxu1  ;;  %1385 = vrot.lane.b32.xlu1 %v1384_v31, %s2129_s17  ;;  %v1566_v21 = vld [vmem:[%s2663_s3 + $0x108] sm:$0xff] }
 0x2a9   : > { %v1453_v32 = vld [vmem:[#allocation4 + $0x17] ss:$2 sm:$0x7]  ;;  %v1433_v36 = vld [vmem:[#allocation4 + $0x16] ss:$2 sm:$0x7]  ;;  %v2636_v27 = vpack.c.bf16 %v1566_v21, %v1565_v20 }
 0x2aa   : > { %v1455_v35 = vrot.slane %v1453_v32, 5  ;;  %v1435_v38 = vrot.slane %v1433_v36, 5  ;;  %v1410_v26 = vld [vmem:[#allocation4 + $0x15] ss:$2 sm:$0x7]  ;;  %2080 = vmatpush3.bf16.msra.mxu1 %v2079_v25 }
 0x2ab   : > { %v1412_v29 = vrot.slane %v1410_v26, 5  ;;  %2082 = vmatprep.subr.bf16.mxu1 %v2636_v27 }
 0x2ac   : > { %1456 = vrot.lane.b32.xlu0 %v1455_v35, %s2125_s29  ;;  %1437 = vst.msk [vmem:[#allocation5 + $0x8] sm:$0x38] %vm1335_vm5, %v1435_v38 }
 0x2af   : > { %v1309_v34 = vpop.f32.mrb[28].mxu1  ;;  %v1363_v43 = vld [vmem:[#allocation4 + $0x1d] ss:$2 sm:$0x7] }
 0x2b0   : > { %1324 = vst.msk [vmem:[#allocation4 + $0x28] sm:$0xff] %vm1318_vm4, %v1309_v34  ;;  %v1311_v37 = vpop.f32.mrb[29].mxu1  ;;  %v1365_v46 = vrot.slane %v1363_v43, 2  ;;  %v1475_v48 = vld [vmem:[#allocation4 + $0x1c] ss:$2 sm:$0x7] }
 0x2b1   : > { %v1391_v51 = vld [vmem:[#allocation4 + $0x1e] ss:$2 sm:$0x7]  ;;  %v1477_v54 = vrot.slane %v1475_v48, 5 }
 0x2b2   : > { %1366 = vrot.lane.b32.xlu0 %v1365_v46, %s2125_s29  ;;  %v1515_v52 = vld [vmem:[#allocation4 + $0x1e] ss:$2 sm:$0x7]  ;;  %v1393_v60 = vrot.slane %v1391_v51, 2 }
 0x2b3   : > { %v1314_v45 = vpop.f32.mrb[30].mxu1  ;;  %v1517_v59 = vrot.slane %v1515_v52, 5  ;;  %v1338_v61 = vld [vmem:[#allocation4 + $0x1c] ss:$2 sm:$0x7] }
 0x2b4   : > { %1326 = vst.msk [vmem:[#allocation4 + $0x30] sm:$0x1] %vm1325_vm7, %v1314_v45  ;;  %v1316_v47 = vpop.f32.mrb[31].mxu1  ;;  %v1340_v0 = vrot.slane %v1338_v61, 2  ;;  %v1567_v48 = vld [vmem:[%s2663_s3 + $0x110] sm:$0xff] }
 0x2b5   : > { %1519 = vst.msk [vmem:[#allocation5 + $0x10] sm:$0x38] %vm1335_vm5, %v1517_v59  ;;  %v1497_v12 = vld [vmem:[#allocation4 + $0x1d] ss:$2 sm:$0x7]  ;;  %v2085_v50 = vpack.c.bf16 %v1568_v49, %v1567_v48 }
 0x2b6   : > { %1478 = vrot.lane.b32.xlu0 %v1477_v54, %s2129_s17  ;;  %1343 = vst.msk [vmem:[#allocation5] sm:$0xc0] %vm1342_vm8, %v1340_v0  ;;  %v1499_v22 = vrot.slane %v1497_v12, 5  ;;  %v1419_v24 = vld [vmem:[#allocation4 + $0x23] ss:$2 sm:$0x7] }
 0x2b7   : > { %v1461_v55 = vld [vmem:[#allocation4 + $0x25] ss:$2 sm:$0x7]  ;;  %v1483_v58 = vld [vmem:[#allocation4 + $0x2a] ss:$2 sm:$0x7] }
 0x2b8   : > { %v1463_v57 = vrot.slane %v1461_v55, 2  ;;  %v1439_v1 = vld [vmem:[#allocation4 + $0x24] ss:$2 sm:$0x7]  ;;  %v1485_v11 = vrot.slane %v1483_v58, 2  ;;  %v1421_v28 = vrot.slane %v1419_v24, 2 }
 0x2b9   : > { %v1441_v7 = vrot.slane %v1439_v1, 2  ;;  %1344 = vst.msk [vmem:[#allocation5 + $0x18] sm:$0x1] %vm1325_vm7, %v1340_v0  ;;  %v1505_v16 = vld [vmem:[#allocation4 + $0x2b] ss:$2 sm:$0x7] }
 0x2ba   : > { %1464 = vrot.lane.b32.xlu1 %v1463_v57, %s2125_s29  ;;  %1394 = vrot.lane.b32.xlu0 %v1393_v60, %s2129_s17  ;;  %v1507_v23 = vrot.slane %v1505_v16, 2 }
 0x2bb   : > { %v1521_v6 = vld [vmem:[#allocation4 + $0x2c] ss:$2 sm:$0x7]  ;;  %1443 = vst.msk [vmem:[#allocation5 + $0x8] sm:$0xc0] %vm1342_vm8, %v1441_v7 }
 0x2bc   : > { %v1523_v13 = vrot.slane %v1521_v6, 2  ;;  %1444 = vst.msk [vmem:[#allocation5 + $0x20] sm:$0x1] %vm1325_vm7, %v1441_v7 }
 0x2be   : > { %1486 = vrot.lane.b32.xlu1 %v1485_v11, %s2129_s17  ;;  %1525 = vst.msk [vmem:[#allocation5 + $0x10] sm:$0xc0] %vm1342_vm8, %v1523_v13  ;;  %1500 = vrot.lane.b32.xlu0 %v1499_v22, %s2131_s5 }
 0x2bf   : > { %1526 = vst.msk [vmem:[#allocation5 + $0x28] sm:$0x1] %vm1325_vm7, %v1523_v13 }
 0x2c2   : > { %1508 = vrot.lane.b32.xlu1 %v1507_v23, %s2131_s5  ;;  %1422 = vrot.lane.b32.xlu0 %v1421_v28, %s2131_s5 }
 0x2c5   : > { %v1529_v54 = vld [vmem:[#allocation5 + $0x10] sm:$0xff] }
 0x2c6   : > { %1413 = vrot.lane.b32.xlu1 %v1412_v29, %s2131_s5  ;;  %v1532_v55 = vld [vmem:[#allocation5 + $0x28] sm:$0x1] }
 0x2ee   : > { %v1349_v30 = vpop.permute.xlu0 %1348 }
 0x2ef   : > { %1352 = vst.msk [vmem:[#allocation5] sm:$0x7] %vm1351_vm9, %v1349_v30 }
 0x2f2   : > { %v1377_v31 = vpop.permute.xlu0 %1376 }
 0x2f3   : > { %1380 = vst.msk [vmem:[#allocation5] sm:$0x7] %vm1379_vm10, %v1377_v31 }
 0x2fc   : > { %v1449_v32 = vpop.permute.xlu1 %1448 }
 0x2fd   : > { %v1405_v33 = vpop.permute.xlu0 %1404  ;;  %1451 = vst.msk [vmem:[#allocation5 + $0x8] sm:$0x7] %vm1351_vm9, %v1449_v32 }
 0x2fe   : > { %1408 = vst.msk [vmem:[#allocation5] sm:$0x7] %vm1407_vm11, %v1405_v33 }
 0x30e   : > { %v1472_v34 = vpop.permute.xlu1 %1471 }
 0x30f   : > { %1474 = vst.msk [vmem:[#allocation5 + $0x8] sm:$0x7] %vm1379_vm10, %v1472_v34 }
 0x312   : > { %v1494_v35 = vpop.permute.xlu1 %1493 }
 0x313   : > { %1496 = vst.msk [vmem:[#allocation5 + $0x8] sm:$0x7] %vm1407_vm11, %v1494_v35 }
 0x316   : > { %v1358_v36 = vpop.permute.xlu1 %1357 }
 0x317   : > { %1361 = vst.msk [vmem:[#allocation5] sm:$0x38] %vm1360_vm12, %v1358_v36 }
 0x31a   : > { %v1386_v37 = vpop.permute.xlu1 %1385 }
 0x31b   : > { %1389 = vst.msk [vmem:[#allocation5] sm:$0x38] %vm1388_vm13, %v1386_v37 }
 0x31e   : > { %v1457_v38 = vpop.permute.xlu0 %1456 }
 0x31f   : > { %1459 = vst.msk [vmem:[#allocation5 + $0x8] sm:$0x38] %vm1360_vm12, %v1457_v38 }
 0x324   : > { %v1367_v39 = vpop.permute.xlu0 %1366 }
 0x325   : > { %1370 = vst.msk [vmem:[#allocation5] sm:$0xc0] %vm1369_vm14, %v1367_v39 }
 0x326   : > { %1372 = vst.msk [vmem:[#allocation5 + $0x18] sm:$0x1] %vm1371_vm15, %v1367_v39 }
 0x328   : > { %v1479_v40 = vpop.permute.xlu0 %1478 }
 0x329   : > { %1481 = vst.msk [vmem:[#allocation5 + $0x8] sm:$0x38] %vm1388_vm13, %v1479_v40 }
 0x32c   : > { %v1465_v41 = vpop.permute.xlu1 %1464  ;;  %v1395_v42 = vpop.permute.xlu0 %1394 }
 0x32d   : > { %1467 = vst.msk [vmem:[#allocation5 + $0x8] sm:$0xc0] %vm1369_vm14, %v1465_v41 }
 0x32e   : > { %1468 = vst.msk [vmem:[#allocation5 + $0x20] sm:$0x1] %vm1371_vm15, %v1465_v41 }
 0x32f   : > { %1398 = vst.msk [vmem:[#allocation5] sm:$0xc0] %vm1397_vm0, %v1395_v42 }
 0x330   : > { %1400 = vst.msk [vmem:[#allocation5 + $0x18] sm:$0x1] %vm1399_vm1, %v1395_v42  ;;  %v1487_v3 = vpop.permute.xlu1 %1486  ;;  %v1501_v43 = vpop.permute.xlu0 %1500 }
 0x331   : > { %1489 = vst.msk [vmem:[#allocation5 + $0x8] sm:$0xc0] %vm1397_vm0, %v1487_v3 }
 0x332   : > { %1490 = vst.msk [vmem:[#allocation5 + $0x20] sm:$0x1] %vm1399_vm1, %v1487_v3 }
 0x333   : > { %1503 = vst.msk [vmem:[#allocation5 + $0x8] sm:$0x38] %vm1416_vm2, %v1501_v43 }
 0x334   : > { %v1509_v44 = vpop.permute.xlu1 %1508  ;;  %v1423_v45 = vpop.permute.xlu0 %1422 }
 0x335   : > { %1511 = vst.msk [vmem:[#allocation5 + $0x8] sm:$0xc0] %vm1425_vm3, %v1509_v44  ;;  %1426 = vst.msk [vmem:[#allocation5] sm:$0xc0] %vm1425_vm3, %v1423_v45 }
 0x336   : > { %1512 = vst.msk [vmem:[#allocation5 + $0x20] sm:$0x1] %vm1427_vm6, %v1509_v44  ;;  %1428 = vst.msk [vmem:[#allocation5 + $0x18] sm:$0x1] %vm1427_vm6, %v1423_v45 }
 0x338   : > { %v1414_v46 = vpop.permute.xlu1 %1413 }
 0x339   : > { %1417 = vst.msk [vmem:[#allocation5] sm:$0x38] %vm1416_vm2, %v1414_v46 }
 0x33c   : > { %v1528_v47 = vld [vmem:[#allocation5 + $0x8] sm:$0xff] }
 0x33d   : > { %1639 = vmatprep.mubr.f32.mxu1 %v1528_v47  ;;  %v1531_v52 = vld [vmem:[#allocation5 + $0x20] sm:$0x1]  ;;  %v1530_v53 = vld [vmem:[#allocation5 + $0x18] sm:$0x1] }
 0x340   : > { %v1527_v51 = vld [vmem:[#allocation5] sm:$0xff] }
 0x341   : > { %1640 = vmatmul.mubr.f32.vlgmr.msra.gmra.mrb[32].mxu1 %v1527_v51 }
 0x342   : > { %2084 = vmatpush3.bf16.msra.mxu1 %v2636_v27  ;;  %1644 = vmatprep.mubr.f32.mxu1 %v1531_v52 }
 0x343   : > { %2086 = vmatprep.subr.bf16.mxu1 %v2085_v50 }
 0x345   : > { %1645 = vmatmul.mubr.f32.gmra.mrb[34].mxu1 %v1530_v53 }
 0x346   : > { %2088 = vmatpush3.bf16.msra.mxu1 %v2085_v50  ;;  %2012 = vmatprep.mubr.msk.f32.mxu1 %vm1318_vm4, %v1529_v54 }
 0x349   : > { %2013 = vmatmul.mubr.msk.f32.vlgmr.msra.gmra.mrb[36].mxu1 %vm1318_vm4, %v1532_v55 }
 0x414   : > { %v1897_v56 = vpop.f32.mrb[32].mxu1 }
 0x415   : > { %v1898_v57 = vpop.f32.mrb[33].mxu1 }
 0x416   : > { %v1899_v58 = vadd.f32 %v1898_v57, %v1897_v56 }
 0x418   : > { %v1900_v59 = vpop.f32.mrb[34].mxu1 }
 0x419   : > { %v1901_v60 = vpop.f32.mrb[35].mxu1 }
 0x41a   : > { %v1902_v61 = vadd.f32 %v1901_v60, %v1900_v59 }
 0x41c   : > { %v2014_v62 = vpop.f32.mrb[36].mxu1 }
 0x41d   : > { %v1722_v63 = vadd.f32 %v2014_v62, %v1902_v61  ;;  %v1716_v0 = vpop.f32.mrb[37].mxu1 }
 0x41e   : > { %v1717_v1 = vadd.f32 %v1899_v58, %v1716_v0 }
 0x41f   : > { %1726 = vst.msk [vmem:[%s197_s14 + $0x8] sm:$0x1] %vm1325_vm7, %v1722_v63 }
 0x420   : > { %1725 = vst.msk [vmem:[%s197_s14] sm:$0xff] %vm1318_vm4, %v1717_v1 }
 0x421 PF: > { %s14_s15 = sadd.s32 1, %s2119_s15  }
 0x422   : > { %p11_p4 = scmp.ge.s32.totalorder %s14_s15, 4  }
 0x424   :  { %13 = sbr.rel (!%p11_p4) target bundleno = 1 (0x1), region = 130 }

</bundles_post_ra>
